<compile_context>
chip_gen: v7x
topology: tpu7x:2x2x1
jax: 0.10.0
libtpu: 0.0.40
codegen_flags: <defaults>
</compile_context>

<pallas_src>
import jax
import jax.numpy as jnp
from jax.experimental import pallas as pl
from jax.experimental.pallas import tpu as pltpu

BASE_OUT = 1000  # base_model output features (ImageNet-style 1000 logits)


def _round_up(v, m):
    return ((v + m - 1) // m) * m


def _vmem_limit_bytes():
    """~75% of this generation's VMEM, never above 96 MiB (v7x has only 64 MiB)."""
    try:
        cap = int(pltpu.get_tpu_info().vmem_capacity_bytes)
        return min(cap * 3 // 4, 96 * 1024 * 1024)
    except Exception:
        return 48 * 1024 * 1024  # conservative fallback, safe on v5e/v6e/v7x


def _contrastive_kernel(x_ref, wb_ref, bb_ref, w1_ref, b1_ref, o_ref, acc_ref):
    """Grid = (batch tiles, F-reduction tiles).

    acc[tm, K_pad] (f32) accumulates x_tile @ wb_tile over the F reduction.
    At the last k step: feats = acc + bb ; h = relu(feats) ; out = h @ w1 + b1.
    """
    k = pl.program_id(1)

    @pl.when(k == 0)
    def _():
        acc_ref[...] = jnp.zeros_like(acc_ref)

    # base_model stand-in: partial [tm, tk] @ [tk, K_pad] on the MXU (bf16 -> f32 acc)
    acc_ref[...] += jnp.dot(
        x_ref[...], wb_ref[...], preferred_element_type=jnp.float32
    )

    @pl.when(k == pl.num_programs(1) - 1)
    def _():
        feats = acc_ref[...] + bb_ref[...]                 # [tm, K_pad] f32
        h = jnp.maximum(feats, 0.0).astype(w1_ref.dtype)   # ReLU, bf16 for the MXU
        out = jnp.dot(h, w1_ref[...], preferred_element_type=jnp.float32)
        o_ref[...] = (out + b1_ref[...]).astype(o_ref.dtype)


def prepare_params(params, *, tk=2048):
    """Pads params to lane-aligned shapes and casts weights to bf16 (biases f32).

    Returns a dict of device arrays plus the tiling metadata used by the kernel.
    """
    wb, bb, w1, b1 = params["wb"], params["bb"], params["w1"], params["b1"]
    F, K = wb.shape
    H = w1.shape[1]

    K_pad = _round_up(K, 128)
    H_pad = _round_up(H, 128)
    tk_eff = min(tk, _round_up(F, 128))
    F_pad = _round_up(F, tk_eff)

    wb_p = jnp.zeros((F_pad, K_pad), jnp.bfloat16).at[:F, :K].set(wb.astype(jnp.bfloat16))
    bb_p = jnp.zeros((1, K_pad), jnp.float32).at[:, :K].set(bb.astype(jnp.float32))
    w1_p = jnp.zeros((K_pad, H_pad), jnp.bfloat16).at[:K, :H].set(w1.astype(jnp.bfloat16))
    b1_p = jnp.zeros((1, H_pad), jnp.float32).at[:, :H].set(b1.astype(jnp.float32))

    return dict(wb=wb_p, bb=bb_p, w1=w1_p, b1=b1_p,
                F=F, K=K, H=H, F_pad=F_pad, K_pad=K_pad, H_pad=H_pad, tk=tk_eff)


def contrastive_net_forward(x_nchw, prepared):
    """ContrastiveNet forward: [B, C, H, W] -> [B, hidden_dim] (f32)."""
    B = x_nchw.shape[0]
    F, H = prepared["F"], prepared["H"]
    F_pad, K_pad, H_pad = prepared["F_pad"], prepared["K_pad"], prepared["H_pad"]
    tk = prepared["tk"]

    x = x_nchw.reshape(B, -1).astype(jnp.bfloat16)   # glue: flatten NCHW -> [B, F]
    assert x.shape[1] == F, (x.shape, F)

    # Batch tile: 128 for real batches, sublane-aligned tile for tiny batches.
    tm = 128 if B >= 128 else _round_up(B, 8)
    B_pad = _round_up(B, tm)
    x_p = jnp.zeros((B_pad, F_pad), jnp.bfloat16).at[:B, :F].set(x)

    grid = (B_pad // tm, F_pad // tk)

    flops = 2 * B_pad * (F_pad * K_pad + K_pad * H_pad)
    bytes_accessed = (x_p.size * 2 + prepared["wb"].size * 2 + prepared["w1"].size * 2
                      + prepared["bb"].size * 4 + prepared["b1"].size * 4
                      + B_pad * H_pad * 4)

    out = pl.pallas_call(
        _contrastive_kernel,
        out_shape=jax.ShapeDtypeStruct((B_pad, H_pad), jnp.float32),
        grid_spec=pltpu.PrefetchScalarGridSpec(
            num_scalar_prefetch=0,
            grid=grid,
            in_specs=[
                pl.BlockSpec((tm, tk), lambda i, k: (i, k)),        # x tile
                pl.BlockSpec((tk, K_pad), lambda i, k: (k, 0)),     # wb tile (streamed over F)
                pl.BlockSpec((1, K_pad), lambda i, k: (0, 0)),      # bb (VMEM-resident)
                pl.BlockSpec((K_pad, H_pad), lambda i, k: (0, 0)),  # w1 (VMEM-resident)
                pl.BlockSpec((1, H_pad), lambda i, k: (0, 0)),      # b1 (VMEM-resident)
            ],
            out_specs=pl.BlockSpec((tm, H_pad), lambda i, k: (i, 0)),
            scratch_shapes=[pltpu.VMEM((tm, K_pad), jnp.float32)],  # f32 accumulator
        ),
        compiler_params=pltpu.CompilerParams(
            dimension_semantics=("parallel", "arbitrary"),
            vmem_limit_bytes=_vmem_limit_bytes(),
        ),
        cost_estimate=pl.CostEstimate(
            flops=flops, transcendentals=0, bytes_accessed=bytes_accessed),
    )(x_p, prepared["wb"], prepared["bb"], prepared["w1"], prepared["b1"])

    return out[:B, :H]


def init_params(key, in_features, hidden_dim=128, base_out=BASE_OUT):
    """Deterministic parameter init (shapes follow the module's __init__).

    Weights are stored [in_features, out_features] (PyTorch nn.Linear keeps
    [out, in]; we transpose once at setup time)."""
    k0, k1, k2, k3 = jax.random.split(key, 4)
    wb = jax.random.normal(k0, (in_features, base_out), jnp.float32) * 0.02
    bb = jax.random.normal(k1, (1, base_out), jnp.float32) * 0.02
    w1 = jax.random.normal(k2, (base_out, hidden_dim), jnp.float32) * 0.02
    b1 = jax.random.normal(k3, (1, hidden_dim), jnp.float32) * 0.02
    return {"wb": wb, "bb": bb, "w1": w1, "b1": b1}


def _reference(x_nchw, params):
    """Pure-JAX reference mirroring the kernel's bf16 matmul / f32 accumulate."""
    x = x_nchw.reshape(x_nchw.shape[0], -1).astype(jnp.bfloat16)
    wb = params["wb"].astype(jnp.bfloat16)
    w1 = params["w1"].astype(jnp.bfloat16)
    feats = jnp.dot(x, wb, preferred_element_type=jnp.float32) + params["bb"]
    h = jnp.maximum(feats, 0.0).astype(jnp.bfloat16)
    return jnp.dot(h, w1, preferred_element_type=jnp.float32) + params["b1"]


if __name__ == "__main__":
    key = jax.random.PRNGKey(0)
    kx, kp = jax.random.split(key)

    # Small, module-consistent shapes: batch=2, channels=4, spatial=16x16.
    B, C, Himg, Wimg = 2, 4, 16, 16
    hidden_dim = 128
    x = jax.random.normal(kx, (B, C, Himg, Wimg), jnp.float32)

    params = init_params(kp, in_features=C * Himg * Wimg, hidden_dim=hidden_dim)
    prepared = prepare_params(params)

    out = contrastive_net_forward(x, prepared)
    out = jax.block_until_ready(out)

    ref = _reference(x, params)
    assert out.shape == (B, hidden_dim), out.shape
    assert jnp.allclose(out, ref, atol=1e-2, rtol=1e-2), float(jnp.max(jnp.abs(out - ref)))

    print("KERNEL_OK")
</pallas_src>

<mosaic_0001>
module attributes {stable_mosaic.version = 11 : i64} {
  func.func @_contrastive_kernel(%arg0: i32, %arg1: i32, %arg2: memref<8x1024xbf16, #tpu.memory_space<vmem>>, %arg3: memref<1024x1024xbf16, #tpu.memory_space<vmem>>, %arg4: memref<1x1024xf32, #tpu.memory_space<vmem>>, %arg5: memref<1024x128xbf16, #tpu.memory_space<vmem>>, %arg6: memref<1x128xf32, #tpu.memory_space<vmem>>, %arg7: memref<8x128xf32, #tpu.memory_space<vmem>>, %arg8: memref<8x1024xf32, #tpu.memory_space<vmem>>) attributes {dimension_semantics = [#tpu.dimension_semantics<parallel>, #tpu.dimension_semantics<arbitrary>], iteration_bounds = array<i64: 1, 1>, scalar_prefetch = 0 : i64, scratch_operands = 1 : i64, tpu.core_type = #tpu.core_type<tc>, window_params = [{transform_indices = @transform_0, window_bounds = array<i64: 8, 1024>}, {transform_indices = @transform_1, window_bounds = array<i64: 1024, 1024>}, {pipeline_mode = #tpu.pipeline_mode<synchronous>, transform_indices = @transform_2, window_bounds = array<i64: 1, 1024>}, {pipeline_mode = #tpu.pipeline_mode<synchronous>, transform_indices = @transform_3, window_bounds = array<i64: 1024, 128>}, {pipeline_mode = #tpu.pipeline_mode<synchronous>, transform_indices = @transform_4, window_bounds = array<i64: 1, 128>}, {transform_indices = @transform_5, window_bounds = array<i64: 8, 128>}]} {
    %c0_i32 = arith.constant 0 : i32
    %0 = arith.cmpi eq, %arg1, %c0_i32 : i32
    %1 = arith.extui %0 : i1 to i32
    %c0_i32_0 = arith.constant 0 : i32
    %2 = arith.cmpi ne, %1, %c0_i32_0 : i32
    scf.if %2 {
      %cst_10 = arith.constant 0.000000e+00 : f32
      %12 = vector.broadcast %cst_10 : f32 to vector<8x1024xf32>
      %c0_11 = arith.constant 0 : index
      %c0_12 = arith.constant 0 : index
      %13 = vector.load %arg8[%c0_11, %c0_12] : memref<8x1024xf32, #tpu.memory_space<vmem>>, vector<8x1024xf32>
      tpu.vector_store %arg8[%c0_11, %c0_12], %12 {strides = array<i32>} : memref<8x1024xf32, #tpu.memory_space<vmem>>, vector<8x1024xf32>,
    } else {
    }
    %c0 = arith.constant 0 : index
    %c0_1 = arith.constant 0 : index
    %3 = vector.load %arg8[%c0, %c0_1] : memref<8x1024xf32, #tpu.memory_space<vmem>>, vector<8x1024xf32>
    %c0_2 = arith.constant 0 : index
    %c0_3 = arith.constant 0 : index
    %4 = vector.load %arg2[%c0_2, %c0_3] : memref<8x1024xbf16, #tpu.memory_space<vmem>>, vector<8x1024xbf16>
    %c0_4 = arith.constant 0 : index
    %c0_5 = arith.constant 0 : index
    %5 = vector.load %arg3[%c0_4, %c0_5] : memref<1024x1024xbf16, #tpu.memory_space<vmem>>, vector<1024x1024xbf16>
    %cst = arith.constant dense<0.000000e+00> : vector<8x1024xf32>
    %6 = tpu.matmul %4, %5, %cst {dimension_numbers = #tpu.dot_dimension_numbers<[1], [0], [0], [1], [0, 0, 1, 1], [], []>} : vector<8x1024xbf16>, vector<1024x1024xbf16>, vector<8x1024xf32> -> vector<8x1024xf32>
    %7 = arith.addf %3, %6 : vector<8x1024xf32>
    %c0_6 = arith.constant 0 : index
    %c0_7 = arith.constant 0 : index
    %8 = vector.load %arg8[%c0_6, %c0_7] : memref<8x1024xf32, #tpu.memory_space<vmem>>, vector<8x1024xf32>
    tpu.vector_store %arg8[%c0_6, %c0_7], %7 {strides = array<i32>} : memref<8x1024xf32, #tpu.memory_space<vmem>>, vector<8x1024xf32>,
    %c0_i32_8 = arith.constant 0 : i32
    %9 = arith.cmpi eq, %arg1, %c0_i32_8 : i32
    %10 = arith.extui %9 : i1 to i32
    %c0_i32_9 = arith.constant 0 : i32
    %11 = arith.cmpi ne, %10, %c0_i32_9 : i32
    scf.if %11 {
      %c0_10 = arith.constant 0 : index
      %c0_11 = arith.constant 0 : index
      %12 = vector.load %arg8[%c0_10, %c0_11] : memref<8x1024xf32, #tpu.memory_space<vmem>>, vector<8x1024xf32>
      %c0_12 = arith.constant 0 : index
      %c0_13 = arith.constant 0 : index
      %13 = vector.load %arg4[%c0_12, %c0_13] : memref<1x1024xf32, #tpu.memory_space<vmem>>, vector<1x1024xf32>
      %14 = vector.broadcast %13 : vector<1x1024xf32> to vector<8x1024xf32>
      %15 = arith.addf %12, %14 : vector<8x1024xf32>
      %cst_14 = arith.constant 0.000000e+00 : f32
      %16 = vector.broadcast %cst_14 : f32 to vector<8x1024xf32>
      %17 = arith.maximumf %15, %16 : vector<8x1024xf32>
      %18 = arith.truncf %17 : vector<8x1024xf32> to vector<8x1024xbf16>
      %c0_15 = arith.constant 0 : index
      %c0_16 = arith.constant 0 : index
      %19 = vector.load %arg5[%c0_15, %c0_16] : memref<1024x128xbf16, #tpu.memory_space<vmem>>, vector<1024x128xbf16>
      %cst_17 = arith.constant dense<0.000000e+00> : vector<8x128xf32>
      %20 = tpu.matmul %18, %19, %cst_17 {dimension_numbers = #tpu.dot_dimension_numbers<[1], [0], [0], [1], [0, 0, 1, 1], [], []>} : vector<8x1024xbf16>, vector<1024x128xbf16>, vector<8x128xf32> -> vector<8x128xf32>
      %c0_18 = arith.constant 0 : index
      %c0_19 = arith.constant 0 : index
      %21 = vector.load %arg6[%c0_18, %c0_19] : memref<1x128xf32, #tpu.memory_space<vmem>>, vector<1x128xf32>
      %22 = vector.broadcast %21 : vector<1x128xf32> to vector<8x128xf32>
      %23 = arith.addf %20, %22 : vector<8x128xf32>
      %c0_20 = arith.constant 0 : index
      %c0_21 = arith.constant 0 : index
      %24 = vector.load %arg7[%c0_20, %c0_21] : memref<8x128xf32, #tpu.memory_space<vmem>>, vector<8x128xf32>
      tpu.vector_store %arg7[%c0_20, %c0_21], %23 {strides = array<i32>} : memref<8x128xf32, #tpu.memory_space<vmem>>, vector<8x128xf32>,
    } else {
    }
    return
  }
  func.func @transform_0(%arg0: i32, %arg1: i32) -> (i32, i32) {
    %c0_i32 = arith.constant 0 : i32
    return %arg0, %arg1 : i32, i32
  }
  func.func @transform_1(%arg0: i32, %arg1: i32) -> (i32, i32) {
    %c0_i32 = arith.constant 0 : i32
    %c0_i32_0 = arith.constant 0 : i32
    return %arg1, %c0_i32 : i32, i32
  }
  func.func @transform_2(%arg0: i32, %arg1: i32) -> (i32, i32) {
    %c0_i32 = arith.constant 0 : i32
    %c0_i32_0 = arith.constant 0 : i32
    %c0_i32_1 = arith.constant 0 : i32
    return %c0_i32, %c0_i32_0 : i32, i32
  }
  func.func @transform_3(%arg0: i32, %arg1: i32) -> (i32, i32) {
    %c0_i32 = arith.constant 0 : i32
    %c0_i32_0 = arith.constant 0 : i32
    %c0_i32_1 = arith.constant 0 : i32
    return %c0_i32, %c0_i32_0 : i32, i32
  }
  func.func @transform_4(%arg0: i32, %arg1: i32) -> (i32, i32) {
    %c0_i32 = arith.constant 0 : i32
    %c0_i32_0 = arith.constant 0 : i32
    %c0_i32_1 = arith.constant 0 : i32
    return %c0_i32, %c0_i32_0 : i32, i32
  }
  func.func @transform_5(%arg0: i32, %arg1: i32) -> (i32, i32) {
    %c0_i32 = arith.constant 0 : i32
    %c0_i32_0 = arith.constant 0 : i32
    return %arg0, %c0_i32 : i32, i32
  }
}

</mosaic_0001>

<bundles_post_ra>
// kernel: tpu_custom_call.1
= control target key start
LH: loop header
LB: loop body
LE: loop exit
PB: predicated region body
PF: predicated region fallthrough
CT: control target
= control target key end

     0   :  { %10 = vsyncpa [#allocation4], 0  ;;  %s5783_s0 = inlined_call_operand.hbm [shape: bf16[8,1024], index: 0, kind: input, shape index: {}]   ;;  %s5784_s1 = inlined_call_operand.hbm [shape: bf16[1024,1024], index: 1, kind: input, shape index: {}]   ;;  %s5785_s2 = inlined_call_operand.hbm [shape: f32[1,1024], index: 2, kind: input, shape index: {}]   ;;  %s5786_s3 = inlined_call_operand.hbm [shape: bf16[1024,128], index: 3, kind: input, shape index: {}]   ;;  %s5787_s4 = inlined_call_operand.hbm [shape: f32[1,128], index: 4, kind: input, shape index: {}]   ;;  %s5788_s5 = inlined_call_operand.hbm [shape: f32[8,128], index: 5, kind: output, shape index: {}]  }
   0x1   :  { %11 = vsyncpa [#allocation7], 0 }
   0x2   :  { %12 = vsyncpa [#allocation10], 0 }
   0x3   :  { %13 = vsyncpa [#allocation5], 0  ;;  %s5549_s18 = smov [#allocation6]   ;;  %s5409_s22 = scalar_lea.hbm %s5784_s1, 65536 }
   0x4   :  { %s29_s19 = sshll.u32 %s5549_s18, 4  ;;  %p5410_p0 = scmp.ne.s32.totalorder %s5784_s1, %s5409_s22  ;;  %s30_s19 = int_to_ptr.vmem [resolvable:$true] %s29_s19 }
   0x5   :  { %p5413_p1 = scmp.lt.u32.totalorder %s5409_s22, %s5784_s1 }
   0x7   :  { %p5415_p2 = pnand %p5413_p1, %p5410_p0 }
   0x9   :  { %5418 = shalt.err (!%p5415_p2)
}
   0xa   :  { %s5419_s27 = scalar_lea.vmem %s30_s19, 65536  ;;  %p5424_p4 = scmp.lt.s32.totalorder %s30_s19, %s30_s19 }
   0xb   :  { %p5420_p3 = scmp.ne.s32.totalorder %s30_s19, %s5419_s27  ;;  %p5425_p5 = scmp.lt.s32.totalorder %s5419_s27, %s5419_s27 }
   0xd   :  { %p5426_p6 = por %p5425_p5, %p5424_p4 }
   0xf   :  { %p5427_p7 = pnand %p5426_p6, %p5420_p3 }
  0x11   :  { %5430 = shalt.err (!%p5427_p7)
}
  0x12   :  { %s5550_s28 = smov 512   ;;  %s5551_s29 = smov 32  }
  0x13   :  { %35 = dma.hbm_to_vmem [thread:$0]  %s5784_s1, 65536, %s30_s19, [#allocation7], %s5550_s28, %s5550_s28, %s5551_s29  }
  0x14   :  { %s5552_s7 = smov [#allocation9]   ;;  %s5431_s11 = scalar_lea.hbm %s5786_s3, 8192 }
  0x15   :  { %s51_s8 = sshll.u32 %s5552_s7, 4  ;;  %p5432_p8 = scmp.ne.s32.totalorder %s5786_s3, %s5431_s11  ;;  %s52_s8 = int_to_ptr.vmem [resolvable:$true] %s51_s8 }
  0x16   :  { %p5435_p9 = scmp.lt.u32.totalorder %s5431_s11, %s5786_s3 }
  0x18   :  { %p5437_p10 = pnand %p5435_p9, %p5432_p8 }
  0x1a   :  { %5440 = shalt.err (!%p5437_p10)
}
  0x1b   :  { %s5441_s16 = scalar_lea.vmem %s52_s8, 8192  ;;  %p5446_p12 = scmp.lt.s32.totalorder %s52_s8, %s52_s8 }
  0x1c   :  { %p5442_p11 = scmp.ne.s32.totalorder %s52_s8, %s5441_s16  ;;  %p5447_p13 = scmp.lt.s32.totalorder %s5441_s16, %s5441_s16 }
  0x1e   :  { %p5448_p0 = por %p5447_p13, %p5446_p12 }
  0x20   :  { %p5449_p1 = pnand %p5448_p0, %p5442_p11 }
  0x22   :  { %5452 = shalt.err (!%p5449_p1)
}
  0x23   :  { %s5553_s1 = smov 64   ;;  %s5554_s17 = smov 4  }
  0x24   :  { %57 = dma.hbm_to_vmem [thread:$0]  %s5786_s3, 8192, %s52_s8, [#allocation10], %s5553_s1, %s5553_s1, %s5554_s17  }
  0x25   :  { %s5555_s20 = smov [#allocation3]   ;;  %s5556_s22 = smov [#allocation8]  }
  0x26   :  { %s20_s21 = sshll.u32 %s5555_s20, 4  ;;  %s42_s23 = sshll.u32 %s5556_s22, 4  ;;  %s21_s21 = int_to_ptr.vmem [resolvable:$true] %s20_s21  ;;  %s43_s23 = int_to_ptr.vmem [resolvable:$true] %s42_s23 }
  0x27   :  { %s5453_s26 = scalar_lea.hbm %s5783_s0, 512 }
  0x28   :  { %p5454_p2 = scmp.ne.s32.totalorder %s5783_s0, %s5453_s26  ;;  %p5457_p3 = scmp.lt.u32.totalorder %s5453_s26, %s5783_s0 }
  0x2a   :  { %p5459_p4 = pnand %p5457_p3, %p5454_p2 }
  0x2c   :  { %5462 = shalt.err (!%p5459_p4)
}
  0x2d   :  { %s5463_s3 = scalar_lea.vmem %s21_s21, 512  ;;  %p5468_p6 = scmp.lt.s32.totalorder %s21_s21, %s21_s21 }
  0x2e   :  { %p5464_p5 = scmp.ne.s32.totalorder %s21_s21, %s5463_s3  ;;  %p5469_p7 = scmp.lt.s32.totalorder %s5463_s3, %s5463_s3 }
  0x30   :  { %p5470_p8 = por %p5469_p7, %p5468_p6 }
  0x32   :  { %p5471_p9 = pnand %p5470_p8, %p5464_p5 }
  0x34   :  { %5474 = shalt.err (!%p5471_p9)
}
  0x35   :  { %23 = dma.hbm_to_vmem [thread:$0]  %s5783_s0, 512, %s21_s21, [#allocation4]  }
  0x36   :  { %s5475_s10 = scalar_lea.hbm %s5785_s2, 128 }
  0x37   :  { %p5476_p10 = scmp.ne.s32.totalorder %s5785_s2, %s5475_s10  ;;  %p5479_p11 = scmp.lt.u32.totalorder %s5475_s10, %s5785_s2 }
  0x39   :  { %p5481_p12 = pnand %p5479_p11, %p5476_p10 }
  0x3b   :  { %5484 = shalt.err (!%p5481_p12)
}
  0x3c   :  { %s5485_s15 = scalar_lea.vmem %s43_s23, 128  ;;  %p5490_p0 = scmp.lt.s32.totalorder %s43_s23, %s43_s23 }
  0x3d   :  { %p5486_p13 = scmp.ne.s32.totalorder %s43_s23, %s5485_s15  ;;  %p5491_p1 = scmp.lt.s32.totalorder %s5485_s15, %s5485_s15 }
  0x3f   :  { %p5492_p2 = por %p5491_p1, %p5490_p0 }
  0x41   :  { %p5493_p3 = pnand %p5492_p2, %p5486_p13 }
  0x43   :  { %5496 = shalt.err (!%p5493_p3)
}
  0x44   :  { %45 = dma.hbm_to_vmem [thread:$0]  %s5785_s2, 128, %s43_s23, [#allocation7]  }
  0x45   :  { %s5557_s1 = smov [#allocation11]   ;;  %s5497_s20 = scalar_lea.hbm %s5787_s4, 16 }
  0x46   :  { %s64_s17 = sshll.u32 %s5557_s1, 4  ;;  %p5498_p4 = scmp.ne.s32.totalorder %s5787_s4, %s5497_s20  ;;  %s65_s17 = int_to_ptr.vmem [resolvable:$true] %s64_s17 }
  0x47   :  { %p5501_p5 = scmp.lt.u32.totalorder %s5497_s20, %s5787_s4 }
  0x49   :  { %p5503_p6 = pnand %p5501_p5, %p5498_p4 }
  0x4b   :  { %5506 = shalt.err (!%p5503_p6)
}
  0x4c   :  { %s5507_s26 = scalar_lea.vmem %s65_s17, 16  ;;  %s5511_s2 = scalar_lea.vmem %s65_s17, 32 }
  0x4d   :  { %p5508_p7 = scmp.ne.s32.totalorder %s65_s17, %s5507_s26  ;;  %p5512_p8 = scmp.lt.s32.totalorder %s65_s17, %s65_s17 }
  0x4e   :  { %p5513_p9 = scmp.lt.s32.totalorder %s5511_s2, %s5507_s26 }
  0x50   :  { %p5514_p10 = por %p5513_p9, %p5512_p8 }
  0x52   :  { %p5515_p11 = pnand %p5514_p10, %p5508_p7 }
  0x54   :  { %5518 = shalt.err (!%p5515_p11)
}
  0x55   :  { %67 = dma.hbm_to_vmem [thread:$0]  %s5787_s4, 16, %s65_s17, [#allocation10]  }
  0x56   :  { %5541 = dma.done.wait [#allocation4], 512  }
  0x57   :  { %5542 = vsyncadd [#allocation4], 4294966784 }
  0x58   :  { %5543 = dma.done.wait [#allocation7], 65664  }
  0x59   :  { %5544 = vsyncadd [#allocation7], 4294901632 }
  0x5a   :  { %5545 = dma.done.wait [#allocation10], 8208  }
  0x5b   :  { %5546 = vsyncadd [#allocation10], 4294959088  ;;  %v108_v0 = vld [vmem:[#allocation6] sm:$0xff]  ;;  %v5651_v54 = vld [vmem:[#allocation3 + $0x8] sm:$0xff]  ;;  %s5558_s4 = smov [#allocation12]  }
  0x5c   :  { %v112_v1 = vld [vmem:[#allocation6 + $0x20] sm:$0xff]  ;;  %v5659_v59 = vcombine.high %v5651_v54, %v5651_v54  ;;  %s4643_s28 = sshll.u32 %s5558_s4, 4  ;;  %s4644_s28 = int_to_ptr.vmem [resolvable:$true] %s4643_s28 }
  0x5d   :  { %v236_v2 = vld [vmem:[#allocation6 + $0x400] sm:$0xff]  ;;  %v4663_v3 = vcombine.high %v108_v0, %v112_v1  ;;  %v4662_v5 = vcombine.low %v108_v0, %v112_v1  ;;  %s5519_s29 = scalar_lea.vmem %s4644_s28, 128  ;;  %p5524_p13 = scmp.lt.s32.totalorder %s4644_s28, %s4644_s28 }
  0x5e   :  { %v240_v4 = vld [vmem:[#allocation6 + $0x420] sm:$0xff]  ;;  %3281 = vmatprep.mubr.bf16.mxu1 %v5659_v59  ;;  %p5520_p12 = scmp.ne.s32.totalorder %s4644_s28, %s5519_s29  ;;  %p5525_p0 = scmp.lt.s32.totalorder %s5519_s29, %s5519_s29 }
  0x5f   :  { %v116_v6 = vld [vmem:[#allocation6 + $0x40] sm:$0xff]  ;;  %v4791_v8 = vcombine.high %v236_v2, %v240_v4  ;;  %v4790_v9 = vcombine.low %v236_v2, %v240_v4  ;;  %3208 = vmatprep.subr.bf16.mxu0 %v4663_v3 }
  0x60   :  { %v120_v7 = vld [vmem:[#allocation6 + $0x60] sm:$0xff]  ;;  %3209 = vmatpush1.bf16.msra.mxu0 %v4662_v5  ;;  %p5526_p1 = por %p5525_p0, %p5524_p13 }
  0x61   :  { %v4671_v10 = vcombine.high %v116_v6, %v120_v7  ;;  %v244_v11 = vld [vmem:[#allocation6 + $0x440] sm:$0xff]  ;;  %3249 = vmatprep.subr.bf16.mxu1 %v4791_v8  ;;  %v4670_v18 = vcombine.low %v116_v6, %v120_v7 }
  0x62   :  { %v248_v12 = vld [vmem:[#allocation6 + $0x460] sm:$0xff]  ;;  %3250 = vmatpush1.bf16.msra.mxu1 %v4790_v9  ;;  %p5527_p2 = pnand %p5526_p1, %p5520_p12 }
  0x63   :  { %v124_v13 = vld [vmem:[#allocation6 + $0x80] sm:$0xff]  ;;  %v4799_v14 = vcombine.high %v244_v11, %v248_v12  ;;  %3210 = vmatprep.subr.bf16.mxu0 %v4671_v10  ;;  %v4798_v19 = vcombine.low %v244_v11, %v248_v12 }
  0x64   :  { %v128_v15 = vld [vmem:[#allocation6 + $0xa0] sm:$0xff]  ;;  %3211 = vmatpush1.bf16.msra.mxu0 %v4670_v18 }
  0x65   :  { %v252_v16 = vld [vmem:[#allocation6 + $0x480] sm:$0xff]  ;;  %v4679_v20 = vcombine.high %v124_v13, %v128_v15  ;;  %3251 = vmatprep.subr.bf16.mxu1 %v4799_v14  ;;  %v4678_v26 = vcombine.low %v124_v13, %v128_v15 }
  0x66   :  { %v256_v17 = vld [vmem:[#allocation6 + $0x4a0] sm:$0xff]  ;;  %3252 = vmatpush1.bf16.msra.mxu1 %v4798_v19 }
  0x67   :  { %v4807_v21 = vcombine.high %v252_v16, %v256_v17  ;;  %v132_v22 = vld [vmem:[#allocation6 + $0xc0] sm:$0xff]  ;;  %3212 = vmatprep.subr.bf16.mxu0 %v4679_v20  ;;  %v4806_v27 = vcombine.low %v252_v16, %v256_v17 }
  0x68   :  { %v136_v23 = vld [vmem:[#allocation6 + $0xe0] sm:$0xff]  ;;  %3213 = vmatpush1.bf16.msra.mxu0 %v4678_v26 }
  0x69   :  { %v260_v24 = vld [vmem:[#allocation6 + $0x4c0] sm:$0xff]  ;;  %v4687_v28 = vcombine.high %v132_v22, %v136_v23  ;;  %3253 = vmatprep.subr.bf16.mxu1 %v4807_v21  ;;  %v4686_v34 = vcombine.low %v132_v22, %v136_v23 }
  0x6a   :  { %v264_v25 = vld [vmem:[#allocation6 + $0x4e0] sm:$0xff]  ;;  %3254 = vmatpush1.bf16.msra.mxu1 %v4806_v27 }
  0x6b   :  { %v4815_v29 = vcombine.high %v260_v24, %v264_v25  ;;  %v140_v30 = vld [vmem:[#allocation6 + $0x100] sm:$0xff]  ;;  %3214 = vmatprep.subr.bf16.mxu0 %v4687_v28  ;;  %v4814_v35 = vcombine.low %v260_v24, %v264_v25 }
  0x6c   :  { %v144_v31 = vld [vmem:[#allocation6 + $0x120] sm:$0xff]  ;;  %3215 = vmatpush1.bf16.msra.mxu0 %v4686_v34 }
  0x6d   :  { %v268_v32 = vld [vmem:[#allocation6 + $0x500] sm:$0xff]  ;;  %v4695_v36 = vcombine.high %v140_v30, %v144_v31  ;;  %3255 = vmatprep.subr.bf16.mxu1 %v4815_v29  ;;  %v4694_v42 = vcombine.low %v140_v30, %v144_v31 }
  0x6e   :  { %v272_v33 = vld [vmem:[#allocation6 + $0x520] sm:$0xff]  ;;  %3256 = vmatpush1.bf16.msra.mxu1 %v4814_v35 }
  0x6f   :  { %v4823_v37 = vcombine.high %v268_v32, %v272_v33  ;;  %v148_v38 = vld [vmem:[#allocation6 + $0x140] sm:$0xff]  ;;  %3216 = vmatprep.subr.bf16.mxu0 %v4695_v36  ;;  %v4822_v43 = vcombine.low %v268_v32, %v272_v33 }
  0x70   :  { %v152_v39 = vld [vmem:[#allocation6 + $0x160] sm:$0xff]  ;;  %3217 = vmatpush1.bf16.msra.mxu0 %v4694_v42 }
  0x71   :  { %v276_v40 = vld [vmem:[#allocation6 + $0x540] sm:$0xff]  ;;  %v4703_v44 = vcombine.high %v148_v38, %v152_v39  ;;  %3257 = vmatprep.subr.bf16.mxu1 %v4823_v37  ;;  %v4702_v50 = vcombine.low %v148_v38, %v152_v39 }
  0x72   :  { %v280_v41 = vld [vmem:[#allocation6 + $0x560] sm:$0xff]  ;;  %3258 = vmatpush1.bf16.msra.mxu1 %v4822_v43 }
  0x73   :  { %v4831_v45 = vcombine.high %v276_v40, %v280_v41  ;;  %v156_v46 = vld [vmem:[#allocation6 + $0x180] sm:$0xff]  ;;  %3218 = vmatprep.subr.bf16.mxu0 %v4703_v44  ;;  %v4830_v51 = vcombine.low %v276_v40, %v280_v41 }
  0x74   :  { %v160_v47 = vld [vmem:[#allocation6 + $0x1a0] sm:$0xff]  ;;  %3219 = vmatpush1.bf16.msra.mxu0 %v4702_v50 }
  0x75   :  { %v284_v48 = vld [vmem:[#allocation6 + $0x580] sm:$0xff]  ;;  %v4711_v52 = vcombine.high %v156_v46, %v160_v47  ;;  %3259 = vmatprep.subr.bf16.mxu1 %v4831_v45  ;;  %v4710_v62 = vcombine.low %v156_v46, %v160_v47 }
  0x76   :  { %v288_v49 = vld [vmem:[#allocation6 + $0x5a0] sm:$0xff]  ;;  %3260 = vmatpush1.bf16.msra.mxu1 %v4830_v51 }
  0x77   :  { %v5649_v53 = vld [vmem:[#allocation3] sm:$0xff]  ;;  %v4839_v55 = vcombine.high %v284_v48, %v288_v49  ;;  %3220 = vmatprep.subr.bf16.mxu0 %v4711_v52  ;;  %v4838_v63 = vcombine.low %v284_v48, %v288_v49 }
  0x78   :  { %v164_v56 = vld [vmem:[#allocation6 + $0x1c0] sm:$0xff]  ;;  %v5655_v58 = vcombine.high %v5649_v53, %v5649_v53  ;;  %3221 = vmatpush1.bf16.msra.mxu0 %v4710_v62 }
  0x79   :  { %v168_v57 = vld [vmem:[#allocation6 + $0x1e0] sm:$0xff]  ;;  %3261 = vmatprep.subr.bf16.mxu1 %v4839_v55 }
  0x7a   :  { %v292_v60 = vld [vmem:[#allocation6 + $0x5c0] sm:$0xff]  ;;  %3240 = vmatprep.mubr.bf16.mxu0 %v5655_v58  ;;  %v4719_v0 = vcombine.high %v164_v56, %v168_v57  ;;  %v4718_v6 = vcombine.low %v164_v56, %v168_v57  ;;  %3262 = vmatpush1.bf16.msra.mxu1 %v4838_v63 }
  0x7b   :  { %v296_v61 = vld [vmem:[#allocation6 + $0x5e0] sm:$0xff] }
  0x7c   :  { %v4847_v1 = vcombine.high %v292_v60, %v296_v61  ;;  %v172_v2 = vld [vmem:[#allocation6 + $0x200] sm:$0xff]  ;;  %3222 = vmatprep.subr.bf16.mxu0 %v4719_v0  ;;  %v4846_v7 = vcombine.low %v292_v60, %v296_v61 }
  0x7d   :  { %v176_v3 = vld [vmem:[#allocation6 + $0x220] sm:$0xff]  ;;  %3223 = vmatpush1.bf16.msra.mxu0 %v4718_v6 }
  0x7e   :  { %v300_v4 = vld [vmem:[#allocation6 + $0x600] sm:$0xff]  ;;  %v4727_v8 = vcombine.high %v172_v2, %v176_v3  ;;  %3263 = vmatprep.subr.bf16.mxu1 %v4847_v1  ;;  %v4726_v14 = vcombine.low %v172_v2, %v176_v3 }
  0x7f   :  { %v304_v5 = vld [vmem:[#allocation6 + $0x620] sm:$0xff]  ;;  %3264 = vmatpush1.bf16.msra.mxu1 %v4846_v7 }
  0x80   :  { %v4855_v9 = vcombine.high %v300_v4, %v304_v5  ;;  %v180_v10 = vld [vmem:[#allocation6 + $0x240] sm:$0xff]  ;;  %3224 = vmatprep.subr.bf16.mxu0 %v4727_v8  ;;  %v4854_v15 = vcombine.low %v300_v4, %v304_v5 }
  0x81   :  { %v184_v11 = vld [vmem:[#allocation6 + $0x260] sm:$0xff]  ;;  %3225 = vmatpush1.bf16.msra.mxu0 %v4726_v14 }
  0x82   :  { %v308_v12 = vld [vmem:[#allocation6 + $0x640] sm:$0xff]  ;;  %v4735_v16 = vcombine.high %v180_v10, %v184_v11  ;;  %3265 = vmatprep.subr.bf16.mxu1 %v4855_v9  ;;  %v4734_v22 = vcombine.low %v180_v10, %v184_v11 }
  0x83   :  { %v312_v13 = vld [vmem:[#allocation6 + $0x660] sm:$0xff]  ;;  %3266 = vmatpush1.bf16.msra.mxu1 %v4854_v15 }
  0x84   :  { %v4863_v17 = vcombine.high %v308_v12, %v312_v13  ;;  %v188_v18 = vld [vmem:[#allocation6 + $0x280] sm:$0xff]  ;;  %3226 = vmatprep.subr.bf16.mxu0 %v4735_v16  ;;  %v4862_v23 = vcombine.low %v308_v12, %v312_v13  ;;  %v5665_v16 = vcombine.low %v5649_v53, %v5649_v53 }
  0x85   :  { %v192_v19 = vld [vmem:[#allocation6 + $0x2a0] sm:$0xff]  ;;  %3227 = vmatpush1.bf16.msra.mxu0 %v4734_v22  ;;  %v5673_v22 = vld [vmem:[#allocation3 + $0x18] sm:$0xff] }
  0x86   :  { %v316_v20 = vld [vmem:[#allocation6 + $0x680] sm:$0xff]  ;;  %v4743_v24 = vcombine.high %v188_v18, %v192_v19  ;;  %3267 = vmatprep.subr.bf16.mxu1 %v4863_v17  ;;  %v4742_v30 = vcombine.low %v188_v18, %v192_v19  ;;  %v5667_v19 = vld [vmem:[#allocation3 + $0x10] sm:$0xff] }
  0x87   :  { %v320_v21 = vld [vmem:[#allocation6 + $0x6a0] sm:$0xff]  ;;  %3268 = vmatpush1.bf16.msra.mxu1 %v4862_v23 }
  0x88   :  { %v4871_v25 = vcombine.high %v316_v20, %v320_v21  ;;  %v196_v26 = vld [vmem:[#allocation6 + $0x2c0] sm:$0xff]  ;;  %3228 = vmatprep.subr.bf16.mxu0 %v4743_v24  ;;  %v4870_v31 = vcombine.low %v316_v20, %v320_v21  ;;  %v5671_v20 = vcombine.low %v5651_v54, %v5651_v54  ;;  %v5682_v54 = vcombine.high %v5673_v22, %v5673_v22 }
  0x89   :  { %v200_v27 = vld [vmem:[#allocation6 + $0x2e0] sm:$0xff]  ;;  %3229 = vmatpush1.bf16.msra.mxu0 %v4742_v30 }
  0x8a   :  { %v324_v28 = vld [vmem:[#allocation6 + $0x6c0] sm:$0xff]  ;;  %v4751_v32 = vcombine.high %v196_v26, %v200_v27  ;;  %3269 = vmatprep.subr.bf16.mxu1 %v4871_v25  ;;  %v4750_v38 = vcombine.low %v196_v26, %v200_v27 }
  0x8b   :  { %v328_v29 = vld [vmem:[#allocation6 + $0x6e0] sm:$0xff]  ;;  %3270 = vmatpush1.bf16.msra.mxu1 %v4870_v31 }
  0x8c   :  { %v4879_v33 = vcombine.high %v324_v28, %v328_v29  ;;  %v204_v34 = vld [vmem:[#allocation6 + $0x300] sm:$0xff]  ;;  %3230 = vmatprep.subr.bf16.mxu0 %v4751_v32  ;;  %v4878_v39 = vcombine.low %v324_v28, %v328_v29  ;;  %v5677_v29 = vcombine.high %v5667_v19, %v5667_v19 }
  0x8d   :  { %v208_v35 = vld [vmem:[#allocation6 + $0x320] sm:$0xff]  ;;  %3231 = vmatpush1.bf16.msra.mxu0 %v4750_v38 }
  0x8e   :  { %v332_v36 = vld [vmem:[#allocation6 + $0x700] sm:$0xff]  ;;  %v4759_v40 = vcombine.high %v204_v34, %v208_v35  ;;  %3271 = vmatprep.subr.bf16.mxu1 %v4879_v33  ;;  %v4758_v46 = vcombine.low %v204_v34, %v208_v35 }
  0x8f   :  { %v336_v37 = vld [vmem:[#allocation6 + $0x720] sm:$0xff]  ;;  %3272 = vmatpush1.bf16.msra.mxu1 %v4878_v39 }
  0x90   :  { %v4887_v41 = vcombine.high %v332_v36, %v336_v37  ;;  %v212_v42 = vld [vmem:[#allocation6 + $0x340] sm:$0xff]  ;;  %3232 = vmatprep.subr.bf16.mxu0 %v4759_v40  ;;  %v4886_v47 = vcombine.low %v332_v36, %v336_v37 }
  0x91   :  { %v216_v43 = vld [vmem:[#allocation6 + $0x360] sm:$0xff]  ;;  %3233 = vmatpush1.bf16.msra.mxu0 %v4758_v46 }
  0x92   :  { %v340_v44 = vld [vmem:[#allocation6 + $0x740] sm:$0xff]  ;;  %v4767_v48 = vcombine.high %v212_v42, %v216_v43  ;;  %3273 = vmatprep.subr.bf16.mxu1 %v4887_v41  ;;  %v4766_v56 = vcombine.low %v212_v42, %v216_v43 }
  0x93   :  { %v344_v45 = vld [vmem:[#allocation6 + $0x760] sm:$0xff]  ;;  %3274 = vmatpush1.bf16.msra.mxu1 %v4886_v47 }
  0x94   :  { %v4895_v49 = vcombine.high %v340_v44, %v344_v45  ;;  %v220_v50 = vld [vmem:[#allocation6 + $0x380] sm:$0xff]  ;;  %3234 = vmatprep.subr.bf16.mxu0 %v4767_v48  ;;  %v4894_v57 = vcombine.low %v340_v44, %v344_v45 }
  0x95   :  { %v224_v51 = vld [vmem:[#allocation6 + $0x3a0] sm:$0xff]  ;;  %3235 = vmatpush1.bf16.msra.mxu0 %v4766_v56 }
  0x96   :  { %v348_v52 = vld [vmem:[#allocation6 + $0x780] sm:$0xff]  ;;  %v4775_v60 = vcombine.high %v220_v50, %v224_v51  ;;  %3275 = vmatprep.subr.bf16.mxu1 %v4895_v49  ;;  %v4774_v2 = vcombine.low %v220_v50, %v224_v51 }
  0x97   :  { %v352_v55 = vld [vmem:[#allocation6 + $0x7a0] sm:$0xff]  ;;  %3276 = vmatpush1.bf16.msra.mxu1 %v4894_v57 }
  0x98   :  { %v4903_v61 = vcombine.high %v348_v52, %v352_v55  ;;  %v228_v62 = vld [vmem:[#allocation6 + $0x3c0] sm:$0xff]  ;;  %3236 = vmatprep.subr.bf16.mxu0 %v4775_v60  ;;  %v4902_v3 = vcombine.low %v348_v52, %v352_v55 }
  0x99   :  { %v232_v63 = vld [vmem:[#allocation6 + $0x3e0] sm:$0xff]  ;;  %3237 = vmatpush1.bf16.msra.mxu0 %v4774_v2 }
  0x9a   :  { %v356_v0 = vld [vmem:[#allocation6 + $0x7c0] sm:$0xff]  ;;  %v4783_v4 = vcombine.high %v228_v62, %v232_v63  ;;  %3277 = vmatprep.subr.bf16.mxu1 %v4903_v61  ;;  %v4782_v10 = vcombine.low %v228_v62, %v232_v63 }
  0x9b   :  { %v360_v1 = vld [vmem:[#allocation6 + $0x7e0] sm:$0xff]  ;;  %3278 = vmatpush1.bf16.msra.mxu1 %v4902_v3 }
  0x9c   :  { %v4911_v5 = vcombine.high %v356_v0, %v360_v1  ;;  %v364_v6 = vld [vmem:[#allocation6 + $0x800] sm:$0xff]  ;;  %3238 = vmatprep.subr.bf16.mxu0 %v4783_v4  ;;  %v4910_v11 = vcombine.low %v356_v0, %v360_v1 }
  0x9d   :  { %v368_v7 = vld [vmem:[#allocation6 + $0x820] sm:$0xff]  ;;  %3239 = vmatpush1.bf16.msra.mxu0 %v4782_v10 }
  0x9e   :  { %v492_v8 = vld [vmem:[#allocation6 + $0xc00] sm:$0xff]  ;;  %v4919_v12 = vcombine.high %v364_v6, %v368_v7  ;;  %3279 = vmatprep.subr.bf16.mxu1 %v4911_v5  ;;  %v4918_v21 = vcombine.low %v364_v6, %v368_v7 }
  0x9f   :  { %v496_v9 = vld [vmem:[#allocation6 + $0xc20] sm:$0xff]  ;;  %3280 = vmatpush1.bf16.msra.mxu1 %v4910_v11 }
  0xa0   :  { %v5047_v13 = vcombine.high %v492_v8, %v496_v9  ;;  %v372_v14 = vld [vmem:[#allocation6 + $0x840] sm:$0xff]  ;;  %3290 = vmatprep.subr.bf16.mxu0 %v4919_v12  ;;  %v5046_v23 = vcombine.low %v492_v8, %v496_v9  ;;  %3241 = vmatmul.mubr.bf16.vlgmr.msra.gmra.mrb[0].mxu0 %v5665_v16 }
  0xa1   :  { %v376_v15 = vld [vmem:[#allocation6 + $0x860] sm:$0xff]  ;;  %3291 = vmatpush1.bf16.msra.mxu0 %v4918_v21  ;;  %3322 = vmatprep.mubr.bf16.mxu0 %v5677_v29 }
  0xa2   :  { %v500_v17 = vld [vmem:[#allocation6 + $0xc40] sm:$0xff]  ;;  %v4927_v24 = vcombine.high %v372_v14, %v376_v15  ;;  %3331 = vmatprep.subr.bf16.mxu1 %v5047_v13  ;;  %3282 = vmatmul.mubr.bf16.vlgmr.msra.gmra.mrb[0].mxu1 %v5671_v20  ;;  %v4926_v30 = vcombine.low %v372_v14, %v376_v15 }
  0xa3   :  { %v504_v18 = vld [vmem:[#allocation6 + $0xc60] sm:$0xff]  ;;  %3332 = vmatpush1.bf16.msra.mxu1 %v5046_v23  ;;  %3363 = vmatprep.mubr.bf16.mxu1 %v5682_v54 }
  0xa4   :  { %v380_v25 = vld [vmem:[#allocation6 + $0x880] sm:$0xff]  ;;  %v5055_v53 = vcombine.high %v500_v17, %v504_v18  ;;  %3292 = vmatprep.subr.bf16.mxu0 %v4927_v24  ;;  %v5054_v31 = vcombine.low %v500_v17, %v504_v18 }
  0xa5   :  { %v384_v26 = vld [vmem:[#allocation6 + $0x8a0] sm:$0xff]  ;;  %3293 = vmatpush1.bf16.msra.mxu0 %v4926_v30 }
  0xa6   :  { %v508_v27 = vld [vmem:[#allocation6 + $0xc80] sm:$0xff]  ;;  %v4935_v32 = vcombine.high %v380_v25, %v384_v26  ;;  %3333 = vmatprep.subr.bf16.mxu1 %v5055_v53  ;;  %v4934_v38 = vcombine.low %v380_v25, %v384_v26 }
  0xa7   :  { %v512_v28 = vld [vmem:[#allocation6 + $0xca0] sm:$0xff]  ;;  %3334 = vmatpush1.bf16.msra.mxu1 %v5054_v31 }
  0xa8   :  { %v388_v33 = vld [vmem:[#allocation6 + $0x8c0] sm:$0xff]  ;;  %v5063_v36 = vcombine.high %v508_v27, %v512_v28  ;;  %3294 = vmatprep.subr.bf16.mxu0 %v4935_v32  ;;  %v5062_v39 = vcombine.low %v508_v27, %v512_v28 }
  0xa9   :  { %v392_v34 = vld [vmem:[#allocation6 + $0x8e0] sm:$0xff]  ;;  %3295 = vmatpush1.bf16.msra.mxu0 %v4934_v38 }
  0xaa   :  { %v516_v35 = vld [vmem:[#allocation6 + $0xcc0] sm:$0xff]  ;;  %v4943_v40 = vcombine.high %v388_v33, %v392_v34  ;;  %3335 = vmatprep.subr.bf16.mxu1 %v5063_v36  ;;  %v4942_v46 = vcombine.low %v388_v33, %v392_v34 }
  0xab   :  { %v520_v37 = vld [vmem:[#allocation6 + $0xce0] sm:$0xff]  ;;  %3336 = vmatpush1.bf16.msra.mxu1 %v5062_v39 }
  0xac   :  { %v396_v41 = vld [vmem:[#allocation6 + $0x900] sm:$0xff]  ;;  %v5071_v44 = vcombine.high %v516_v35, %v520_v37  ;;  %3296 = vmatprep.subr.bf16.mxu0 %v4943_v40  ;;  %v5070_v47 = vcombine.low %v516_v35, %v520_v37 }
  0xad   :  { %v400_v42 = vld [vmem:[#allocation6 + $0x920] sm:$0xff]  ;;  %3297 = vmatpush1.bf16.msra.mxu0 %v4942_v46 }
  0xae   :  { %v524_v43 = vld [vmem:[#allocation6 + $0xd00] sm:$0xff]  ;;  %v4951_v48 = vcombine.high %v396_v41, %v400_v42  ;;  %3337 = vmatprep.subr.bf16.mxu1 %v5071_v44  ;;  %v4950_v56 = vcombine.low %v396_v41, %v400_v42 }
  0xaf   :  { %v528_v45 = vld [vmem:[#allocation6 + $0xd20] sm:$0xff]  ;;  %3338 = vmatpush1.bf16.msra.mxu1 %v5070_v47 }
  0xb0   :  { %v404_v49 = vld [vmem:[#allocation6 + $0x940] sm:$0xff]  ;;  %v5079_v52 = vcombine.high %v524_v43, %v528_v45  ;;  %3298 = vmatprep.subr.bf16.mxu0 %v4951_v48  ;;  %v5078_v57 = vcombine.low %v524_v43, %v528_v45 }
  0xb1   :  { %v408_v50 = vld [vmem:[#allocation6 + $0x960] sm:$0xff]  ;;  %3299 = vmatpush1.bf16.msra.mxu0 %v4950_v56 }
  0xb2   :  { %v532_v51 = vld [vmem:[#allocation6 + $0xd40] sm:$0xff]  ;;  %v4959_v60 = vcombine.high %v404_v49, %v408_v50  ;;  %3339 = vmatprep.subr.bf16.mxu1 %v5079_v52  ;;  %v4958_v2 = vcombine.low %v404_v49, %v408_v50 }
  0xb3   :  { %v536_v55 = vld [vmem:[#allocation6 + $0xd60] sm:$0xff]  ;;  %3340 = vmatpush1.bf16.msra.mxu1 %v5078_v57 }
  0xb4   :  { %v412_v61 = vld [vmem:[#allocation6 + $0x980] sm:$0xff]  ;;  %v5087_v0 = vcombine.high %v532_v51, %v536_v55  ;;  %3300 = vmatprep.subr.bf16.mxu0 %v4959_v60  ;;  %v5086_v3 = vcombine.low %v532_v51, %v536_v55 }
  0xb5   :  { %v416_v62 = vld [vmem:[#allocation6 + $0x9a0] sm:$0xff]  ;;  %3301 = vmatpush1.bf16.msra.mxu0 %v4958_v2 }
  0xb6   :  { %v540_v63 = vld [vmem:[#allocation6 + $0xd80] sm:$0xff]  ;;  %v4967_v4 = vcombine.high %v412_v61, %v416_v62  ;;  %3341 = vmatprep.subr.bf16.mxu1 %v5087_v0  ;;  %v4966_v10 = vcombine.low %v412_v61, %v416_v62 }
  0xb7   :  { %v544_v1 = vld [vmem:[#allocation6 + $0xda0] sm:$0xff]  ;;  %3342 = vmatpush1.bf16.msra.mxu1 %v5086_v3 }
  0xb8   :  { %v420_v5 = vld [vmem:[#allocation6 + $0x9c0] sm:$0xff]  ;;  %v5095_v8 = vcombine.high %v540_v63, %v544_v1  ;;  %3302 = vmatprep.subr.bf16.mxu0 %v4967_v4  ;;  %v5094_v11 = vcombine.low %v540_v63, %v544_v1 }
  0xb9   :  { %v424_v6 = vld [vmem:[#allocation6 + $0x9e0] sm:$0xff]  ;;  %3303 = vmatpush1.bf16.msra.mxu0 %v4966_v10 }
  0xba   :  { %v548_v7 = vld [vmem:[#allocation6 + $0xdc0] sm:$0xff]  ;;  %v4975_v12 = vcombine.high %v420_v5, %v424_v6  ;;  %3343 = vmatprep.subr.bf16.mxu1 %v5095_v8  ;;  %v4974_v21 = vcombine.low %v420_v5, %v424_v6 }
  0xbb   :  { %v552_v9 = vld [vmem:[#allocation6 + $0xde0] sm:$0xff]  ;;  %3344 = vmatpush1.bf16.msra.mxu1 %v5094_v11 }
  0xbc   :  { %v428_v13 = vld [vmem:[#allocation6 + $0xa00] sm:$0xff]  ;;  %v5103_v17 = vcombine.high %v548_v7, %v552_v9  ;;  %3304 = vmatprep.subr.bf16.mxu0 %v4975_v12  ;;  %v5102_v23 = vcombine.low %v548_v7, %v552_v9 }
  0xbd   :  { %v432_v14 = vld [vmem:[#allocation6 + $0xa20] sm:$0xff]  ;;  %3305 = vmatpush1.bf16.msra.mxu0 %v4974_v21 }
  0xbe   :  { %v556_v15 = vld [vmem:[#allocation6 + $0xe00] sm:$0xff]  ;;  %v4983_v24 = vcombine.high %v428_v13, %v432_v14  ;;  %3345 = vmatprep.subr.bf16.mxu1 %v5103_v17  ;;  %v4982_v30 = vcombine.low %v428_v13, %v432_v14 }
  0xbf   :  { %v560_v18 = vld [vmem:[#allocation6 + $0xe20] sm:$0xff]  ;;  %3346 = vmatpush1.bf16.msra.mxu1 %v5102_v23 }
  0xc0   :  { %v436_v25 = vld [vmem:[#allocation6 + $0xa40] sm:$0xff]  ;;  %v5111_v27 = vcombine.high %v556_v15, %v560_v18  ;;  %3306 = vmatprep.subr.bf16.mxu0 %v4983_v24  ;;  %v5110_v31 = vcombine.low %v556_v15, %v560_v18 }
  0xc1   :  { %v440_v26 = vld [vmem:[#allocation6 + $0xa60] sm:$0xff]  ;;  %3307 = vmatpush1.bf16.msra.mxu0 %v4982_v30 }
  0xc2   :  { %v564_v53 = vld [vmem:[#allocation6 + $0xe40] sm:$0xff]  ;;  %v4991_v32 = vcombine.high %v436_v25, %v440_v26  ;;  %3347 = vmatprep.subr.bf16.mxu1 %v5111_v27  ;;  %v4990_v38 = vcombine.low %v436_v25, %v440_v26  ;;  %v109_v25 = vld [vmem:[#allocation6 + $0x8] sm:$0xff] }
  0xc3   :  { %v568_v28 = vld [vmem:[#allocation6 + $0xe60] sm:$0xff]  ;;  %3348 = vmatpush1.bf16.msra.mxu1 %v5110_v31  ;;  %v113_v26 = vld [vmem:[#allocation6 + $0x28] sm:$0xff] }
  0xc4   :  { %v444_v33 = vld [vmem:[#allocation6 + $0xa80] sm:$0xff]  ;;  %v5119_v36 = vcombine.high %v564_v53, %v568_v28  ;;  %3308 = vmatprep.subr.bf16.mxu0 %v4991_v32  ;;  %v5118_v39 = vcombine.low %v564_v53, %v568_v28  ;;  %v237_v53 = vld [vmem:[#allocation6 + $0x408] sm:$0xff]  ;;  %v4665_v32 = vcombine.high %v109_v25, %v113_v26 }
  0xc5   :  { %v448_v34 = vld [vmem:[#allocation6 + $0xaa0] sm:$0xff]  ;;  %3309 = vmatpush1.bf16.msra.mxu0 %v4990_v38  ;;  %v241_v28 = vld [vmem:[#allocation6 + $0x428] sm:$0xff]  ;;  %v5689_v38 = vcombine.low %v5667_v19, %v5667_v19 }
  0xc6   :  { %v572_v35 = vld [vmem:[#allocation6 + $0xe80] sm:$0xff]  ;;  %v4999_v40 = vcombine.high %v444_v33, %v448_v34  ;;  %3349 = vmatprep.subr.bf16.mxu1 %v5119_v36  ;;  %v4998_v46 = vcombine.low %v444_v33, %v448_v34  ;;  %v117_v33 = vld [vmem:[#allocation6 + $0x48] sm:$0xff]  ;;  %v4793_v36 = vcombine.high %v237_v53, %v241_v28 }
  0xc7   :  { %v576_v37 = vld [vmem:[#allocation6 + $0xea0] sm:$0xff]  ;;  %3350 = vmatpush1.bf16.msra.mxu1 %v5118_v39  ;;  %v121_v34 = vld [vmem:[#allocation6 + $0x68] sm:$0xff]  ;;  %v5693_v39 = vcombine.low %v5673_v22, %v5673_v22 }
  0xc8   :  { %v452_v41 = vld [vmem:[#allocation6 + $0xac0] sm:$0xff]  ;;  %v5127_v44 = vcombine.high %v572_v35, %v576_v37  ;;  %3310 = vmatprep.subr.bf16.mxu0 %v4999_v40  ;;  %v5126_v47 = vcombine.low %v572_v35, %v576_v37  ;;  %v245_v35 = vld [vmem:[#allocation6 + $0x448] sm:$0xff]  ;;  %v4664_v40 = vcombine.low %v109_v25, %v113_v26  ;;  %v4672_v19 = vcombine.low %v117_v33, %v121_v34 }
  0xc9   :  { %v456_v42 = vld [vmem:[#allocation6 + $0xae0] sm:$0xff]  ;;  %3311 = vmatpush1.bf16.msra.mxu0 %v4998_v46  ;;  %v249_v37 = vld [vmem:[#allocation6 + $0x468] sm:$0xff] }
  0xca   :  { %v580_v43 = vld [vmem:[#allocation6 + $0xec0] sm:$0xff]  ;;  %v5007_v48 = vcombine.high %v452_v41, %v456_v42  ;;  %3351 = vmatprep.subr.bf16.mxu1 %v5127_v44  ;;  %v5006_v56 = vcombine.low %v452_v41, %v456_v42  ;;  %v4792_v41 = vcombine.low %v237_v53, %v241_v28  ;;  %v4673_v42 = vcombine.high %v117_v33, %v121_v34  ;;  %v125_v44 = vld [vmem:[#allocation6 + $0x88] sm:$0xff] }
  0xcb   :  { %v584_v45 = vld [vmem:[#allocation6 + $0xee0] sm:$0xff]  ;;  %3352 = vmatpush1.bf16.msra.mxu1 %v5126_v47  ;;  %v253_v46 = vld [vmem:[#allocation6 + $0x488] sm:$0xff]  ;;  %v4800_v22 = vcombine.low %v245_v35, %v249_v37 }
  0xcc   :  { %v460_v49 = vld [vmem:[#allocation6 + $0xb00] sm:$0xff]  ;;  %v5135_v52 = vcombine.high %v580_v43, %v584_v45  ;;  %3312 = vmatprep.subr.bf16.mxu0 %v5007_v48  ;;  %v5134_v57 = vcombine.low %v580_v43, %v584_v45  ;;  %v4801_v43 = vcombine.high %v245_v35, %v249_v37  ;;  %v129_v45 = vld [vmem:[#allocation6 + $0xa8] sm:$0xff] }
  0xcd   :  { %v464_v50 = vld [vmem:[#allocation6 + $0xb20] sm:$0xff]  ;;  %3313 = vmatpush1.bf16.msra.mxu0 %v5006_v56  ;;  %v257_v47 = vld [vmem:[#allocation6 + $0x4a8] sm:$0xff]  ;;  %v4681_v48 = vcombine.high %v125_v44, %v129_v45  ;;  %v4680_v56 = vcombine.low %v125_v44, %v129_v45 }
  0xce   :  { %v588_v51 = vld [vmem:[#allocation6 + $0xf00] sm:$0xff]  ;;  %v5015_v60 = vcombine.high %v460_v49, %v464_v50  ;;  %3353 = vmatprep.subr.bf16.mxu1 %v5135_v52  ;;  %v5014_v2 = vcombine.low %v460_v49, %v464_v50  ;;  %v4809_v49 = vcombine.high %v253_v46, %v257_v47  ;;  %v133_v50 = vld [vmem:[#allocation6 + $0xc8] sm:$0xff] }
  0xcf   :  { %v592_v55 = vld [vmem:[#allocation6 + $0xf20] sm:$0xff]  ;;  %3354 = vmatpush1.bf16.msra.mxu1 %v5134_v57  ;;  %v261_v52 = vld [vmem:[#allocation6 + $0x4c8] sm:$0xff]  ;;  %v4808_v57 = vcombine.low %v253_v46, %v257_v47 }
  0xd0   :  { %v468_v61 = vld [vmem:[#allocation6 + $0xb40] sm:$0xff]  ;;  %v5143_v0 = vcombine.high %v588_v51, %v592_v55  ;;  %3314 = vmatprep.subr.bf16.mxu0 %v5015_v60  ;;  %v5142_v3 = vcombine.low %v588_v51, %v592_v55  ;;  %v137_v51 = vld [vmem:[#allocation6 + $0xe8] sm:$0xff] }
  0xd1   :  { %v472_v62 = vld [vmem:[#allocation6 + $0xb60] sm:$0xff]  ;;  %3315 = vmatpush1.bf16.msra.mxu0 %v5014_v2  ;;  %v265_v55 = vld [vmem:[#allocation6 + $0x4e8] sm:$0xff]  ;;  %v4689_v60 = vcombine.high %v133_v50, %v137_v51  ;;  %v4688_v2 = vcombine.low %v133_v50, %v137_v51 }
  0xd2   :  { %v596_v63 = vld [vmem:[#allocation6 + $0xf40] sm:$0xff]  ;;  %v5023_v4 = vcombine.high %v468_v61, %v472_v62  ;;  %3355 = vmatprep.subr.bf16.mxu1 %v5143_v0  ;;  %v5022_v10 = vcombine.low %v468_v61, %v472_v62  ;;  %v4817_v61 = vcombine.high %v261_v52, %v265_v55  ;;  %v141_v62 = vld [vmem:[#allocation6 + $0x108] sm:$0xff] }
  0xd3   :  { %v600_v1 = vld [vmem:[#allocation6 + $0xf60] sm:$0xff]  ;;  %3356 = vmatpush1.bf16.msra.mxu1 %v5142_v3  ;;  %v269_v0 = vld [vmem:[#allocation6 + $0x508] sm:$0xff]  ;;  %v4816_v3 = vcombine.low %v261_v52, %v265_v55 }
  0xd4   :  { %v476_v5 = vld [vmem:[#allocation6 + $0xb80] sm:$0xff]  ;;  %v5151_v8 = vcombine.high %v596_v63, %v600_v1  ;;  %3316 = vmatprep.subr.bf16.mxu0 %v5023_v4  ;;  %v5150_v11 = vcombine.low %v596_v63, %v600_v1  ;;  %v145_v63 = vld [vmem:[#allocation6 + $0x128] sm:$0xff] }
  0xd5   :  { %v480_v6 = vld [vmem:[#allocation6 + $0xba0] sm:$0xff]  ;;  %3317 = vmatpush1.bf16.msra.mxu0 %v5022_v10  ;;  %v273_v1 = vld [vmem:[#allocation6 + $0x528] sm:$0xff]  ;;  %v4697_v4 = vcombine.high %v141_v62, %v145_v63  ;;  %v4696_v10 = vcombine.low %v141_v62, %v145_v63 }
  0xd6   :  { %v604_v7 = vld [vmem:[#allocation6 + $0xf80] sm:$0xff]  ;;  %v5031_v12 = vcombine.high %v476_v5, %v480_v6  ;;  %3357 = vmatprep.subr.bf16.mxu1 %v5151_v8  ;;  %v5030_v21 = vcombine.low %v476_v5, %v480_v6  ;;  %v4825_v5 = vcombine.high %v269_v0, %v273_v1  ;;  %v149_v6 = vld [vmem:[#allocation6 + $0x148] sm:$0xff] }
  0xd7   :  { %v608_v9 = vld [vmem:[#allocation6 + $0xfa0] sm:$0xff]  ;;  %3358 = vmatpush1.bf16.msra.mxu1 %v5150_v11  ;;  %v277_v8 = vld [vmem:[#allocation6 + $0x548] sm:$0xff]  ;;  %v4824_v11 = vcombine.low %v269_v0, %v273_v1 }
  0xd8   :  { %v484_v13 = vld [vmem:[#allocation6 + $0xbc0] sm:$0xff]  ;;  %v5159_v17 = vcombine.high %v604_v7, %v608_v9  ;;  %3318 = vmatprep.subr.bf16.mxu0 %v5031_v12  ;;  %v5158_v23 = vcombine.low %v604_v7, %v608_v9  ;;  %v153_v7 = vld [vmem:[#allocation6 + $0x168] sm:$0xff] }
  0xd9   :  { %v488_v14 = vld [vmem:[#allocation6 + $0xbe0] sm:$0xff]  ;;  %3319 = vmatpush1.bf16.msra.mxu0 %v5030_v21  ;;  %v281_v9 = vld [vmem:[#allocation6 + $0x568] sm:$0xff]  ;;  %v4705_v12 = vcombine.high %v149_v6, %v153_v7  ;;  %v4704_v21 = vcombine.low %v149_v6, %v153_v7 }
  0xda   :  { %v612_v15 = vld [vmem:[#allocation6 + $0xfc0] sm:$0xff]  ;;  %v5039_v24 = vcombine.high %v484_v13, %v488_v14  ;;  %3359 = vmatprep.subr.bf16.mxu1 %v5159_v17  ;;  %v5038_v30 = vcombine.low %v484_v13, %v488_v14  ;;  %v4833_v13 = vcombine.high %v277_v8, %v281_v9  ;;  %v157_v14 = vld [vmem:[#allocation6 + $0x188] sm:$0xff] }
  0xdb   :  { %v616_v18 = vld [vmem:[#allocation6 + $0xfe0] sm:$0xff]  ;;  %3360 = vmatpush1.bf16.msra.mxu1 %v5158_v23  ;;  %v285_v17 = vld [vmem:[#allocation6 + $0x588] sm:$0xff]  ;;  %v4832_v23 = vcombine.low %v277_v8, %v281_v9 }
  0xdc   :  { %v5167_v27 = vcombine.high %v612_v15, %v616_v18  ;;  %3320 = vmatprep.subr.bf16.mxu0 %v5039_v24  ;;  %v5166_v31 = vcombine.low %v612_v15, %v616_v18  ;;  %v161_v15 = vld [vmem:[#allocation6 + $0x1a8] sm:$0xff] }
  0xdd   :  { %3321 = vmatpush1.bf16.msra.mxu0 %v5038_v30  ;;  %v289_v18 = vld [vmem:[#allocation6 + $0x5a8] sm:$0xff]  ;;  %v4713_v24 = vcombine.high %v157_v14, %v161_v15  ;;  %v4712_v30 = vcombine.low %v157_v14, %v161_v15 }
  0xde   :  { %3361 = vmatprep.subr.bf16.mxu1 %v5167_v27  ;;  %3372 = vmatprep.subr.bf16.mxu0 %v4665_v32  ;;  %v4841_v25 = vcombine.high %v285_v17, %v289_v18  ;;  %v165_v26 = vld [vmem:[#allocation6 + $0x1c8] sm:$0xff] }
  0xdf   :  { %3362 = vmatpush1.bf16.msra.mxu1 %v5166_v31  ;;  %v169_v53 = vld [vmem:[#allocation6 + $0x1e8] sm:$0xff]  ;;  %v4840_v31 = vcombine.low %v285_v17, %v289_v18 }
  0xe0   :  { %3413 = vmatprep.subr.bf16.mxu1 %v4793_v36  ;;  %3323 = vmatmul.mubr.bf16.vlgmr.msra.gmra.mrb[4].mxu0 %v5689_v38  ;;  %v293_v27 = vld [vmem:[#allocation6 + $0x5c8] sm:$0xff]  ;;  %v4721_v32 = vcombine.high %v165_v26, %v169_v53 }
  0xe1   :  { %3373 = vmatpush1.bf16.msra.mxu0 %v4664_v40  ;;  %3404 = vmatprep.mubr.bf16.mxu0 %v5655_v58  ;;  %v297_v28 = vld [vmem:[#allocation6 + $0x5e8] sm:$0xff]  ;;  %v4720_v40 = vcombine.low %v165_v26, %v169_v53 }
  0xe2   :  { %3364 = vmatmul.mubr.bf16.vlgmr.msra.gmra.mrb[4].mxu1 %v5693_v39  ;;  %3374 = vmatprep.subr.bf16.mxu0 %v4673_v42  ;;  %v4849_v33 = vcombine.high %v293_v27, %v297_v28  ;;  %v173_v34 = vld [vmem:[#allocation6 + $0x208] sm:$0xff] }
  0xe3   :  { %3414 = vmatpush1.bf16.msra.mxu1 %v4792_v41  ;;  %3445 = vmatprep.mubr.bf16.mxu1 %v5659_v59  ;;  %v177_v35 = vld [vmem:[#allocation6 + $0x228] sm:$0xff]  ;;  %v4848_v41 = vcombine.low %v293_v27, %v297_v28 }
  0xe4   :  { %3415 = vmatprep.subr.bf16.mxu1 %v4801_v43  ;;  %v301_v36 = vld [vmem:[#allocation6 + $0x608] sm:$0xff]  ;;  %v4729_v42 = vcombine.high %v173_v34, %v177_v35 }
  0xe5   :  { %3375 = vmatpush1.bf16.msra.mxu0 %v4672_v19  ;;  %v305_v37 = vld [vmem:[#allocation6 + $0x628] sm:$0xff]  ;;  %v4728_v19 = vcombine.low %v173_v34, %v177_v35 }
  0xe6   :  { %3376 = vmatprep.subr.bf16.mxu0 %v4681_v48  ;;  %v4857_v43 = vcombine.high %v301_v36, %v305_v37  ;;  %v181_v44 = vld [vmem:[#allocation6 + $0x248] sm:$0xff] }
  0xe7   :  { %3416 = vmatpush1.bf16.msra.mxu1 %v4800_v22  ;;  %v185_v45 = vld [vmem:[#allocation6 + $0x268] sm:$0xff]  ;;  %v4856_v22 = vcombine.low %v301_v36, %v305_v37 }
  0xe8   :  { %3417 = vmatprep.subr.bf16.mxu1 %v4809_v49  ;;  %v309_v46 = vld [vmem:[#allocation6 + $0x648] sm:$0xff]  ;;  %v4737_v48 = vcombine.high %v181_v44, %v185_v45 }
  0xe9   :  { %3377 = vmatpush1.bf16.msra.mxu0 %v4680_v56  ;;  %v313_v47 = vld [vmem:[#allocation6 + $0x668] sm:$0xff]  ;;  %v4736_v56 = vcombine.low %v181_v44, %v185_v45 }
  0xea   :  { %3378 = vmatprep.subr.bf16.mxu0 %v4689_v60  ;;  %v4865_v49 = vcombine.high %v309_v46, %v313_v47  ;;  %v189_v50 = vld [vmem:[#allocation6 + $0x288] sm:$0xff] }
  0xeb   :  { %3418 = vmatpush1.bf16.msra.mxu1 %v4808_v57  ;;  %v193_v51 = vld [vmem:[#allocation6 + $0x2a8] sm:$0xff]  ;;  %v4864_v57 = vcombine.low %v309_v46, %v313_v47 }
  0xec   :  { %3419 = vmatprep.subr.bf16.mxu1 %v4817_v61  ;;  %v317_v52 = vld [vmem:[#allocation6 + $0x688] sm:$0xff]  ;;  %v4745_v60 = vcombine.high %v189_v50, %v193_v51 }
  0xed   :  { %3379 = vmatpush1.bf16.msra.mxu0 %v4688_v2  ;;  %v321_v55 = vld [vmem:[#allocation6 + $0x6a8] sm:$0xff]  ;;  %v4744_v2 = vcombine.low %v189_v50, %v193_v51 }
  0xee   :  { %3380 = vmatprep.subr.bf16.mxu0 %v4697_v4  ;;  %v4873_v61 = vcombine.high %v317_v52, %v321_v55  ;;  %v197_v62 = vld [vmem:[#allocation6 + $0x2c8] sm:$0xff] }
  0xef   :  { %3420 = vmatpush1.bf16.msra.mxu1 %v4816_v3  ;;  %v201_v63 = vld [vmem:[#allocation6 + $0x2e8] sm:$0xff]  ;;  %v4872_v3 = vcombine.low %v317_v52, %v321_v55 }
  0xf0   :  { %3421 = vmatprep.subr.bf16.mxu1 %v4825_v5  ;;  %v325_v0 = vld [vmem:[#allocation6 + $0x6c8] sm:$0xff]  ;;  %v4753_v4 = vcombine.high %v197_v62, %v201_v63 }
  0xf1   :  { %3381 = vmatpush1.bf16.msra.mxu0 %v4696_v10  ;;  %v329_v1 = vld [vmem:[#allocation6 + $0x6e8] sm:$0xff]  ;;  %v4752_v10 = vcombine.low %v197_v62, %v201_v63 }
  0xf2   :  { %3382 = vmatprep.subr.bf16.mxu0 %v4705_v12  ;;  %v4881_v5 = vcombine.high %v325_v0, %v329_v1  ;;  %v205_v6 = vld [vmem:[#allocation6 + $0x308] sm:$0xff] }
  0xf3   :  { %3422 = vmatpush1.bf16.msra.mxu1 %v4824_v11  ;;  %v209_v7 = vld [vmem:[#allocation6 + $0x328] sm:$0xff]  ;;  %v4880_v11 = vcombine.low %v325_v0, %v329_v1 }
  0xf4   :  { %3423 = vmatprep.subr.bf16.mxu1 %v4833_v13  ;;  %v333_v8 = vld [vmem:[#allocation6 + $0x708] sm:$0xff]  ;;  %v4761_v12 = vcombine.high %v205_v6, %v209_v7 }
  0xf5   :  { %3383 = vmatpush1.bf16.msra.mxu0 %v4704_v21  ;;  %v337_v9 = vld [vmem:[#allocation6 + $0x728] sm:$0xff]  ;;  %v4760_v21 = vcombine.low %v205_v6, %v209_v7 }
  0xf6   :  { %3384 = vmatprep.subr.bf16.mxu0 %v4713_v24  ;;  %v4889_v13 = vcombine.high %v333_v8, %v337_v9  ;;  %v213_v14 = vld [vmem:[#allocation6 + $0x348] sm:$0xff] }
  0xf7   :  { %3424 = vmatpush1.bf16.msra.mxu1 %v4832_v23  ;;  %v217_v15 = vld [vmem:[#allocation6 + $0x368] sm:$0xff]  ;;  %v4888_v23 = vcombine.low %v333_v8, %v337_v9 }
  0xf8   :  { %3425 = vmatprep.subr.bf16.mxu1 %v4841_v25  ;;  %v341_v17 = vld [vmem:[#allocation6 + $0x748] sm:$0xff]  ;;  %v4769_v24 = vcombine.high %v213_v14, %v217_v15 }
  0xf9   :  { %3385 = vmatpush1.bf16.msra.mxu0 %v4712_v30  ;;  %v345_v18 = vld [vmem:[#allocation6 + $0x768] sm:$0xff]  ;;  %v4768_v30 = vcombine.low %v213_v14, %v217_v15 }
  0xfa   :  { %3386 = vmatprep.subr.bf16.mxu0 %v4721_v32  ;;  %v4897_v25 = vcombine.high %v341_v17, %v345_v18  ;;  %v221_v26 = vld [vmem:[#allocation6 + $0x388] sm:$0xff] }
  0xfb   :  { %3426 = vmatpush1.bf16.msra.mxu1 %v4840_v31  ;;  %v225_v53 = vld [vmem:[#allocation6 + $0x3a8] sm:$0xff]  ;;  %v4896_v31 = vcombine.low %v341_v17, %v345_v18 }
  0xfc   :  { %3427 = vmatprep.subr.bf16.mxu1 %v4849_v33  ;;  %v349_v27 = vld [vmem:[#allocation6 + $0x788] sm:$0xff]  ;;  %v4777_v32 = vcombine.high %v221_v26, %v225_v53 }
  0xfd   :  { %3387 = vmatpush1.bf16.msra.mxu0 %v4720_v40  ;;  %v353_v28 = vld [vmem:[#allocation6 + $0x7a8] sm:$0xff]  ;;  %v4776_v40 = vcombine.low %v221_v26, %v225_v53 }
  0xfe   :  { %3388 = vmatprep.subr.bf16.mxu0 %v4729_v42  ;;  %v4905_v33 = vcombine.high %v349_v27, %v353_v28  ;;  %v229_v34 = vld [vmem:[#allocation6 + $0x3c8] sm:$0xff] }
  0xff   :  { %3428 = vmatpush1.bf16.msra.mxu1 %v4848_v41  ;;  %v233_v35 = vld [vmem:[#allocation6 + $0x3e8] sm:$0xff]  ;;  %v4904_v41 = vcombine.low %v349_v27, %v353_v28 }
 0x100   :  { %3429 = vmatprep.subr.bf16.mxu1 %v4857_v43  ;;  %v357_v36 = vld [vmem:[#allocation6 + $0x7c8] sm:$0xff]  ;;  %v4785_v42 = vcombine.high %v229_v34, %v233_v35 }
 0x101   :  { %3389 = vmatpush1.bf16.msra.mxu0 %v4728_v19  ;;  %v361_v37 = vld [vmem:[#allocation6 + $0x7e8] sm:$0xff]  ;;  %v4784_v19 = vcombine.low %v229_v34, %v233_v35 }
 0x102   :  { %3390 = vmatprep.subr.bf16.mxu0 %v4737_v48  ;;  %v4913_v43 = vcombine.high %v357_v36, %v361_v37  ;;  %v365_v44 = vld [vmem:[#allocation6 + $0x808] sm:$0xff] }
 0x103   :  { %3430 = vmatpush1.bf16.msra.mxu1 %v4856_v22  ;;  %v369_v45 = vld [vmem:[#allocation6 + $0x828] sm:$0xff]  ;;  %v4912_v22 = vcombine.low %v357_v36, %v361_v37 }
 0x104   :  { %3431 = vmatprep.subr.bf16.mxu1 %v4865_v49  ;;  %v493_v46 = vld [vmem:[#allocation6 + $0xc08] sm:$0xff]  ;;  %v4921_v48 = vcombine.high %v365_v44, %v369_v45 }
 0x105   :  { %3391 = vmatpush1.bf16.msra.mxu0 %v4736_v56  ;;  %v497_v47 = vld [vmem:[#allocation6 + $0xc28] sm:$0xff]  ;;  %v4920_v56 = vcombine.low %v365_v44, %v369_v45 }
 0x106   :  { %3392 = vmatprep.subr.bf16.mxu0 %v4745_v60  ;;  %v5049_v49 = vcombine.high %v493_v46, %v497_v47  ;;  %v373_v50 = vld [vmem:[#allocation6 + $0x848] sm:$0xff] }
 0x107   :  { %3432 = vmatpush1.bf16.msra.mxu1 %v4864_v57  ;;  %v377_v51 = vld [vmem:[#allocation6 + $0x868] sm:$0xff]  ;;  %v5048_v57 = vcombine.low %v493_v46, %v497_v47 }
 0x108   :  { %3433 = vmatprep.subr.bf16.mxu1 %v4873_v61  ;;  %v501_v52 = vld [vmem:[#allocation6 + $0xc48] sm:$0xff]  ;;  %v4929_v60 = vcombine.high %v373_v50, %v377_v51 }
 0x109   :  { %3393 = vmatpush1.bf16.msra.mxu0 %v4744_v2  ;;  %v505_v55 = vld [vmem:[#allocation6 + $0xc68] sm:$0xff]  ;;  %v4928_v2 = vcombine.low %v373_v50, %v377_v51 }
 0x10a   :  { %3394 = vmatprep.subr.bf16.mxu0 %v4753_v4  ;;  %v5057_v61 = vcombine.high %v501_v52, %v505_v55  ;;  %v381_v62 = vld [vmem:[#allocation6 + $0x888] sm:$0xff] }
 0x10b   :  { %3434 = vmatpush1.bf16.msra.mxu1 %v4872_v3  ;;  %v385_v63 = vld [vmem:[#allocation6 + $0x8a8] sm:$0xff]  ;;  %v5056_v3 = vcombine.low %v501_v52, %v505_v55 }
 0x10c   :  { %3435 = vmatprep.subr.bf16.mxu1 %v4881_v5  ;;  %v509_v0 = vld [vmem:[#allocation6 + $0xc88] sm:$0xff]  ;;  %v4937_v4 = vcombine.high %v381_v62, %v385_v63 }
 0x10d   :  { %3395 = vmatpush1.bf16.msra.mxu0 %v4752_v10  ;;  %v513_v1 = vld [vmem:[#allocation6 + $0xca8] sm:$0xff]  ;;  %v4936_v10 = vcombine.low %v381_v62, %v385_v63 }
 0x10e   :  { %3396 = vmatprep.subr.bf16.mxu0 %v4761_v12  ;;  %v5065_v5 = vcombine.high %v509_v0, %v513_v1  ;;  %v389_v6 = vld [vmem:[#allocation6 + $0x8c8] sm:$0xff] }
 0x10f   :  { %3436 = vmatpush1.bf16.msra.mxu1 %v4880_v11  ;;  %v393_v7 = vld [vmem:[#allocation6 + $0x8e8] sm:$0xff]  ;;  %v5064_v11 = vcombine.low %v509_v0, %v513_v1 }
 0x110   :  { %3437 = vmatprep.subr.bf16.mxu1 %v4889_v13  ;;  %v517_v8 = vld [vmem:[#allocation6 + $0xcc8] sm:$0xff]  ;;  %v4945_v12 = vcombine.high %v389_v6, %v393_v7 }
 0x111   :  { %3397 = vmatpush1.bf16.msra.mxu0 %v4760_v21  ;;  %v521_v9 = vld [vmem:[#allocation6 + $0xce8] sm:$0xff]  ;;  %v4944_v21 = vcombine.low %v389_v6, %v393_v7 }
 0x112   :  { %3398 = vmatprep.subr.bf16.mxu0 %v4769_v24  ;;  %v5073_v13 = vcombine.high %v517_v8, %v521_v9  ;;  %v397_v14 = vld [vmem:[#allocation6 + $0x908] sm:$0xff] }
 0x113   :  { %3438 = vmatpush1.bf16.msra.mxu1 %v4888_v23  ;;  %v401_v15 = vld [vmem:[#allocation6 + $0x928] sm:$0xff]  ;;  %v5072_v23 = vcombine.low %v517_v8, %v521_v9 }
 0x114   :  { %3439 = vmatprep.subr.bf16.mxu1 %v4897_v25  ;;  %v525_v17 = vld [vmem:[#allocation6 + $0xd08] sm:$0xff]  ;;  %v4953_v24 = vcombine.high %v397_v14, %v401_v15 }
 0x115   :  { %3399 = vmatpush1.bf16.msra.mxu0 %v4768_v30  ;;  %v529_v18 = vld [vmem:[#allocation6 + $0xd28] sm:$0xff]  ;;  %v4952_v30 = vcombine.low %v397_v14, %v401_v15 }
 0x116   :  { %3400 = vmatprep.subr.bf16.mxu0 %v4777_v32  ;;  %v5081_v25 = vcombine.high %v525_v17, %v529_v18  ;;  %v405_v26 = vld [vmem:[#allocation6 + $0x948] sm:$0xff] }
 0x117   :  { %3440 = vmatpush1.bf16.msra.mxu1 %v4896_v31  ;;  %v409_v53 = vld [vmem:[#allocation6 + $0x968] sm:$0xff]  ;;  %v5080_v31 = vcombine.low %v525_v17, %v529_v18 }
 0x118   :  { %3441 = vmatprep.subr.bf16.mxu1 %v4905_v33  ;;  %v533_v27 = vld [vmem:[#allocation6 + $0xd48] sm:$0xff]  ;;  %v4961_v32 = vcombine.high %v405_v26, %v409_v53 }
 0x119   :  { %3401 = vmatpush1.bf16.msra.mxu0 %v4776_v40  ;;  %v537_v28 = vld [vmem:[#allocation6 + $0xd68] sm:$0xff]  ;;  %v4960_v40 = vcombine.low %v405_v26, %v409_v53 }
 0x11a   :  { %3402 = vmatprep.subr.bf16.mxu0 %v4785_v42  ;;  %v5089_v33 = vcombine.high %v533_v27, %v537_v28  ;;  %v413_v34 = vld [vmem:[#allocation6 + $0x988] sm:$0xff] }
 0x11b   :  { %3442 = vmatpush1.bf16.msra.mxu1 %v4904_v41  ;;  %v417_v35 = vld [vmem:[#allocation6 + $0x9a8] sm:$0xff]  ;;  %v5088_v41 = vcombine.low %v533_v27, %v537_v28 }
 0x11c   :  { %3443 = vmatprep.subr.bf16.mxu1 %v4913_v43  ;;  %v541_v36 = vld [vmem:[#allocation6 + $0xd88] sm:$0xff]  ;;  %v4969_v42 = vcombine.high %v413_v34, %v417_v35 }
 0x11d   :  { %3403 = vmatpush1.bf16.msra.mxu0 %v4784_v19  ;;  %v545_v37 = vld [vmem:[#allocation6 + $0xda8] sm:$0xff]  ;;  %v4968_v19 = vcombine.low %v413_v34, %v417_v35 }
 0x11e   :  { %3454 = vmatprep.subr.bf16.mxu0 %v4921_v48  ;;  %v5097_v43 = vcombine.high %v541_v36, %v545_v37  ;;  %v421_v44 = vld [vmem:[#allocation6 + $0x9c8] sm:$0xff] }
 0x11f   :  { %3444 = vmatpush1.bf16.msra.mxu1 %v4912_v22  ;;  %v425_v45 = vld [vmem:[#allocation6 + $0x9e8] sm:$0xff]  ;;  %v5096_v22 = vcombine.low %v541_v36, %v545_v37 }
 0x120   :  { %3495 = vmatprep.subr.bf16.mxu1 %v5049_v49  ;;  %3405 = vmatmul.mubr.bf16.vlgmr.msra.gmra.mrb[8].mxu0 %v5665_v16  ;;  %v549_v46 = vld [vmem:[#allocation6 + $0xdc8] sm:$0xff]  ;;  %v4977_v48 = vcombine.high %v421_v44, %v425_v45 }
 0x121   :  { %3455 = vmatpush1.bf16.msra.mxu0 %v4920_v56  ;;  %3486 = vmatprep.mubr.bf16.mxu0 %v5677_v29  ;;  %v553_v47 = vld [vmem:[#allocation6 + $0xde8] sm:$0xff]  ;;  %v4976_v56 = vcombine.low %v421_v44, %v425_v45 }
 0x122   :  { %3446 = vmatmul.mubr.bf16.vlgmr.msra.gmra.mrb[8].mxu1 %v5671_v20  ;;  %3456 = vmatprep.subr.bf16.mxu0 %v4929_v60  ;;  %v5105_v49 = vcombine.high %v549_v46, %v553_v47  ;;  %v429_v50 = vld [vmem:[#allocation6 + $0xa08] sm:$0xff] }
 0x123   :  { %3496 = vmatpush1.bf16.msra.mxu1 %v5048_v57  ;;  %3527 = vmatprep.mubr.bf16.mxu1 %v5682_v54  ;;  %v433_v51 = vld [vmem:[#allocation6 + $0xa28] sm:$0xff]  ;;  %v5104_v57 = vcombine.low %v549_v46, %v553_v47 }
 0x124   :  { %3497 = vmatprep.subr.bf16.mxu1 %v5057_v61  ;;  %v557_v52 = vld [vmem:[#allocation6 + $0xe08] sm:$0xff]  ;;  %v4985_v60 = vcombine.high %v429_v50, %v433_v51 }
 0x125   :  { %3457 = vmatpush1.bf16.msra.mxu0 %v4928_v2  ;;  %v561_v55 = vld [vmem:[#allocation6 + $0xe28] sm:$0xff]  ;;  %v4984_v2 = vcombine.low %v429_v50, %v433_v51 }
 0x126   :  { %3458 = vmatprep.subr.bf16.mxu0 %v4937_v4  ;;  %v5113_v61 = vcombine.high %v557_v52, %v561_v55  ;;  %v437_v62 = vld [vmem:[#allocation6 + $0xa48] sm:$0xff] }
 0x127   :  { %3498 = vmatpush1.bf16.msra.mxu1 %v5056_v3  ;;  %v441_v63 = vld [vmem:[#allocation6 + $0xa68] sm:$0xff]  ;;  %v5112_v3 = vcombine.low %v557_v52, %v561_v55 }
 0x128   :  { %3499 = vmatprep.subr.bf16.mxu1 %v5065_v5  ;;  %v565_v0 = vld [vmem:[#allocation6 + $0xe48] sm:$0xff]  ;;  %v4993_v4 = vcombine.high %v437_v62, %v441_v63 }
 0x129   :  { %3459 = vmatpush1.bf16.msra.mxu0 %v4936_v10  ;;  %v569_v1 = vld [vmem:[#allocation6 + $0xe68] sm:$0xff]  ;;  %v4992_v10 = vcombine.low %v437_v62, %v441_v63  ;;  %v110_v62 = vld [vmem:[#allocation6 + $0x10] sm:$0xff] }
 0x12a   :  { %3460 = vmatprep.subr.bf16.mxu0 %v4945_v12  ;;  %v5121_v5 = vcombine.high %v565_v0, %v569_v1  ;;  %v445_v6 = vld [vmem:[#allocation6 + $0xa88] sm:$0xff]  ;;  %v114_v63 = vld [vmem:[#allocation6 + $0x30] sm:$0xff] }
 0x12b   :  { %3500 = vmatpush1.bf16.msra.mxu1 %v5064_v11  ;;  %v449_v7 = vld [vmem:[#allocation6 + $0xaa8] sm:$0xff]  ;;  %v5120_v11 = vcombine.low %v565_v0, %v569_v1  ;;  %v238_v0 = vld [vmem:[#allocation6 + $0x410] sm:$0xff] }
 0x12c   :  { %3501 = vmatprep.subr.bf16.mxu1 %v5073_v13  ;;  %v573_v8 = vld [vmem:[#allocation6 + $0xe88] sm:$0xff]  ;;  %v5001_v12 = vcombine.high %v445_v6, %v449_v7  ;;  %v242_v1 = vld [vmem:[#allocation6 + $0x430] sm:$0xff] }
 0x12d   :  { %3461 = vmatpush1.bf16.msra.mxu0 %v4944_v21  ;;  %v577_v9 = vld [vmem:[#allocation6 + $0xea8] sm:$0xff]  ;;  %v5000_v21 = vcombine.low %v445_v6, %v449_v7  ;;  %v118_v6 = vld [vmem:[#allocation6 + $0x50] sm:$0xff] }
 0x12e   :  { %3462 = vmatprep.subr.bf16.mxu0 %v4953_v24  ;;  %v5129_v13 = vcombine.high %v573_v8, %v577_v9  ;;  %v453_v14 = vld [vmem:[#allocation6 + $0xac8] sm:$0xff]  ;;  %v122_v7 = vld [vmem:[#allocation6 + $0x70] sm:$0xff] }
 0x12f   :  { %3502 = vmatpush1.bf16.msra.mxu1 %v5072_v23  ;;  %v457_v15 = vld [vmem:[#allocation6 + $0xae8] sm:$0xff]  ;;  %v5128_v23 = vcombine.low %v573_v8, %v577_v9  ;;  %v246_v8 = vld [vmem:[#allocation6 + $0x450] sm:$0xff] }
 0x130   :  { %3503 = vmatprep.subr.bf16.mxu1 %v5081_v25  ;;  %v581_v17 = vld [vmem:[#allocation6 + $0xec8] sm:$0xff]  ;;  %v5009_v24 = vcombine.high %v453_v14, %v457_v15  ;;  %v250_v9 = vld [vmem:[#allocation6 + $0x470] sm:$0xff] }
 0x131   :  { %3463 = vmatpush1.bf16.msra.mxu0 %v4952_v30  ;;  %v585_v18 = vld [vmem:[#allocation6 + $0xee8] sm:$0xff]  ;;  %v5008_v30 = vcombine.low %v453_v14, %v457_v15  ;;  %v126_v14 = vld [vmem:[#allocation6 + $0x90] sm:$0xff] }
 0x132   :  { %3464 = vmatprep.subr.bf16.mxu0 %v4961_v32  ;;  %v5137_v25 = vcombine.high %v581_v17, %v585_v18  ;;  %v461_v26 = vld [vmem:[#allocation6 + $0xb08] sm:$0xff]  ;;  %v130_v15 = vld [vmem:[#allocation6 + $0xb0] sm:$0xff] }
 0x133   :  { %3504 = vmatpush1.bf16.msra.mxu1 %v5080_v31  ;;  %v465_v53 = vld [vmem:[#allocation6 + $0xb28] sm:$0xff]  ;;  %v5136_v31 = vcombine.low %v581_v17, %v585_v18  ;;  %v254_v17 = vld [vmem:[#allocation6 + $0x490] sm:$0xff] }
 0x134   :  { %3505 = vmatprep.subr.bf16.mxu1 %v5089_v33  ;;  %v589_v27 = vld [vmem:[#allocation6 + $0xf08] sm:$0xff]  ;;  %v5017_v32 = vcombine.high %v461_v26, %v465_v53  ;;  %v258_v18 = vld [vmem:[#allocation6 + $0x4b0] sm:$0xff] }
 0x135   :  { %3465 = vmatpush1.bf16.msra.mxu0 %v4960_v40  ;;  %v593_v28 = vld [vmem:[#allocation6 + $0xf28] sm:$0xff]  ;;  %v5016_v40 = vcombine.low %v461_v26, %v465_v53  ;;  %v134_v26 = vld [vmem:[#allocation6 + $0xd0] sm:$0xff] }
 0x136   :  { %3466 = vmatprep.subr.bf16.mxu0 %v4969_v42  ;;  %v5145_v33 = vcombine.high %v589_v27, %v593_v28  ;;  %v469_v34 = vld [vmem:[#allocation6 + $0xb48] sm:$0xff]  ;;  %v138_v53 = vld [vmem:[#allocation6 + $0xf0] sm:$0xff] }
 0x137   :  { %3506 = vmatpush1.bf16.msra.mxu1 %v5088_v41  ;;  %v473_v35 = vld [vmem:[#allocation6 + $0xb68] sm:$0xff]  ;;  %v5144_v41 = vcombine.low %v589_v27, %v593_v28  ;;  %v262_v27 = vld [vmem:[#allocation6 + $0x4d0] sm:$0xff] }
 0x138   :  { %3507 = vmatprep.subr.bf16.mxu1 %v5097_v43  ;;  %v597_v36 = vld [vmem:[#allocation6 + $0xf48] sm:$0xff]  ;;  %v5025_v42 = vcombine.high %v469_v34, %v473_v35  ;;  %v266_v28 = vld [vmem:[#allocation6 + $0x4f0] sm:$0xff] }
 0x139   :  { %3467 = vmatpush1.bf16.msra.mxu0 %v4968_v19  ;;  %v601_v37 = vld [vmem:[#allocation6 + $0xf68] sm:$0xff]  ;;  %v5024_v19 = vcombine.low %v469_v34, %v473_v35  ;;  %v142_v34 = vld [vmem:[#allocation6 + $0x110] sm:$0xff] }
 0x13a   :  { %3468 = vmatprep.subr.bf16.mxu0 %v4977_v48  ;;  %v5153_v43 = vcombine.high %v597_v36, %v601_v37  ;;  %v477_v44 = vld [vmem:[#allocation6 + $0xb88] sm:$0xff]  ;;  %v146_v35 = vld [vmem:[#allocation6 + $0x130] sm:$0xff] }
 0x13b   :  { %3508 = vmatpush1.bf16.msra.mxu1 %v5096_v22  ;;  %v481_v45 = vld [vmem:[#allocation6 + $0xba8] sm:$0xff]  ;;  %v5152_v22 = vcombine.low %v597_v36, %v601_v37  ;;  %v270_v36 = vld [vmem:[#allocation6 + $0x510] sm:$0xff] }
 0x13c   :  { %3509 = vmatprep.subr.bf16.mxu1 %v5105_v49  ;;  %v605_v46 = vld [vmem:[#allocation6 + $0xf88] sm:$0xff]  ;;  %v5033_v48 = vcombine.high %v477_v44, %v481_v45  ;;  %v274_v37 = vld [vmem:[#allocation6 + $0x530] sm:$0xff] }
 0x13d   :  { %3469 = vmatpush1.bf16.msra.mxu0 %v4976_v56  ;;  %v609_v47 = vld [vmem:[#allocation6 + $0xfa8] sm:$0xff]  ;;  %v5032_v56 = vcombine.low %v477_v44, %v481_v45  ;;  %v150_v44 = vld [vmem:[#allocation6 + $0x150] sm:$0xff] }
 0x13e   :  { %3470 = vmatprep.subr.bf16.mxu0 %v4985_v60  ;;  %v5161_v49 = vcombine.high %v605_v46, %v609_v47  ;;  %v485_v50 = vld [vmem:[#allocation6 + $0xbc8] sm:$0xff]  ;;  %v154_v45 = vld [vmem:[#allocation6 + $0x170] sm:$0xff] }
 0x13f   :  { %3510 = vmatpush1.bf16.msra.mxu1 %v5104_v57  ;;  %v489_v51 = vld [vmem:[#allocation6 + $0xbe8] sm:$0xff]  ;;  %v5160_v57 = vcombine.low %v605_v46, %v609_v47  ;;  %v278_v46 = vld [vmem:[#allocation6 + $0x550] sm:$0xff] }
 0x140   :  { %3511 = vmatprep.subr.bf16.mxu1 %v5113_v61  ;;  %v613_v52 = vld [vmem:[#allocation6 + $0xfc8] sm:$0xff]  ;;  %v5041_v60 = vcombine.high %v485_v50, %v489_v51  ;;  %v282_v47 = vld [vmem:[#allocation6 + $0x570] sm:$0xff] }
 0x141   :  { %3471 = vmatpush1.bf16.msra.mxu0 %v4984_v2  ;;  %v617_v55 = vld [vmem:[#allocation6 + $0xfe8] sm:$0xff]  ;;  %v5040_v2 = vcombine.low %v485_v50, %v489_v51  ;;  %v158_v50 = vld [vmem:[#allocation6 + $0x190] sm:$0xff] }
 0x142   :  { %3472 = vmatprep.subr.bf16.mxu0 %v4993_v4  ;;  %v5169_v61 = vcombine.high %v613_v52, %v617_v55  ;;  %v4667_v4 = vcombine.high %v110_v62, %v114_v63  ;;  %v162_v51 = vld [vmem:[#allocation6 + $0x1b0] sm:$0xff] }
 0x143   :  { %3512 = vmatpush1.bf16.msra.mxu1 %v5112_v3  ;;  %v5168_v3 = vcombine.low %v613_v52, %v617_v55  ;;  %v286_v52 = vld [vmem:[#allocation6 + $0x590] sm:$0xff] }
 0x144   :  { %3513 = vmatprep.subr.bf16.mxu1 %v5121_v5  ;;  %v4795_v5 = vcombine.high %v238_v0, %v242_v1  ;;  %v290_v55 = vld [vmem:[#allocation6 + $0x5b0] sm:$0xff] }
 0x145   :  { %3473 = vmatpush1.bf16.msra.mxu0 %v4992_v10  ;;  %v4666_v10 = vcombine.low %v110_v62, %v114_v63  ;;  %v4843_v62 = vcombine.high %v286_v52, %v290_v55  ;;  %v166_v63 = vld [vmem:[#allocation6 + $0x1d0] sm:$0xff] }
 0x146   :  { %3474 = vmatprep.subr.bf16.mxu0 %v5001_v12  ;;  %v4675_v12 = vcombine.high %v118_v6, %v122_v7 }
 0x147   :  { %3514 = vmatpush1.bf16.msra.mxu1 %v5120_v11  ;;  %v4794_v11 = vcombine.low %v238_v0, %v242_v1  ;;  %v170_v0 = vld [vmem:[#allocation6 + $0x1f0] sm:$0xff] }
 0x148   :  { %3515 = vmatprep.subr.bf16.mxu1 %v5129_v13  ;;  %v4803_v13 = vcombine.high %v246_v8, %v250_v9 }
 0x149   :  { %3475 = vmatpush1.bf16.msra.mxu0 %v5000_v21  ;;  %v4674_v21 = vcombine.low %v118_v6, %v122_v7 }
 0x14a   :  { %3476 = vmatprep.subr.bf16.mxu0 %v5009_v24  ;;  %v4683_v24 = vcombine.high %v126_v14, %v130_v15 }
 0x14b   :  { %3516 = vmatpush1.bf16.msra.mxu1 %v5128_v23  ;;  %v4802_v23 = vcombine.low %v246_v8, %v250_v9  ;;  %v4714_v8 = vcombine.low %v158_v50, %v162_v51 }
 0x14c   :  { %3517 = vmatprep.subr.bf16.mxu1 %v5137_v25  ;;  %v4811_v25 = vcombine.high %v254_v17, %v258_v18 }
 0x14d   :  { %3477 = vmatpush1.bf16.msra.mxu0 %v5008_v30  ;;  %v4682_v30 = vcombine.low %v126_v14, %v130_v15 }
 0x14e   :  { %3478 = vmatprep.subr.bf16.mxu0 %v5017_v32  ;;  %v4691_v32 = vcombine.high %v134_v26, %v138_v53 }
 0x14f   :  { %3518 = vmatpush1.bf16.msra.mxu1 %v5136_v31  ;;  %v4810_v31 = vcombine.low %v254_v17, %v258_v18  ;;  %v174_v17 = vld [vmem:[#allocation6 + $0x210] sm:$0xff] }
 0x150   :  { %3519 = vmatprep.subr.bf16.mxu1 %v5145_v33  ;;  %v4819_v33 = vcombine.high %v262_v27, %v266_v28  ;;  %v178_v18 = vld [vmem:[#allocation6 + $0x230] sm:$0xff] }
 0x151   :  { %3479 = vmatpush1.bf16.msra.mxu0 %v5016_v40  ;;  %v4690_v40 = vcombine.low %v134_v26, %v138_v53  ;;  %v4731_v26 = vcombine.high %v174_v17, %v178_v18 }
 0x152   :  { %3480 = vmatprep.subr.bf16.mxu0 %v5025_v42  ;;  %v4699_v42 = vcombine.high %v142_v34, %v146_v35 }
 0x153   :  { %3520 = vmatpush1.bf16.msra.mxu1 %v5144_v41  ;;  %v4818_v41 = vcombine.low %v262_v27, %v266_v28  ;;  %v182_v27 = vld [vmem:[#allocation6 + $0x250] sm:$0xff] }
 0x154   :  { %3521 = vmatprep.subr.bf16.mxu1 %v5153_v43  ;;  %v4827_v43 = vcombine.high %v270_v36, %v274_v37  ;;  %v186_v28 = vld [vmem:[#allocation6 + $0x270] sm:$0xff] }
 0x155   :  { %3481 = vmatpush1.bf16.msra.mxu0 %v5024_v19  ;;  %v4698_v19 = vcombine.low %v142_v34, %v146_v35  ;;  %v4739_v34 = vcombine.high %v182_v27, %v186_v28 }
 0x156   :  { %3482 = vmatprep.subr.bf16.mxu0 %v5033_v48  ;;  %v4707_v48 = vcombine.high %v150_v44, %v154_v45 }
 0x157   :  { %3522 = vmatpush1.bf16.msra.mxu1 %v5152_v22  ;;  %v4826_v22 = vcombine.low %v270_v36, %v274_v37  ;;  %v190_v36 = vld [vmem:[#allocation6 + $0x290] sm:$0xff] }
 0x158   :  { %3523 = vmatprep.subr.bf16.mxu1 %v5161_v49  ;;  %v4835_v49 = vcombine.high %v278_v46, %v282_v47  ;;  %v194_v37 = vld [vmem:[#allocation6 + $0x2b0] sm:$0xff] }
 0x159   :  { %3483 = vmatpush1.bf16.msra.mxu0 %v5032_v56  ;;  %v4706_v56 = vcombine.low %v150_v44, %v154_v45  ;;  %v4747_v44 = vcombine.high %v190_v36, %v194_v37 }
 0x15a   :  { %3484 = vmatprep.subr.bf16.mxu0 %v5041_v60  ;;  %v4715_v60 = vcombine.high %v158_v50, %v162_v51 }
 0x15b   :  { %3524 = vmatpush1.bf16.msra.mxu1 %v5160_v57  ;;  %v4834_v57 = vcombine.low %v278_v46, %v282_v47  ;;  %v198_v46 = vld [vmem:[#allocation6 + $0x2d0] sm:$0xff] }
 0x15c   :  { %3525 = vmatprep.subr.bf16.mxu1 %v5169_v61  ;;  %v202_v47 = vld [vmem:[#allocation6 + $0x2f0] sm:$0xff] }
 0x15d   :  { %3485 = vmatpush1.bf16.msra.mxu0 %v5040_v2  ;;  %v4755_v50 = vcombine.high %v198_v46, %v202_v47 }
 0x15e   :  { %3536 = vmatprep.subr.bf16.mxu0 %v4667_v4  ;;  %v298_v4 = vld [vmem:[#allocation6 + $0x5f0] sm:$0xff] }
 0x15f   :  { %3526 = vmatpush1.bf16.msra.mxu1 %v5168_v3  ;;  %v294_v3 = vld [vmem:[#allocation6 + $0x5d0] sm:$0xff] }
 0x160   :  { %3577 = vmatprep.subr.bf16.mxu1 %v4795_v5  ;;  %3487 = vmatmul.mubr.bf16.vlgmr.msra.gmra.mrb[12].mxu0 %v5689_v38  ;;  %v4851_v15 = vcombine.high %v294_v3, %v298_v4 }
 0x161   :  { %3537 = vmatpush1.bf16.msra.mxu0 %v4666_v10  ;;  %3568 = vmatprep.mubr.bf16.mxu0 %v5655_v58 }
 0x162   :  { %3528 = vmatmul.mubr.bf16.vlgmr.msra.gmra.mrb[12].mxu1 %v5693_v39  ;;  %3538 = vmatprep.subr.bf16.mxu0 %v4675_v12  ;;  %v4842_v12 = vcombine.low %v286_v52, %v290_v55  ;;  %v206_v52 = vld [vmem:[#allocation6 + $0x310] sm:$0xff] }
 0x163   :  { %3578 = vmatpush1.bf16.msra.mxu1 %v4794_v11  ;;  %3609 = vmatprep.mubr.bf16.mxu1 %v5659_v59  ;;  %v210_v55 = vld [vmem:[#allocation6 + $0x330] sm:$0xff] }
 0x164   :  { %3579 = vmatprep.subr.bf16.mxu1 %v4803_v13  ;;  %v4723_v13 = vcombine.high %v166_v63, %v170_v0 }
 0x165   :  { %3539 = vmatpush1.bf16.msra.mxu0 %v4674_v21  ;;  %v302_v21 = vld [vmem:[#allocation6 + $0x610] sm:$0xff] }
 0x166   :  { %3540 = vmatprep.subr.bf16.mxu0 %v4683_v24  ;;  %v4722_v24 = vcombine.low %v166_v63, %v170_v0  ;;  %v214_v0 = vld [vmem:[#allocation6 + $0x350] sm:$0xff] }
 0x167   :  { %3580 = vmatpush1.bf16.msra.mxu1 %v4802_v23  ;;  %v306_v23 = vld [vmem:[#allocation6 + $0x630] sm:$0xff] }
 0x168   :  { %3581 = vmatprep.subr.bf16.mxu1 %v4811_v25  ;;  %v4850_v25 = vcombine.low %v294_v3, %v298_v4  ;;  %v4859_v53 = vcombine.high %v302_v21, %v306_v23  ;;  %v346_v3 = vld [vmem:[#allocation6 + $0x770] sm:$0xff]  ;;  %v4762_v4 = vcombine.low %v206_v52, %v210_v55 }
 0x169   :  { %3541 = vmatpush1.bf16.msra.mxu0 %v4682_v30  ;;  %v310_v30 = vld [vmem:[#allocation6 + $0x650] sm:$0xff] }
 0x16a   :  { %3542 = vmatprep.subr.bf16.mxu0 %v4691_v32  ;;  %v4730_v32 = vcombine.low %v174_v17, %v178_v18 }
 0x16b   :  { %3582 = vmatpush1.bf16.msra.mxu1 %v4810_v31  ;;  %v314_v31 = vld [vmem:[#allocation6 + $0x670] sm:$0xff] }
 0x16c   :  { %3583 = vmatprep.subr.bf16.mxu1 %v4819_v33  ;;  %v4858_v33 = vcombine.low %v302_v21, %v306_v23  ;;  %v4867_v35 = vcombine.high %v310_v30, %v314_v31  ;;  %v230_v21 = vld [vmem:[#allocation6 + $0x3d0] sm:$0xff] }
 0x16d   :  { %3543 = vmatpush1.bf16.msra.mxu0 %v4690_v40  ;;  %v318_v40 = vld [vmem:[#allocation6 + $0x690] sm:$0xff] }
 0x16e   :  { %3544 = vmatprep.subr.bf16.mxu0 %v4699_v42  ;;  %v4738_v42 = vcombine.low %v182_v27, %v186_v28  ;;  %v234_v23 = vld [vmem:[#allocation6 + $0x3f0] sm:$0xff] }
 0x16f   :  { %3584 = vmatpush1.bf16.msra.mxu1 %v4818_v41  ;;  %v322_v41 = vld [vmem:[#allocation6 + $0x6b0] sm:$0xff]  ;;  %v4787_v27 = vcombine.high %v230_v21, %v234_v23 }
 0x170   :  { %3585 = vmatprep.subr.bf16.mxu1 %v4827_v43  ;;  %v4866_v43 = vcombine.low %v310_v30, %v314_v31  ;;  %v4875_v45 = vcombine.high %v318_v40, %v322_v41  ;;  %v366_v30 = vld [vmem:[#allocation6 + $0x810] sm:$0xff] }
 0x171   :  { %3545 = vmatpush1.bf16.msra.mxu0 %v4698_v19  ;;  %v326_v19 = vld [vmem:[#allocation6 + $0x6d0] sm:$0xff] }
 0x172   :  { %3546 = vmatprep.subr.bf16.mxu0 %v4707_v48  ;;  %v4746_v48 = vcombine.low %v190_v36, %v194_v37  ;;  %v370_v31 = vld [vmem:[#allocation6 + $0x830] sm:$0xff] }
 0x173   :  { %3586 = vmatpush1.bf16.msra.mxu1 %v4826_v22  ;;  %v3242_v61 = vpop.f32.mrb[0].mxu0  ;;  %v330_v22 = vld [vmem:[#allocation6 + $0x6f0] sm:$0xff]  ;;  %v4923_v36 = vcombine.high %v366_v30, %v370_v31 }
 0x174   :  { %3587 = vmatprep.subr.bf16.mxu1 %v4835_v49  ;;  %v3244_v2 = vpop.f32.mrb[1].mxu0  ;;  %v4874_v49 = vcombine.low %v318_v40, %v322_v41  ;;  %v4883_v51 = vcombine.high %v326_v19, %v330_v22  ;;  %v374_v40 = vld [vmem:[#allocation6 + $0x850] sm:$0xff] }
 0x175   :  { %v3283_v1 = vpop.f32.mrb[0].mxu1  ;;  %v3246_v7 = vpop.f32.mrb[2].mxu0  ;;  %3547 = vmatpush1.bf16.msra.mxu0 %v4706_v56  ;;  %v334_v56 = vld [vmem:[#allocation6 + $0x710] sm:$0xff] }
 0x176   :  { %v5707_v5 = vadd.f32 %v3283_v1, %v3242_v61  ;;  %v3285_v6 = vpop.f32.mrb[1].mxu1  ;;  %v3247_v11 = vpop.f32.mrb[3].mxu0  ;;  %3548 = vmatprep.subr.bf16.mxu0 %v4715_v60  ;;  %v4754_v60 = vcombine.low %v198_v46, %v202_v47  ;;  %v4882_v61 = vcombine.low %v326_v19, %v330_v22  ;;  %v218_v1 = vld [vmem:[#allocation6 + $0x370] sm:$0xff] }
 0x177   :  { %v5709_v9 = vadd.f32 %v3285_v6, %v3244_v2  ;;  %v3287_v10 = vpop.f32.mrb[2].mxu1  ;;  %3588 = vmatpush1.bf16.msra.mxu1 %v4834_v57  ;;  %v338_v57 = vld [vmem:[#allocation6 + $0x730] sm:$0xff]  ;;  %v4771_v7 = vcombine.high %v214_v0, %v218_v1 }
 0x178   :  { %v3288_v14 = vpop.f32.mrb[3].mxu1  ;;  %3589 = vmatprep.subr.bf16.mxu1 %v4843_v62  ;;  %v4763_v62 = vcombine.high %v206_v52, %v210_v55  ;;  %v4891_v63 = vcombine.high %v334_v56, %v338_v57  ;;  %v342_v2 = vld [vmem:[#allocation6 + $0x750] sm:$0xff]  ;;  %v4890_v6 = vcombine.low %v334_v56, %v338_v57 }
 0x179   :  { %3549 = vmatpush1.bf16.msra.mxu0 %v4714_v8  ;;  %v4899_v8 = vcombine.high %v342_v2, %v346_v3  ;;  %v222_v10 = vld [vmem:[#allocation6 + $0x390] sm:$0xff]  ;;  %v4770_v14 = vcombine.low %v214_v0, %v218_v1 }
 0x17a   :  { %3550 = vmatprep.subr.bf16.mxu0 %v4723_v13  ;;  %v226_v11 = vld [vmem:[#allocation6 + $0x3b0] sm:$0xff] }
 0x17b   :  { %3590 = vmatpush1.bf16.msra.mxu1 %v4842_v12  ;;  %v350_v12 = vld [vmem:[#allocation6 + $0x790] sm:$0xff]  ;;  %v4779_v17 = vcombine.high %v222_v10, %v226_v11 }
 0x17c   :  { %3591 = vmatprep.subr.bf16.mxu1 %v4851_v15  ;;  %v354_v13 = vld [vmem:[#allocation6 + $0x7b0] sm:$0xff]  ;;  %v4898_v15 = vcombine.low %v342_v2, %v346_v3 }
 0x17d   :  { %3551 = vmatpush1.bf16.msra.mxu0 %v4722_v24  ;;  %v4907_v18 = vcombine.high %v350_v12, %v354_v13  ;;  %v358_v24 = vld [vmem:[#allocation6 + $0x7d0] sm:$0xff] }
 0x17e   :  { %3552 = vmatprep.subr.bf16.mxu0 %v4731_v26  ;;  %v4778_v26 = vcombine.low %v222_v10, %v226_v11  ;;  %v378_v41 = vld [vmem:[#allocation6 + $0x870] sm:$0xff] }
 0x17f   :  { %3592 = vmatpush1.bf16.msra.mxu1 %v4850_v25  ;;  %v362_v25 = vld [vmem:[#allocation6 + $0x7f0] sm:$0xff]  ;;  %v4931_v46 = vcombine.high %v374_v40, %v378_v41 }
 0x180   :  { %3593 = vmatprep.subr.bf16.mxu1 %v4859_v53  ;;  %v4906_v53 = vcombine.low %v350_v12, %v354_v13  ;;  %v4915_v28 = vcombine.high %v358_v24, %v362_v25  ;;  %v382_v19 = vld [vmem:[#allocation6 + $0x890] sm:$0xff] }
 0x181   :  { %3553 = vmatpush1.bf16.msra.mxu0 %v4730_v32  ;;  %v494_v32 = vld [vmem:[#allocation6 + $0xc10] sm:$0xff] }
 0x182   :  { %3554 = vmatprep.subr.bf16.mxu0 %v4739_v34  ;;  %v4786_v34 = vcombine.low %v230_v21, %v234_v23  ;;  %v386_v22 = vld [vmem:[#allocation6 + $0x8b0] sm:$0xff] }
 0x183   :  { %3594 = vmatpush1.bf16.msra.mxu1 %v4858_v33  ;;  %v498_v33 = vld [vmem:[#allocation6 + $0xc30] sm:$0xff]  ;;  %v4939_v52 = vcombine.high %v382_v19, %v386_v22 }
 0x184   :  { %3595 = vmatprep.subr.bf16.mxu1 %v4867_v35  ;;  %v4914_v35 = vcombine.low %v358_v24, %v362_v25  ;;  %v5051_v37 = vcombine.high %v494_v32, %v498_v33  ;;  %v390_v56 = vld [vmem:[#allocation6 + $0x8d0] sm:$0xff] }
 0x185   :  { %3555 = vmatpush1.bf16.msra.mxu0 %v4738_v42  ;;  %v502_v42 = vld [vmem:[#allocation6 + $0xc50] sm:$0xff] }
 0x186   :  { %3556 = vmatprep.subr.bf16.mxu0 %v4747_v44  ;;  %v4922_v44 = vcombine.low %v366_v30, %v370_v31  ;;  %v394_v57 = vld [vmem:[#allocation6 + $0x8f0] sm:$0xff] }
 0x187   :  { %3596 = vmatpush1.bf16.msra.mxu1 %v4866_v43  ;;  %v506_v43 = vld [vmem:[#allocation6 + $0xc70] sm:$0xff]  ;;  %v4947_v0 = vcombine.high %v390_v56, %v394_v57 }
 0x188   :  { %3597 = vmatprep.subr.bf16.mxu1 %v4875_v45  ;;  %v5050_v45 = vcombine.low %v494_v32, %v498_v33  ;;  %v5059_v47 = vcombine.high %v502_v42, %v506_v43  ;;  %v398_v2 = vld [vmem:[#allocation6 + $0x910] sm:$0xff] }
 0x189   :  { %3557 = vmatpush1.bf16.msra.mxu0 %v4746_v48  ;;  %v510_v48 = vld [vmem:[#allocation6 + $0xc90] sm:$0xff] }
 0x18a   :  { %3558 = vmatprep.subr.bf16.mxu0 %v4755_v50  ;;  %v4930_v50 = vcombine.low %v374_v40, %v378_v41  ;;  %v402_v3 = vld [vmem:[#allocation6 + $0x930] sm:$0xff] }
 0x18b   :  { %3598 = vmatpush1.bf16.msra.mxu1 %v4874_v49  ;;  %v514_v49 = vld [vmem:[#allocation6 + $0xcb0] sm:$0xff]  ;;  %v4955_v10 = vcombine.high %v398_v2, %v402_v3 }
 0x18c   :  { %3599 = vmatprep.subr.bf16.mxu1 %v4883_v51  ;;  %v5058_v51 = vcombine.low %v502_v42, %v506_v43  ;;  %v5067_v55 = vcombine.high %v510_v48, %v514_v49  ;;  %v406_v12 = vld [vmem:[#allocation6 + $0x950] sm:$0xff] }
 0x18d   :  { %3559 = vmatpush1.bf16.msra.mxu0 %v4754_v60  ;;  %v518_v60 = vld [vmem:[#allocation6 + $0xcd0] sm:$0xff] }
 0x18e   :  { %3560 = vmatprep.subr.bf16.mxu0 %v4763_v62  ;;  %v4938_v62 = vcombine.low %v382_v19, %v386_v22  ;;  %v410_v13 = vld [vmem:[#allocation6 + $0x970] sm:$0xff] }
 0x18f   :  { %3600 = vmatpush1.bf16.msra.mxu1 %v4882_v61  ;;  %v522_v61 = vld [vmem:[#allocation6 + $0xcf0] sm:$0xff]  ;;  %v4963_v21 = vcombine.high %v406_v12, %v410_v13 }
 0x190   :  { %3601 = vmatprep.subr.bf16.mxu1 %v4891_v63  ;;  %v5066_v63 = vcombine.low %v510_v48, %v514_v49  ;;  %v5075_v1 = vcombine.high %v518_v60, %v522_v61  ;;  %v414_v24 = vld [vmem:[#allocation6 + $0x990] sm:$0xff] }
 0x191   :  { %3561 = vmatpush1.bf16.msra.mxu0 %v4762_v4  ;;  %v526_v4 = vld [vmem:[#allocation6 + $0xd10] sm:$0xff] }
 0x192   :  { %3562 = vmatprep.subr.bf16.mxu0 %v4771_v7  ;;  %v4946_v7 = vcombine.low %v390_v56, %v394_v57  ;;  %v418_v25 = vld [vmem:[#allocation6 + $0x9b0] sm:$0xff] }
 0x193   :  { %3602 = vmatpush1.bf16.msra.mxu1 %v4890_v6  ;;  %v530_v6 = vld [vmem:[#allocation6 + $0xd30] sm:$0xff]  ;;  %v4971_v30 = vcombine.high %v414_v24, %v418_v25 }
 0x194   :  { %3603 = vmatprep.subr.bf16.mxu1 %v4899_v8  ;;  %v5074_v8 = vcombine.low %v518_v60, %v522_v61  ;;  %v5083_v11 = vcombine.high %v526_v4, %v530_v6  ;;  %v422_v33 = vld [vmem:[#allocation6 + $0x9d0] sm:$0xff] }
 0x195   :  { %3563 = vmatpush1.bf16.msra.mxu0 %v4770_v14  ;;  %v534_v14 = vld [vmem:[#allocation6 + $0xd50] sm:$0xff] }
 0x196   :  { %3564 = vmatprep.subr.bf16.mxu0 %v4779_v17  ;;  %v4954_v17 = vcombine.low %v398_v2, %v402_v3  ;;  %v550_v40 = vld [vmem:[#allocation6 + $0xdd0] sm:$0xff] }
 0x197   :  { %3604 = vmatpush1.bf16.msra.mxu1 %v4898_v15  ;;  %v538_v15 = vld [vmem:[#allocation6 + $0xd70] sm:$0xff] }
 0x198   :  { %3605 = vmatprep.subr.bf16.mxu1 %v4907_v18  ;;  %v5082_v18 = vcombine.low %v526_v4, %v530_v6  ;;  %v5091_v23 = vcombine.high %v534_v14, %v538_v15  ;;  %v554_v41 = vld [vmem:[#allocation6 + $0xdf0] sm:$0xff] }
 0x199   :  { %3565 = vmatpush1.bf16.msra.mxu0 %v4778_v26  ;;  %v542_v26 = vld [vmem:[#allocation6 + $0xd90] sm:$0xff]  ;;  %v5106_v57 = vcombine.low %v550_v40, %v554_v41 }
 0x19a   :  { %3566 = vmatprep.subr.bf16.mxu0 %v4787_v27  ;;  %v4962_v27 = vcombine.low %v406_v12, %v410_v13 }
 0x19b   :  { %3606 = vmatpush1.bf16.msra.mxu1 %v4906_v53  ;;  %v546_v53 = vld [vmem:[#allocation6 + $0xdb0] sm:$0xff] }
 0x19c   :  { %3607 = vmatprep.subr.bf16.mxu1 %v4915_v28  ;;  %v5090_v28 = vcombine.low %v534_v14, %v538_v15  ;;  %v5099_v32 = vcombine.high %v542_v26, %v546_v53  ;;  %v5098_v22 = vcombine.low %v542_v26, %v546_v53 }
 0x19d   :  { %3567 = vmatpush1.bf16.msra.mxu0 %v4786_v34  ;;  %v426_v34 = vld [vmem:[#allocation6 + $0x9f0] sm:$0xff] }
 0x19e   :  { %3618 = vmatprep.subr.bf16.mxu0 %v4923_v36  ;;  %v4979_v48 = vcombine.high %v422_v33, %v426_v34  ;;  %v4978_v56 = vcombine.low %v422_v33, %v426_v34 }
 0x19f   :  { %3608 = vmatpush1.bf16.msra.mxu1 %v4914_v35 }
 0x1a0   :  { %3659 = vmatprep.subr.bf16.mxu1 %v5051_v37  ;;  %3569 = vmatmul.mubr.bf16.vlgmr.msra.gmra.mrb[16].mxu0 %v5665_v16 }
 0x1a1   :  { %3619 = vmatpush1.bf16.msra.mxu0 %v4922_v44  ;;  %3650 = vmatprep.mubr.bf16.mxu0 %v5677_v29 }
 0x1a2   :  { %3610 = vmatmul.mubr.bf16.vlgmr.msra.gmra.mrb[16].mxu1 %v5671_v20  ;;  %3620 = vmatprep.subr.bf16.mxu0 %v4931_v46 }
 0x1a3   :  { %3660 = vmatpush1.bf16.msra.mxu1 %v5050_v45  ;;  %3691 = vmatprep.mubr.bf16.mxu1 %v5682_v54  ;;  %v4970_v45 = vcombine.low %v414_v24, %v418_v25 }
 0x1a4   :  { %3661 = vmatprep.subr.bf16.mxu1 %v5059_v47 }
 0x1a5   :  { %3621 = vmatpush1.bf16.msra.mxu0 %v4930_v50  ;;  %v5107_v50 = vcombine.high %v550_v40, %v554_v41  ;;  %v598_v40 = vld [vmem:[#allocation6 + $0xf50] sm:$0xff] }
 0x1a6   :  { %3622 = vmatprep.subr.bf16.mxu0 %v4939_v52  ;;  %v434_v52 = vld [vmem:[#allocation6 + $0xa30] sm:$0xff] }
 0x1a7   :  { %3662 = vmatpush1.bf16.msra.mxu1 %v5058_v51  ;;  %v430_v51 = vld [vmem:[#allocation6 + $0xa10] sm:$0xff] }
 0x1a8   :  { %3663 = vmatprep.subr.bf16.mxu1 %v5067_v55  ;;  %v562_v55 = vld [vmem:[#allocation6 + $0xe30] sm:$0xff]  ;;  %v4987_v60 = vcombine.high %v430_v51, %v434_v52  ;;  %v4986_v2 = vcombine.low %v430_v51, %v434_v52 }
 0x1a9   :  { %3623 = vmatpush1.bf16.msra.mxu0 %v4938_v62  ;;  %v438_v62 = vld [vmem:[#allocation6 + $0xa50] sm:$0xff] }
 0x1aa   :  { %3624 = vmatprep.subr.bf16.mxu0 %v4947_v0  ;;  %v566_v0 = vld [vmem:[#allocation6 + $0xe50] sm:$0xff] }
 0x1ab   :  { %3664 = vmatpush1.bf16.msra.mxu1 %v5066_v63  ;;  %v442_v63 = vld [vmem:[#allocation6 + $0xa70] sm:$0xff] }
 0x1ac   :  { %3665 = vmatprep.subr.bf16.mxu1 %v5075_v1  ;;  %v570_v1 = vld [vmem:[#allocation6 + $0xe70] sm:$0xff]  ;;  %v4995_v4 = vcombine.high %v438_v62, %v442_v63  ;;  %v4994_v12 = vcombine.low %v438_v62, %v442_v63 }
 0x1ad   :  { %3625 = vmatpush1.bf16.msra.mxu0 %v4946_v7  ;;  %v5123_v6 = vcombine.high %v566_v0, %v570_v1  ;;  %v446_v7 = vld [vmem:[#allocation6 + $0xa90] sm:$0xff]  ;;  %v5122_v13 = vcombine.low %v566_v0, %v570_v1  ;;  %v111_v0 = vld [vmem:[#allocation6 + $0x18] sm:$0xff] }
 0x1ae   :  { %3626 = vmatprep.subr.bf16.mxu0 %v4955_v10  ;;  %v574_v10 = vld [vmem:[#allocation6 + $0xe90] sm:$0xff]  ;;  %v115_v1 = vld [vmem:[#allocation6 + $0x38] sm:$0xff] }
 0x1af   :  { %3666 = vmatpush1.bf16.msra.mxu1 %v5074_v8  ;;  %v450_v8 = vld [vmem:[#allocation6 + $0xab0] sm:$0xff] }
 0x1b0   :  { %3667 = vmatprep.subr.bf16.mxu1 %v5083_v11  ;;  %v578_v11 = vld [vmem:[#allocation6 + $0xeb0] sm:$0xff]  ;;  %v5003_v14 = vcombine.high %v446_v7, %v450_v8  ;;  %v5002_v24 = vcombine.low %v446_v7, %v450_v8  ;;  %v4669_v7 = vcombine.high %v111_v0, %v115_v1 }
 0x1b1   :  { %3627 = vmatpush1.bf16.msra.mxu0 %v4954_v17  ;;  %v5131_v15 = vcombine.high %v574_v10, %v578_v11  ;;  %v454_v17 = vld [vmem:[#allocation6 + $0xad0] sm:$0xff]  ;;  %v5130_v25 = vcombine.low %v574_v10, %v578_v11  ;;  %v119_v10 = vld [vmem:[#allocation6 + $0x58] sm:$0xff] }
 0x1b2   :  { %3628 = vmatprep.subr.bf16.mxu0 %v4963_v21  ;;  %v582_v21 = vld [vmem:[#allocation6 + $0xed0] sm:$0xff]  ;;  %v123_v11 = vld [vmem:[#allocation6 + $0x78] sm:$0xff] }
 0x1b3   :  { %3668 = vmatpush1.bf16.msra.mxu1 %v5082_v18  ;;  %v3324_v31 = vpop.f32.mrb[4].mxu0  ;;  %v458_v18 = vld [vmem:[#allocation6 + $0xaf0] sm:$0xff] }
 0x1b4   :  { %3669 = vmatprep.subr.bf16.mxu1 %v5091_v23  ;;  %v3325_v35 = vadd.f32 %v3324_v31, %v5707_v5  ;;  %v3326_v37 = vpop.f32.mrb[5].mxu0  ;;  %v586_v23 = vld [vmem:[#allocation6 + $0xef0] sm:$0xff]  ;;  %v5011_v26 = vcombine.high %v454_v17, %v458_v18 }
 0x1b5   :  { %v3365_v36 = vpop.f32.mrb[4].mxu1  ;;  %v3327_v42 = vadd.f32 %v3326_v37, %v5709_v9  ;;  %v3328_v44 = vpop.f32.mrb[6].mxu0  ;;  %3629 = vmatpush1.bf16.msra.mxu0 %v4962_v27  ;;  %v558_v9 = vld [vmem:[#allocation6 + $0xe10] sm:$0xff]  ;;  %v5139_v53 = vcombine.high %v582_v21, %v586_v23  ;;  %v5138_v33 = vcombine.low %v582_v21, %v586_v23  ;;  %v127_v21 = vld [vmem:[#allocation6 + $0x98] sm:$0xff] }
 0x1b6   :  { %v3367_v43 = vpop.f32.mrb[5].mxu1  ;;  %v5717_v46 = vadd.f32 %v3365_v36, %v3325_v35  ;;  %v3329_v19 = vpop.f32.mrb[7].mxu0  ;;  %3630 = vmatprep.subr.bf16.mxu0 %v4971_v30  ;;  %v5115_v61 = vcombine.high %v558_v9, %v562_v55  ;;  %v5114_v3 = vcombine.low %v558_v9, %v562_v55  ;;  %v462_v27 = vld [vmem:[#allocation6 + $0xb10] sm:$0xff]  ;;  %v131_v23 = vld [vmem:[#allocation6 + $0xb8] sm:$0xff] }
 0x1b7   :  { %v3369_v47 = vpop.f32.mrb[6].mxu1  ;;  %3670 = vmatpush1.bf16.msra.mxu1 %v5090_v28  ;;  %v5719_v49 = vadd.f32 %v3367_v43, %v3327_v42  ;;  %v466_v28 = vld [vmem:[#allocation6 + $0xb30] sm:$0xff] }
 0x1b8   :  { %v3370_v5 = vpop.f32.mrb[7].mxu1  ;;  %3671 = vmatprep.subr.bf16.mxu1 %v5099_v32  ;;  %v590_v30 = vld [vmem:[#allocation6 + $0xf10] sm:$0xff]  ;;  %v5010_v32 = vcombine.low %v454_v17, %v458_v18  ;;  %v5019_v34 = vcombine.high %v462_v27, %v466_v28  ;;  %v5018_v42 = vcombine.low %v462_v27, %v466_v28  ;;  %v4677_v17 = vcombine.high %v119_v10, %v123_v11 }
 0x1b9   :  { %3631 = vmatpush1.bf16.msra.mxu0 %v4970_v45  ;;  %v594_v31 = vld [vmem:[#allocation6 + $0xf30] sm:$0xff]  ;;  %v4685_v27 = vcombine.high %v127_v21, %v131_v23 }
 0x1ba   :  { %3632 = vmatprep.subr.bf16.mxu0 %v4979_v48  ;;  %v5147_v35 = vcombine.high %v590_v30, %v594_v31  ;;  %v470_v36 = vld [vmem:[#allocation6 + $0xb50] sm:$0xff]  ;;  %v5146_v43 = vcombine.low %v590_v30, %v594_v31  ;;  %v135_v30 = vld [vmem:[#allocation6 + $0xd8] sm:$0xff] }
 0x1bb   :  { %3672 = vmatpush1.bf16.msra.mxu1 %v5098_v22  ;;  %v474_v37 = vld [vmem:[#allocation6 + $0xb70] sm:$0xff]  ;;  %v139_v31 = vld [vmem:[#allocation6 + $0xf8] sm:$0xff] }
 0x1bc   :  { %3673 = vmatprep.subr.bf16.mxu1 %v5107_v50  ;;  %v602_v41 = vld [vmem:[#allocation6 + $0xf70] sm:$0xff]  ;;  %v5027_v44 = vcombine.high %v470_v36, %v474_v37  ;;  %v5026_v5 = vcombine.low %v470_v36, %v474_v37  ;;  %v4693_v36 = vcombine.high %v135_v30, %v139_v31 }
 0x1bd   :  { %3633 = vmatpush1.bf16.msra.mxu0 %v4978_v56  ;;  %v5155_v45 = vcombine.high %v598_v40, %v602_v41  ;;  %v478_v47 = vld [vmem:[#allocation6 + $0xb90] sm:$0xff]  ;;  %v5154_v50 = vcombine.low %v598_v40, %v602_v41  ;;  %v143_v40 = vld [vmem:[#allocation6 + $0x118] sm:$0xff] }
 0x1be   :  { %3634 = vmatprep.subr.bf16.mxu0 %v4987_v60  ;;  %v482_v19 = vld [vmem:[#allocation6 + $0xbb0] sm:$0xff]  ;;  %v147_v41 = vld [vmem:[#allocation6 + $0x138] sm:$0xff] }
 0x1bf   :  { %3674 = vmatpush1.bf16.msra.mxu1 %v5106_v57  ;;  %v606_v22 = vld [vmem:[#allocation6 + $0xf90] sm:$0xff]  ;;  %v5035_v51 = vcombine.high %v478_v47, %v482_v19  ;;  %v5034_v60 = vcombine.low %v478_v47, %v482_v19  ;;  %v151_v47 = vld [vmem:[#allocation6 + $0x158] sm:$0xff] }
 0x1c0   :  { %3675 = vmatprep.subr.bf16.mxu1 %v5115_v61  ;;  %v610_v48 = vld [vmem:[#allocation6 + $0xfb0] sm:$0xff]  ;;  %v155_v19 = vld [vmem:[#allocation6 + $0x178] sm:$0xff] }
 0x1c1   :  { %3635 = vmatpush1.bf16.msra.mxu0 %v4986_v2  ;;  %v5163_v52 = vcombine.high %v606_v22, %v610_v48  ;;  %v486_v9 = vld [vmem:[#allocation6 + $0xbd0] sm:$0xff]  ;;  %v5162_v61 = vcombine.low %v606_v22, %v610_v48  ;;  %v239_v2 = vld [vmem:[#allocation6 + $0x418] sm:$0xff] }
 0x1c2   :  { %3636 = vmatprep.subr.bf16.mxu0 %v4995_v4  ;;  %v490_v55 = vld [vmem:[#allocation6 + $0xbf0] sm:$0xff]  ;;  %v279_v22 = vld [vmem:[#allocation6 + $0x558] sm:$0xff] }
 0x1c3   :  { %3676 = vmatpush1.bf16.msra.mxu1 %v5114_v3  ;;  %v614_v56 = vld [vmem:[#allocation6 + $0xfd0] sm:$0xff]  ;;  %v5043_v62 = vcombine.high %v486_v9, %v490_v55  ;;  %v243_v3 = vld [vmem:[#allocation6 + $0x438] sm:$0xff]  ;;  %v5042_v4 = vcombine.low %v486_v9, %v490_v55 }
 0x1c4   :  { %3677 = vmatprep.subr.bf16.mxu1 %v5123_v6  ;;  %v618_v57 = vld [vmem:[#allocation6 + $0xff0] sm:$0xff]  ;;  %v4797_v8 = vcombine.high %v239_v2, %v243_v3  ;;  %v283_v48 = vld [vmem:[#allocation6 + $0x578] sm:$0xff] }
 0x1c5   :  { %3637 = vmatpush1.bf16.msra.mxu0 %v4994_v12  ;;  %v5171_v63 = vcombine.high %v614_v56, %v618_v57  ;;  %v5170_v6 = vcombine.low %v614_v56, %v618_v57  ;;  %v247_v12 = vld [vmem:[#allocation6 + $0x458] sm:$0xff] }
 0x1c6   :  { %3638 = vmatprep.subr.bf16.mxu0 %v5003_v14  ;;  %v4668_v14 = vcombine.low %v111_v0, %v115_v1  ;;  %v159_v9 = vld [vmem:[#allocation6 + $0x198] sm:$0xff] }
 0x1c7   :  { %3678 = vmatpush1.bf16.msra.mxu1 %v5122_v13  ;;  %v251_v13 = vld [vmem:[#allocation6 + $0x478] sm:$0xff] }
 0x1c8   :  { %3679 = vmatprep.subr.bf16.mxu1 %v5131_v15  ;;  %v4796_v15 = vcombine.low %v239_v2, %v243_v3  ;;  %v4805_v18 = vcombine.high %v247_v12, %v251_v13  ;;  %v163_v55 = vld [vmem:[#allocation6 + $0x1b8] sm:$0xff] }
 0x1c9   :  { %3639 = vmatpush1.bf16.msra.mxu0 %v5002_v24  ;;  %v255_v24 = vld [vmem:[#allocation6 + $0x498] sm:$0xff] }
 0x1ca   :  { %3640 = vmatprep.subr.bf16.mxu0 %v5011_v26  ;;  %v4676_v26 = vcombine.low %v119_v10, %v123_v11  ;;  %v287_v56 = vld [vmem:[#allocation6 + $0x598] sm:$0xff] }
 0x1cb   :  { %3680 = vmatpush1.bf16.msra.mxu1 %v5130_v25  ;;  %v259_v25 = vld [vmem:[#allocation6 + $0x4b8] sm:$0xff] }
 0x1cc   :  { %3681 = vmatprep.subr.bf16.mxu1 %v5139_v53  ;;  %v4804_v53 = vcombine.low %v247_v12, %v251_v13  ;;  %v4813_v28 = vcombine.high %v255_v24, %v259_v25  ;;  %v291_v57 = vld [vmem:[#allocation6 + $0x5b8] sm:$0xff]  ;;  %v4716_v12 = vcombine.low %v159_v9, %v163_v55 }
 0x1cd   :  { %3641 = vmatpush1.bf16.msra.mxu0 %v5010_v32  ;;  %v263_v32 = vld [vmem:[#allocation6 + $0x4d8] sm:$0xff]  ;;  %v4845_v0 = vcombine.high %v287_v56, %v291_v57 }
 0x1ce   :  { %3642 = vmatprep.subr.bf16.mxu0 %v5019_v34  ;;  %v4684_v34 = vcombine.low %v127_v21, %v131_v23  ;;  %v167_v1 = vld [vmem:[#allocation6 + $0x1d8] sm:$0xff] }
 0x1cf   :  { %3682 = vmatpush1.bf16.msra.mxu1 %v5138_v33  ;;  %v267_v33 = vld [vmem:[#allocation6 + $0x4f8] sm:$0xff] }
 0x1d0   :  { %3683 = vmatprep.subr.bf16.mxu1 %v5147_v35  ;;  %v4812_v35 = vcombine.low %v255_v24, %v259_v25  ;;  %v4821_v37 = vcombine.high %v263_v32, %v267_v33  ;;  %v171_v2 = vld [vmem:[#allocation6 + $0x1f8] sm:$0xff] }
 0x1d1   :  { %3643 = vmatpush1.bf16.msra.mxu0 %v5018_v42  ;;  %v271_v42 = vld [vmem:[#allocation6 + $0x518] sm:$0xff] }
 0x1d2   :  { %3644 = vmatprep.subr.bf16.mxu0 %v5027_v44  ;;  %v4692_v44 = vcombine.low %v135_v30, %v139_v31  ;;  %v175_v24 = vld [vmem:[#allocation6 + $0x218] sm:$0xff] }
 0x1d3   :  { %3684 = vmatpush1.bf16.msra.mxu1 %v5146_v43  ;;  %v275_v43 = vld [vmem:[#allocation6 + $0x538] sm:$0xff] }
 0x1d4   :  { %3685 = vmatprep.subr.bf16.mxu1 %v5155_v45  ;;  %v4701_v45 = vcombine.high %v143_v40, %v147_v41  ;;  %v179_v25 = vld [vmem:[#allocation6 + $0x238] sm:$0xff] }
 0x1d5   :  { %3645 = vmatpush1.bf16.msra.mxu0 %v5026_v5  ;;  %v4700_v5 = vcombine.low %v143_v40, %v147_v41  ;;  %v4733_v30 = vcombine.high %v175_v24, %v179_v25 }
 0x1d6   :  { %3646 = vmatprep.subr.bf16.mxu0 %v5035_v51  ;;  %v4709_v51 = vcombine.high %v151_v47, %v155_v19 }
 0x1d7   :  { %3686 = vmatpush1.bf16.msra.mxu1 %v5154_v50  ;;  %v4828_v50 = vcombine.low %v271_v42, %v275_v43 }
 0x1d8   :  { %3687 = vmatprep.subr.bf16.mxu1 %v5163_v52  ;;  %v4837_v52 = vcombine.high %v279_v22, %v283_v48 }
 0x1d9   :  { %3647 = vmatpush1.bf16.msra.mxu0 %v5034_v60  ;;  %v4708_v60 = vcombine.low %v151_v47, %v155_v19 }
 0x1da   :  { %3648 = vmatprep.subr.bf16.mxu0 %v5043_v62  ;;  %v4717_v62 = vcombine.high %v159_v9, %v163_v55 }
 0x1db   :  { %3688 = vmatpush1.bf16.msra.mxu1 %v5162_v61  ;;  %v4836_v61 = vcombine.low %v279_v22, %v283_v48  ;;  %v199_v22 = vld [vmem:[#allocation6 + $0x2d8] sm:$0xff] }
 0x1dc   :  { %3689 = vmatprep.subr.bf16.mxu1 %v5171_v63  ;;  %v203_v48 = vld [vmem:[#allocation6 + $0x2f8] sm:$0xff] }
 0x1dd   :  { %3649 = vmatpush1.bf16.msra.mxu0 %v5042_v4  ;;  %v4757_v9 = vcombine.high %v199_v22, %v203_v48 }
 0x1de   :  { %3700 = vmatprep.subr.bf16.mxu0 %v4669_v7  ;;  %v299_v7 = vld [vmem:[#allocation6 + $0x5f8] sm:$0xff] }
 0x1df   :  { %3690 = vmatpush1.bf16.msra.mxu1 %v5170_v6  ;;  %v295_v6 = vld [vmem:[#allocation6 + $0x5d8] sm:$0xff] }
 0x1e0   :  { %3741 = vmatprep.subr.bf16.mxu1 %v4797_v8  ;;  %3651 = vmatmul.mubr.bf16.vlgmr.msra.gmra.mrb[20].mxu0 %v5689_v38  ;;  %v4853_v23 = vcombine.high %v295_v6, %v299_v7 }
 0x1e1   :  { %3701 = vmatpush1.bf16.msra.mxu0 %v4668_v14  ;;  %3732 = vmatprep.mubr.bf16.mxu0 %v5655_v58  ;;  %v4820_v58 = vcombine.low %v263_v32, %v267_v33  ;;  %v183_v32 = vld [vmem:[#allocation6 + $0x258] sm:$0xff] }
 0x1e2   :  { %3692 = vmatmul.mubr.bf16.vlgmr.msra.gmra.mrb[20].mxu1 %v5693_v39  ;;  %3702 = vmatprep.subr.bf16.mxu0 %v4677_v17  ;;  %v4844_v17 = vcombine.low %v287_v56, %v291_v57  ;;  %v187_v33 = vld [vmem:[#allocation6 + $0x278] sm:$0xff] }
 0x1e3   :  { %3742 = vmatpush1.bf16.msra.mxu1 %v4796_v15  ;;  %3773 = vmatprep.mubr.bf16.mxu1 %v5659_v59  ;;  %v4829_v59 = vcombine.high %v271_v42, %v275_v43  ;;  %v4741_v40 = vcombine.high %v183_v32, %v187_v33  ;;  %v191_v42 = vld [vmem:[#allocation6 + $0x298] sm:$0xff] }
 0x1e4   :  { %3743 = vmatprep.subr.bf16.mxu1 %v4805_v18  ;;  %v4725_v18 = vcombine.high %v167_v1, %v171_v2  ;;  %v195_v43 = vld [vmem:[#allocation6 + $0x2b8] sm:$0xff] }
 0x1e5   :  { %3703 = vmatpush1.bf16.msra.mxu0 %v4676_v26  ;;  %v303_v26 = vld [vmem:[#allocation6 + $0x618] sm:$0xff]  ;;  %v4749_v47 = vcombine.high %v191_v42, %v195_v43 }
 0x1e6   :  { %3704 = vmatprep.subr.bf16.mxu0 %v4685_v27  ;;  %v4724_v27 = vcombine.low %v167_v1, %v171_v2  ;;  %v207_v56 = vld [vmem:[#allocation6 + $0x318] sm:$0xff] }
 0x1e7   :  { %3744 = vmatpush1.bf16.msra.mxu1 %v4804_v53  ;;  %v307_v53 = vld [vmem:[#allocation6 + $0x638] sm:$0xff] }
 0x1e8   :  { %3745 = vmatprep.subr.bf16.mxu1 %v4813_v28  ;;  %v4852_v28 = vcombine.low %v295_v6, %v299_v7  ;;  %v4861_v31 = vcombine.high %v303_v26, %v307_v53  ;;  %v211_v57 = vld [vmem:[#allocation6 + $0x338] sm:$0xff] }
 0x1e9   :  { %3705 = vmatpush1.bf16.msra.mxu0 %v4684_v34  ;;  %v311_v34 = vld [vmem:[#allocation6 + $0x658] sm:$0xff]  ;;  %v4764_v7 = vcombine.low %v207_v56, %v211_v57 }
 0x1ea   :  { %3706 = vmatprep.subr.bf16.mxu0 %v4693_v36  ;;  %v4732_v36 = vcombine.low %v175_v24, %v179_v25  ;;  %v215_v2 = vld [vmem:[#allocation6 + $0x358] sm:$0xff] }
 0x1eb   :  { %3746 = vmatpush1.bf16.msra.mxu1 %v4812_v35  ;;  %v315_v35 = vld [vmem:[#allocation6 + $0x678] sm:$0xff] }
 0x1ec   :  { %3747 = vmatprep.subr.bf16.mxu1 %v4821_v37  ;;  %v4860_v37 = vcombine.low %v303_v26, %v307_v53  ;;  %v4869_v41 = vcombine.high %v311_v34, %v315_v35  ;;  %v347_v6 = vld [vmem:[#allocation6 + $0x778] sm:$0xff] }
 0x1ed   :  { %3707 = vmatpush1.bf16.msra.mxu0 %v4692_v44  ;;  %v319_v44 = vld [vmem:[#allocation6 + $0x698] sm:$0xff] }
 0x1ee   :  { %3708 = vmatprep.subr.bf16.mxu0 %v4701_v45  ;;  %v4740_v45 = vcombine.low %v183_v32, %v187_v33  ;;  %v231_v26 = vld [vmem:[#allocation6 + $0x3d8] sm:$0xff] }
 0x1ef   :  { %3748 = vmatpush1.bf16.msra.mxu1 %v4820_v58  ;;  %v323_v58 = vld [vmem:[#allocation6 + $0x6b8] sm:$0xff] }
 0x1f0   :  { %3749 = vmatprep.subr.bf16.mxu1 %v4829_v59  ;;  %v4868_v59 = vcombine.low %v311_v34, %v315_v35  ;;  %v4877_v19 = vcombine.high %v319_v44, %v323_v58  ;;  %v235_v53 = vld [vmem:[#allocation6 + $0x3f8] sm:$0xff] }
 0x1f1   :  { %3709 = vmatpush1.bf16.msra.mxu0 %v4700_v5  ;;  %v327_v5 = vld [vmem:[#allocation6 + $0x6d8] sm:$0xff]  ;;  %v4789_v32 = vcombine.high %v231_v26, %v235_v53 }
 0x1f2   :  { %3710 = vmatprep.subr.bf16.mxu0 %v4709_v51  ;;  %v4748_v51 = vcombine.low %v191_v42, %v195_v43  ;;  %v367_v34 = vld [vmem:[#allocation6 + $0x818] sm:$0xff] }
 0x1f3   :  { %3750 = vmatpush1.bf16.msra.mxu1 %v4828_v50  ;;  %v3406_v63 = vpop.f32.mrb[8].mxu0  ;;  %v331_v50 = vld [vmem:[#allocation6 + $0x6f8] sm:$0xff] }
 0x1f4   :  { %3751 = vmatprep.subr.bf16.mxu1 %v4837_v52  ;;  %v3408_v4 = vpop.f32.mrb[9].mxu0  ;;  %v4876_v52 = vcombine.low %v319_v44, %v323_v58  ;;  %v4885_v55 = vcombine.high %v327_v5, %v331_v50  ;;  %v371_v35 = vld [vmem:[#allocation6 + $0x838] sm:$0xff] }
 0x1f5   :  { %v3447_v3 = vpop.f32.mrb[8].mxu1  ;;  %v3410_v11 = vpop.f32.mrb[10].mxu0  ;;  %3711 = vmatpush1.bf16.msra.mxu0 %v4708_v60  ;;  %v335_v60 = vld [vmem:[#allocation6 + $0x718] sm:$0xff]  ;;  %v4925_v42 = vcombine.high %v367_v34, %v371_v35 }
 0x1f6   :  { %v5725_v8 = vadd.f32 %v3447_v3, %v3406_v63  ;;  %v3449_v10 = vpop.f32.mrb[9].mxu1  ;;  %v3411_v15 = vpop.f32.mrb[11].mxu0  ;;  %3712 = vmatprep.subr.bf16.mxu0 %v4717_v62  ;;  %v4756_v62 = vcombine.low %v199_v22, %v203_v48  ;;  %v4884_v63 = vcombine.low %v327_v5, %v331_v50  ;;  %v219_v3 = vld [vmem:[#allocation6 + $0x378] sm:$0xff] }
 0x1f7   :  { %v5727_v13 = vadd.f32 %v3449_v10, %v3408_v4  ;;  %v3451_v14 = vpop.f32.mrb[10].mxu1  ;;  %3752 = vmatpush1.bf16.msra.mxu1 %v4836_v61  ;;  %v339_v61 = vld [vmem:[#allocation6 + $0x738] sm:$0xff]  ;;  %v4773_v11 = vcombine.high %v215_v2, %v219_v3 }
 0x1f8   :  { %v3452_v21 = vpop.f32.mrb[11].mxu1  ;;  %3753 = vmatprep.subr.bf16.mxu1 %v4845_v0  ;;  %v4765_v0 = vcombine.high %v207_v56, %v211_v57  ;;  %v4893_v1 = vcombine.high %v335_v60, %v339_v61  ;;  %v343_v4 = vld [vmem:[#allocation6 + $0x758] sm:$0xff]  ;;  %v4892_v10 = vcombine.low %v335_v60, %v339_v61 }
 0x1f9   :  { %3713 = vmatpush1.bf16.msra.mxu0 %v4716_v12  ;;  %v4901_v12 = vcombine.high %v343_v4, %v347_v6  ;;  %v223_v14 = vld [vmem:[#allocation6 + $0x398] sm:$0xff]  ;;  %v4772_v21 = vcombine.low %v215_v2, %v219_v3 }
 0x1fa   :  { %3714 = vmatprep.subr.bf16.mxu0 %v4725_v18  ;;  %v227_v15 = vld [vmem:[#allocation6 + $0x3b8] sm:$0xff] }
 0x1fb   :  { %3754 = vmatpush1.bf16.msra.mxu1 %v4844_v17  ;;  %v351_v17 = vld [vmem:[#allocation6 + $0x798] sm:$0xff]  ;;  %v4781_v24 = vcombine.high %v223_v14, %v227_v15 }
 0x1fc   :  { %3755 = vmatprep.subr.bf16.mxu1 %v4853_v23  ;;  %v355_v18 = vld [vmem:[#allocation6 + $0x7b8] sm:$0xff]  ;;  %v4900_v23 = vcombine.low %v343_v4, %v347_v6 }
 0x1fd   :  { %3715 = vmatpush1.bf16.msra.mxu0 %v4724_v27  ;;  %v4909_v25 = vcombine.high %v351_v17, %v355_v18  ;;  %v359_v27 = vld [vmem:[#allocation6 + $0x7d8] sm:$0xff] }
 0x1fe   :  { %3716 = vmatprep.subr.bf16.mxu0 %v4733_v30  ;;  %v4780_v30 = vcombine.low %v223_v14, %v227_v15  ;;  %v375_v44 = vld [vmem:[#allocation6 + $0x858] sm:$0xff] }
 0x1ff   :  { %3756 = vmatpush1.bf16.msra.mxu1 %v4852_v28  ;;  %v363_v28 = vld [vmem:[#allocation6 + $0x7f8] sm:$0xff] }
 0x200   :  { %3757 = vmatprep.subr.bf16.mxu1 %v4861_v31  ;;  %v4908_v31 = vcombine.low %v351_v17, %v355_v18  ;;  %v4917_v33 = vcombine.high %v359_v27, %v363_v28  ;;  %v379_v58 = vld [vmem:[#allocation6 + $0x878] sm:$0xff] }
 0x201   :  { %3717 = vmatpush1.bf16.msra.mxu0 %v4732_v36  ;;  %v495_v36 = vld [vmem:[#allocation6 + $0xc18] sm:$0xff]  ;;  %v4933_v22 = vcombine.high %v375_v44, %v379_v58 }
 0x202   :  { %3718 = vmatprep.subr.bf16.mxu0 %v4741_v40  ;;  %v4788_v40 = vcombine.low %v231_v26, %v235_v53  ;;  %v383_v5 = vld [vmem:[#allocation6 + $0x898] sm:$0xff] }
 0x203   :  { %3758 = vmatpush1.bf16.msra.mxu1 %v4860_v37  ;;  %v499_v37 = vld [vmem:[#allocation6 + $0xc38] sm:$0xff] }
 0x204   :  { %3759 = vmatprep.subr.bf16.mxu1 %v4869_v41  ;;  %v4916_v41 = vcombine.low %v359_v27, %v363_v28  ;;  %v5053_v43 = vcombine.high %v495_v36, %v499_v37  ;;  %v387_v50 = vld [vmem:[#allocation6 + $0x8b8] sm:$0xff] }
 0x205   :  { %3719 = vmatpush1.bf16.msra.mxu0 %v4740_v45  ;;  %v503_v45 = vld [vmem:[#allocation6 + $0xc58] sm:$0xff]  ;;  %v4941_v56 = vcombine.high %v383_v5, %v387_v50 }
 0x206   :  { %3720 = vmatprep.subr.bf16.mxu0 %v4749_v47  ;;  %v4924_v47 = vcombine.low %v367_v34, %v371_v35  ;;  %v391_v60 = vld [vmem:[#allocation6 + $0x8d8] sm:$0xff] }
 0x207   :  { %3760 = vmatpush1.bf16.msra.mxu1 %v4868_v59  ;;  %v507_v59 = vld [vmem:[#allocation6 + $0xc78] sm:$0xff] }
 0x208   :  { %3761 = vmatprep.subr.bf16.mxu1 %v4877_v19  ;;  %v5052_v19 = vcombine.low %v495_v36, %v499_v37  ;;  %v5061_v48 = vcombine.high %v503_v45, %v507_v59  ;;  %v395_v61 = vld [vmem:[#allocation6 + $0x8f8] sm:$0xff] }
 0x209   :  { %3721 = vmatpush1.bf16.msra.mxu0 %v4748_v51  ;;  %v511_v51 = vld [vmem:[#allocation6 + $0xc98] sm:$0xff] }
 0x20a   :  { %3722 = vmatprep.subr.bf16.mxu0 %v4757_v9  ;;  %v4932_v9 = vcombine.low %v375_v44, %v379_v58  ;;  %v399_v2 = vld [vmem:[#allocation6 + $0x918] sm:$0xff] }
 0x20b   :  { %3762 = vmatpush1.bf16.msra.mxu1 %v4876_v52  ;;  %v515_v52 = vld [vmem:[#allocation6 + $0xcb8] sm:$0xff] }
 0x20c   :  { %3763 = vmatprep.subr.bf16.mxu1 %v4885_v55  ;;  %v5060_v55 = vcombine.low %v503_v45, %v507_v59  ;;  %v5069_v57 = vcombine.high %v511_v51, %v515_v52  ;;  %v403_v3 = vld [vmem:[#allocation6 + $0x938] sm:$0xff] }
 0x20d   :  { %3723 = vmatpush1.bf16.msra.mxu0 %v4756_v62  ;;  %v519_v62 = vld [vmem:[#allocation6 + $0xcd8] sm:$0xff]  ;;  %v4956_v17 = vcombine.low %v399_v2, %v403_v3 }
 0x20e   :  { %3724 = vmatprep.subr.bf16.mxu0 %v4765_v0  ;;  %v4949_v0 = vcombine.high %v391_v60, %v395_v61  ;;  %v527_v4 = vld [vmem:[#allocation6 + $0xd18] sm:$0xff] }
 0x20f   :  { %3764 = vmatpush1.bf16.msra.mxu1 %v4884_v63  ;;  %v523_v63 = vld [vmem:[#allocation6 + $0xcf8] sm:$0xff] }
 0x210   :  { %3765 = vmatprep.subr.bf16.mxu1 %v4893_v1  ;;  %v5077_v1 = vcombine.high %v519_v62, %v523_v63  ;;  %v531_v6 = vld [vmem:[#allocation6 + $0xd38] sm:$0xff] }
 0x211   :  { %3725 = vmatpush1.bf16.msra.mxu0 %v4764_v7  ;;  %v4948_v7 = vcombine.low %v391_v60, %v395_v61  ;;  %v535_v14 = vld [vmem:[#allocation6 + $0xd58] sm:$0xff]  ;;  %v5084_v18 = vcombine.low %v527_v4, %v531_v6 }
 0x212   :  { %3726 = vmatprep.subr.bf16.mxu0 %v4773_v11  ;;  %v407_v11 = vld [vmem:[#allocation6 + $0x958] sm:$0xff] }
 0x213   :  { %3766 = vmatpush1.bf16.msra.mxu1 %v4892_v10  ;;  %v4957_v10 = vcombine.high %v399_v2, %v403_v3  ;;  %v539_v15 = vld [vmem:[#allocation6 + $0xd78] sm:$0xff] }
 0x214   :  { %3767 = vmatprep.subr.bf16.mxu1 %v4901_v12  ;;  %v411_v12 = vld [vmem:[#allocation6 + $0x978] sm:$0xff]  ;;  %v5092_v28 = vcombine.low %v535_v14, %v539_v15 }
 0x215   :  { %3727 = vmatpush1.bf16.msra.mxu0 %v4772_v21  ;;  %v4965_v21 = vcombine.high %v407_v11, %v411_v12  ;;  %v543_v26 = vld [vmem:[#allocation6 + $0xd98] sm:$0xff]  ;;  %v4964_v27 = vcombine.low %v407_v11, %v411_v12 }
 0x216   :  { %3728 = vmatprep.subr.bf16.mxu0 %v4781_v24  ;;  %v415_v24 = vld [vmem:[#allocation6 + $0x998] sm:$0xff] }
 0x217   :  { %3768 = vmatpush1.bf16.msra.mxu1 %v4900_v23  ;;  %v5093_v23 = vcombine.high %v535_v14, %v539_v15  ;;  %v547_v53 = vld [vmem:[#allocation6 + $0xdb8] sm:$0xff] }
 0x218   :  { %3769 = vmatprep.subr.bf16.mxu1 %v4909_v25  ;;  %v419_v25 = vld [vmem:[#allocation6 + $0x9b8] sm:$0xff] }
 0x219   :  { %3729 = vmatpush1.bf16.msra.mxu0 %v4780_v30  ;;  %v4973_v30 = vcombine.high %v415_v24, %v419_v25  ;;  %v427_v34 = vld [vmem:[#allocation6 + $0x9f8] sm:$0xff]  ;;  %v4972_v58 = vcombine.low %v415_v24, %v419_v25 }
 0x21a   :  { %3730 = vmatprep.subr.bf16.mxu0 %v4789_v32  ;;  %v5101_v32 = vcombine.high %v543_v26, %v547_v53  ;;  %v439_v60 = vld [vmem:[#allocation6 + $0xa58] sm:$0xff] }
 0x21b   :  { %3770 = vmatpush1.bf16.msra.mxu1 %v4908_v31  ;;  %v443_v61 = vld [vmem:[#allocation6 + $0xa78] sm:$0xff] }
 0x21c   :  { %3771 = vmatprep.subr.bf16.mxu1 %v4917_v33  ;;  %v423_v33 = vld [vmem:[#allocation6 + $0x9d8] sm:$0xff] }
 0x21d   :  { %3731 = vmatpush1.bf16.msra.mxu0 %v4788_v40  ;;  %v551_v40 = vld [vmem:[#allocation6 + $0xdd8] sm:$0xff] }
 0x21e   :  { %3782 = vmatprep.subr.bf16.mxu0 %v4925_v42  ;;  %v447_v2 = vld [vmem:[#allocation6 + $0xa98] sm:$0xff] }
 0x21f   :  { %3772 = vmatpush1.bf16.msra.mxu1 %v4916_v41  ;;  %v555_v41 = vld [vmem:[#allocation6 + $0xdf8] sm:$0xff] }
 0x220   :  { %3823 = vmatprep.subr.bf16.mxu1 %v5053_v43  ;;  %3733 = vmatmul.mubr.bf16.vlgmr.msra.gmra.mrb[24].mxu0 %v5665_v16  ;;  %v4940_v16 = vcombine.low %v383_v5, %v387_v50  ;;  %v5109_v5 = vcombine.high %v551_v40, %v555_v41  ;;  %v431_v50 = vld [vmem:[#allocation6 + $0xa18] sm:$0xff] }
 0x221   :  { %3783 = vmatpush1.bf16.msra.mxu0 %v4924_v47  ;;  %3814 = vmatprep.mubr.bf16.mxu0 %v5677_v29  ;;  %v5076_v29 = vcombine.low %v519_v62, %v523_v63  ;;  %v567_v62 = vld [vmem:[#allocation6 + $0xe58] sm:$0xff] }
 0x222   :  { %3774 = vmatmul.mubr.bf16.vlgmr.msra.gmra.mrb[24].mxu1 %v5671_v20  ;;  %3784 = vmatprep.subr.bf16.mxu0 %v4933_v22  ;;  %v5068_v20 = vcombine.low %v511_v51, %v515_v52  ;;  %v4981_v22 = vcombine.high %v423_v33, %v427_v34  ;;  %v435_v51 = vld [vmem:[#allocation6 + $0xa38] sm:$0xff] }
 0x223   :  { %3824 = vmatpush1.bf16.msra.mxu1 %v5052_v19  ;;  %3855 = vmatprep.mubr.bf16.mxu1 %v5682_v54  ;;  %v5085_v54 = vcombine.high %v527_v4, %v531_v6  ;;  %v5100_v19 = vcombine.low %v543_v26, %v547_v53  ;;  %v563_v52 = vld [vmem:[#allocation6 + $0xe38] sm:$0xff]  ;;  %v3893_v26 = vlaneseq }
 0x224   :  { %3825 = vmatprep.subr.bf16.mxu1 %v5061_v48  ;;  %v571_v63 = vld [vmem:[#allocation6 + $0xe78] sm:$0xff] }
 0x225   :  { %3785 = vmatpush1.bf16.msra.mxu0 %v4932_v9  ;;  %v4980_v9 = vcombine.low %v423_v33, %v427_v34  ;;  %v451_v3 = vld [vmem:[#allocation6 + $0xab8] sm:$0xff] }
 0x226   :  { %3786 = vmatprep.subr.bf16.mxu0 %v4941_v56  ;;  %v4989_v56 = vcombine.high %v431_v50, %v435_v51  ;;  %v575_v4 = vld [vmem:[#allocation6 + $0xe98] sm:$0xff] }
 0x227   :  { %3826 = vmatpush1.bf16.msra.mxu1 %v5060_v55  ;;  %v5108_v55 = vcombine.low %v551_v40, %v555_v41  ;;  %v579_v6 = vld [vmem:[#allocation6 + $0xeb8] sm:$0xff] }
 0x228   :  { %3827 = vmatprep.subr.bf16.mxu1 %v5069_v57  ;;  %v455_v11 = vld [vmem:[#allocation6 + $0xad8] sm:$0xff] }
 0x229   :  { %3787 = vmatpush1.bf16.msra.mxu0 %v4940_v16  ;;  %v4988_v16 = vcombine.low %v431_v50, %v435_v51  ;;  %v459_v12 = vld [vmem:[#allocation6 + $0xaf8] sm:$0xff] }
 0x22a   :  { %3788 = vmatprep.subr.bf16.mxu0 %v4949_v0  ;;  %v4997_v0 = vcombine.high %v439_v60, %v443_v61  ;;  %v583_v14 = vld [vmem:[#allocation6 + $0xed8] sm:$0xff] }
 0x22b   :  { %3828 = vmatpush1.bf16.msra.mxu1 %v5068_v20  ;;  %v587_v15 = vld [vmem:[#allocation6 + $0xef8] sm:$0xff] }
 0x22c   :  { %3829 = vmatprep.subr.bf16.mxu1 %v5077_v1  ;;  %v5125_v1 = vcombine.high %v567_v62, %v571_v63  ;;  %v463_v24 = vld [vmem:[#allocation6 + $0xb18] sm:$0xff] }
 0x22d   :  { %3789 = vmatpush1.bf16.msra.mxu0 %v4948_v7  ;;  %v4996_v7 = vcombine.low %v439_v60, %v443_v61  ;;  %v467_v25 = vld [vmem:[#allocation6 + $0xb38] sm:$0xff] }
 0x22e   :  { %3790 = vmatprep.subr.bf16.mxu0 %v4957_v10  ;;  %v5005_v10 = vcombine.high %v447_v2, %v451_v3  ;;  %v591_v53 = vld [vmem:[#allocation6 + $0xf18] sm:$0xff]  ;;  %v5020_v40 = vcombine.low %v463_v24, %v467_v25 }
 0x22f   :  { %3830 = vmatpush1.bf16.msra.mxu1 %v5076_v29  ;;  %v5124_v29 = vcombine.low %v567_v62, %v571_v63  ;;  %v471_v33 = vld [vmem:[#allocation6 + $0xb58] sm:$0xff] }
 0x230   :  { %3831 = vmatprep.subr.bf16.mxu1 %v5085_v54  ;;  %v5133_v54 = vcombine.high %v575_v4, %v579_v6  ;;  %v475_v34 = vld [vmem:[#allocation6 + $0xb78] sm:$0xff] }
 0x231   :  { %3791 = vmatpush1.bf16.msra.mxu0 %v4956_v17  ;;  %v5004_v17 = vcombine.low %v447_v2, %v451_v3  ;;  %v5345_v3 = vld [vmem:[#allocation9 + $0x40] sm:$0xff]  }
 0x232   :  { %3792 = vmatprep.subr.bf16.mxu0 %v4965_v21  ;;  %v5013_v21 = vcombine.high %v455_v11, %v459_v12 }
 0x233   :  { %3832 = vmatpush1.bf16.msra.mxu1 %v5084_v18  ;;  %v3488_v31 = vpop.f32.mrb[12].mxu0  ;;  %v5132_v18 = vcombine.low %v575_v4, %v579_v6  ;;  %v5346_v4 = vld [vmem:[#allocation9 + $0xc0] sm:$0xff]  }
 0x234   :  { %3833 = vmatprep.subr.bf16.mxu1 %v5093_v23  ;;  %v3489_v35 = vadd.f32 %v3488_v31, %v5725_v8  ;;  %v3490_v37 = vpop.f32.mrb[13].mxu0  ;;  %v5141_v23 = vcombine.high %v583_v14, %v587_v15  ;;  %v5021_v31 = vcombine.high %v463_v24, %v467_v25  ;;  %v5360_v24 = vld [vmem:[#allocation9 + $0x98] sm:$0xff]   ;;  %v5361_v25 = vld [vmem:[#allocation9 + $0x60] sm:$0xff]  }
 0x235   :  { %v3529_v36 = vpop.f32.mrb[12].mxu1  ;;  %v3491_v42 = vadd.f32 %v3490_v37, %v5727_v13  ;;  %v3492_v44 = vpop.f32.mrb[14].mxu0  ;;  %3793 = vmatpush1.bf16.msra.mxu0 %v4964_v27  ;;  %v559_v13 = vld [vmem:[#allocation6 + $0xe18] sm:$0xff] }
 0x236   :  { %v3531_v43 = vpop.f32.mrb[13].mxu1  ;;  %v5735_v45 = vadd.f32 %v3529_v36, %v3489_v35  ;;  %v3493_v47 = vpop.f32.mrb[15].mxu0  ;;  %3794 = vmatprep.subr.bf16.mxu0 %v4973_v30  ;;  %v5117_v57 = vcombine.high %v559_v13, %v563_v52  ;;  %v5116_v20 = vcombine.low %v559_v13, %v563_v52  ;;  %v595_v27 = vld [vmem:[#allocation6 + $0xf38] sm:$0xff]  ;;  %v5140_v30 = vcombine.low %v583_v14, %v587_v15  ;;  %v5352_v14 = vld [vmem:[#allocation9 + $0x88] sm:$0xff]  }
 0x237   :  { %v3533_v59 = vpop.f32.mrb[14].mxu1  ;;  %3834 = vmatpush1.bf16.msra.mxu1 %v5092_v28  ;;  %v5737_v48 = vadd.f32 %v3531_v43, %v3491_v42  ;;  %v5012_v28 = vcombine.low %v455_v11, %v459_v12  ;;  %v5739_v35 = vshrl.u32 %v3893_v26, 7  ;;  %v599_v36 = vld [vmem:[#allocation6 + $0xf58] sm:$0xff]  ;;  %v5148_v41 = vcombine.low %v591_v53, %v595_v27  ;;  %v5351_v12 = vld [vmem:[#allocation9 + $0x8] sm:$0xff]   ;;  %v5362_v26 = vld [vmem:[#allocation9 + $0xe0] sm:$0xff]  }
 0x238   :  { %v3534_v8 = vpop.f32.mrb[15].mxu1  ;;  %3835 = vmatprep.subr.bf16.mxu1 %v5101_v32  ;;  %v5149_v32 = vcombine.high %v591_v53, %v595_v27  ;;  %v603_v37 = vld [vmem:[#allocation6 + $0xf78] sm:$0xff]  ;;  %v5029_v42 = vcombine.high %v471_v33, %v475_v34  ;;  %v5363_v53 = vld [vmem:[#allocation9 + $0x20] sm:$0xff]  }
 0x239   :  { %3795 = vmatpush1.bf16.msra.mxu0 %v4972_v58  ;;  %v5157_v43 = vcombine.high %v599_v36, %v603_v37  ;;  %v479_v44 = vld [vmem:[#allocation6 + $0xb98] sm:$0xff]  ;;  %v3899_v59 = vsub.s32 1, %v5739_v35  ;;  %v3907_v8 = vsub.s32 3, %v5739_v35  ;;  %v5156_v50 = vcombine.low %v599_v36, %v603_v37  ;;  %v5368_v36 = vld [vmem:[#allocation9 + $0xa8] sm:$0xff]  }
 0x23a   :  { %3796 = vmatprep.subr.bf16.mxu0 %v4981_v22  ;;  %v483_v58 = vld [vmem:[#allocation6 + $0xbb8] sm:$0xff]  ;;  %v5742_v22 = vld [vmem:[#allocation8] sm:$0xff]  ;;  %v3895_v27 = vsub.s32 0, %v5739_v35 }
 0x23b   :  { %3836 = vmatpush1.bf16.msra.mxu1 %v5100_v19  ;;  %v607_v47 = vld [vmem:[#allocation6 + $0xf98] sm:$0xff]  ;;  %v5037_v51 = vcombine.high %v479_v44, %v483_v58  ;;  %v3908_v60 = vrot.slane %v5742_v22, %v3907_v8  ;;  %v5036_v61 = vcombine.low %v479_v44, %v483_v58 }
 0x23c   :  { %3837 = vmatprep.subr.bf16.mxu1 %v5109_v5  ;;  %v611_v19 = vld [vmem:[#allocation6 + $0xfb8] sm:$0xff]  ;;  %v5028_v5 = vcombine.low %v471_v33, %v475_v34  ;;  %v5367_v33 = vld [vmem:[#allocation9 + $0x28] sm:$0xff]   ;;  %v3896_v34 = vrot.slane %v5742_v22, %v3895_v27 }
 0x23d   :  { %3797 = vmatpush1.bf16.msra.mxu0 %v4980_v9  ;;  %v5165_v13 = vcombine.high %v607_v47, %v611_v19  ;;  %v487_v52 = vld [vmem:[#allocation6 + $0xbd8] sm:$0xff]  ;;  %v5164_v62 = vcombine.low %v607_v47, %v611_v19 }
 0x23e   :  { %3798 = vmatprep.subr.bf16.mxu0 %v4989_v56  ;;  %v491_v9 = vld [vmem:[#allocation6 + $0xbf8] sm:$0xff]  ;;  %v3933_v8 = vadd.f32 %v3896_v34, %v5717_v46  ;;  %v5377_v46 = vld [vmem:[#allocation9 + $0x140] sm:$0xff]  }
 0x23f   :  { %3838 = vmatpush1.bf16.msra.mxu1 %v5108_v55  ;;  %v3900_v55 = vrot.slane %v5742_v22, %v3899_v59  ;;  %v615_v56 = vld [vmem:[#allocation6 + $0xfd8] sm:$0xff]  ;;  %v5045_v63 = vcombine.high %v487_v52, %v491_v9 }
 0x240   :  { %3839 = vmatprep.subr.bf16.mxu1 %v5117_v57  ;;  %v619_v57 = vld [vmem:[#allocation6 + $0xff8] sm:$0xff] }
 0x241   :  { %3799 = vmatpush1.bf16.msra.mxu0 %v4988_v16  ;;  %v5173_v16 = vcombine.high %v615_v56, %v619_v57  ;;  %v5172_v2 = vcombine.low %v615_v56, %v619_v57  ;;  %v5353_v15 = vld [vmem:[#allocation9 + $0x50] sm:$0xff]   ;;  %v5374_v56 = vld [vmem:[#allocation9 + $0xf8] sm:$0xff]  }
 0x242   :  { %3800 = vmatprep.subr.bf16.mxu0 %v4997_v0  ;;  %v3936_v0 = vadd.f32 %v3908_v60, %v5737_v48  ;;  %v5350_v48 = vld [vmem:[#allocation9 + $0xc8] sm:$0xff]   ;;  %v5369_v37 = vld [vmem:[#allocation9 + $0x70] sm:$0xff]   ;;  %v5375_v57 = vld [vmem:[#allocation9 + $0x38] sm:$0xff]   ;;  %v3941_v60 = vmax.f32 %v3933_v8, 0.0 }
 0x243   :  { %3840 = vmatpush1.bf16.msra.mxu1 %v5116_v20  ;;  %v3934_v20 = vadd.f32 %v3900_v55, %v5719_v49  ;;  %v5371_v19 = vld [vmem:[#allocation9 + $0x30] sm:$0xff]  }
 0x244   :  { %3841 = vmatprep.subr.bf16.mxu1 %v5125_v1  ;;  %v5044_v1 = vcombine.low %v487_v52, %v491_v9  ;;  %v5373_v52 = vld [vmem:[#allocation9 + $0x78] sm:$0xff]   ;;  %v5406_v8 = vld [vmem:[#allocation9 + $0x1b0] sm:$0xff]  }
 0x245   :  { %3801 = vmatpush1.bf16.msra.mxu0 %v4996_v7  ;;  %v3942_v6 = vmax.f32 %v3934_v20, 0.0  ;;  %v3944_v7 = vmax.f32 %v3936_v0, 0.0  ;;  %v3949_v20 = vpack.c.bf16 %v3941_v60, %v3941_v60  ;;  %v5379_v0 = vld [vmem:[#allocation9 + $0x148] sm:$0xff]  }
 0x246   :  { %3802 = vmatprep.subr.bf16.mxu0 %v5005_v10  ;;  %v5348_v10 = vld [vmem:[#allocation9 + $0x80] sm:$0xff]  }
 0x247   :  { %3842 = vmatpush1.bf16.msra.mxu1 %v5124_v29  ;;  %v5347_v29 = vld [vmem:[#allocation9] sm:$0xff]   ;;  %v3950_v49 = vpack.c.bf16 %v3942_v6, %v3942_v6  ;;  %v3952_v11 = vpack.c.bf16 %v3944_v7, %v3944_v7  ;;  %v5396_v6 = vld [vmem:[#allocation9 + $0x188] sm:$0xff]   ;;  %v5397_v7 = vld [vmem:[#allocation9 + $0x1d0] sm:$0xff]  }
 0x248   :  { %3843 = vmatprep.subr.bf16.mxu1 %v5133_v54  ;;  %v5349_v54 = vld [vmem:[#allocation9 + $0x48] sm:$0xff]  }
 0x249   :  { %3803 = vmatpush1.bf16.msra.mxu0 %v5004_v17  ;;  %v5354_v17 = vld [vmem:[#allocation9 + $0xd0] sm:$0xff]  }
 0x24a   :  { %3804 = vmatprep.subr.bf16.mxu0 %v5013_v21  ;;  %v5356_v21 = vld [vmem:[#allocation9 + $0x90] sm:$0xff]  }
 0x24b   :  { %3844 = vmatpush1.bf16.msra.mxu1 %v5132_v18  ;;  %v5355_v18 = vld [vmem:[#allocation9 + $0x10] sm:$0xff]  }
 0x24c   :  { %3845 = vmatprep.subr.bf16.mxu1 %v5141_v23  ;;  %v5358_v23 = vld [vmem:[#allocation9 + $0xd8] sm:$0xff]  }
 0x24d   :  { %3805 = vmatpush1.bf16.msra.mxu0 %v5012_v28  ;;  %v5364_v28 = vld [vmem:[#allocation9 + $0xa0] sm:$0xff]  }
 0x24e   :  { %3806 = vmatprep.subr.bf16.mxu0 %v5021_v31  ;;  %v3903_v31 = vsub.s32 2, %v5739_v35 }
 0x24f   :  { %3846 = vmatpush1.bf16.msra.mxu1 %v5140_v30  ;;  %v5365_v30 = vld [vmem:[#allocation9 + $0x68] sm:$0xff]  }
 0x250   :  { %3847 = vmatprep.subr.bf16.mxu1 %v5149_v32  ;;  %v5366_v32 = vld [vmem:[#allocation9 + $0xe8] sm:$0xff]  }
 0x251   :  { %3807 = vmatpush1.bf16.msra.mxu0 %v5020_v40  ;;  %v3904_v40 = vrot.slane %v5742_v22, %v3903_v31 }
 0x252   :  { %3808 = vmatprep.subr.bf16.mxu0 %v5029_v42  ;;  %v5370_v42 = vld [vmem:[#allocation9 + $0xf0] sm:$0xff]  }
 0x253   :  { %3848 = vmatpush1.bf16.msra.mxu1 %v5148_v41  ;;  %v3935_v9 = vadd.f32 %v3904_v40, %v5735_v45  ;;  %v5394_v45 = vld [vmem:[#allocation9 + $0x180] sm:$0xff]   ;;  %v5404_v40 = vld [vmem:[#allocation9 + $0x1a8] sm:$0xff]  }
 0x254   :  { %3849 = vmatprep.subr.bf16.mxu1 %v5157_v43 }
 0x255   :  { %3809 = vmatpush1.bf16.msra.mxu0 %v5028_v5 }
 0x256   :  { %3810 = vmatprep.subr.bf16.mxu0 %v5037_v51 }
 0x257   :  { %3850 = vmatpush1.bf16.msra.mxu1 %v5156_v50 }
 0x258   :  { %3851 = vmatprep.subr.bf16.mxu1 %v5165_v13  ;;  %v5372_v13 = vld [vmem:[#allocation9 + $0xb0] sm:$0xff]  }
 0x259   :  { %3811 = vmatpush1.bf16.msra.mxu0 %v5036_v61  ;;  %v5376_v61 = vld [vmem:[#allocation9 + $0xb8] sm:$0xff]  }
 0x25a   :  { %3812 = vmatprep.subr.bf16.mxu0 %v5045_v63  ;;  %v5393_v63 = vld [vmem:[#allocation9 + $0x1c0] sm:$0xff]  }
 0x25b   :  { %3852 = vmatpush1.bf16.msra.mxu1 %v5164_v62  ;;  %v3943_v62 = vmax.f32 %v3935_v9, 0.0 }
 0x25c   :  { %3853 = vmatprep.subr.bf16.mxu1 %v5173_v16  ;;  %v5378_v16 = vld [vmem:[#allocation9 + $0x100] sm:$0xff]  }
 0x25d   :  { %3813 = vmatpush1.bf16.msra.mxu0 %v5044_v1  ;;  %v3951_v1 = vpack.c.bf16 %v3943_v62, %v3943_v62 }
 0x25e   :  { %5239 = vmatprep.subr.bf16.mxu0 %v5345_v3  ;;  %v5380_v3 = vld [vmem:[#allocation9 + $0x108] sm:$0xff]  }
 0x25f   :  { %3854 = vmatpush1.bf16.msra.mxu1 %v5172_v2  ;;  %v5395_v2 = vld [vmem:[#allocation9 + $0x1c8] sm:$0xff]  }
 0x260   :  { %5261 = vmatprep.subr.bf16.mxu1 %v5346_v4  ;;  %3815 = vmatmul.mubr.bf16.vlgmr.msra.gmra.mrb[28].mxu0 %v5689_v38  ;;  %v5357_v38 = vld [vmem:[#allocation9 + $0x58] sm:$0xff]   ;;  %v5381_v4 = vld [vmem:[#allocation9 + $0x150] sm:$0xff]  }
 0x261   :  { %5240 = vmatpush3.bf16.msra.mxu0 %v5347_v29  ;;  %4508 = vmatprep.mubr.bf16.mxu0 %v3950_v49  ;;  %v5382_v29 = vld [vmem:[#allocation9 + $0x110] sm:$0xff]   ;;  %v5399_v49 = vld [vmem:[#allocation9 + $0x1d8] sm:$0xff]  }
 0x262   :  { %3856 = vmatmul.mubr.bf16.vlgmr.msra.gmra.mrb[28].mxu1 %v5693_v39  ;;  %5241 = vmatprep.subr.bf16.mxu0 %v5349_v54  ;;  %v5359_v39 = vld [vmem:[#allocation9 + $0x18] sm:$0xff]   ;;  %v5398_v54 = vld [vmem:[#allocation9 + $0x190] sm:$0xff]  }
 0x263   :  { %5262 = vmatpush3.bf16.msra.mxu1 %v5348_v10  ;;  %4548 = vmatprep.mubr.bf16.mxu1 %v3952_v11  ;;  %v5383_v10 = vld [vmem:[#allocation9 + $0x158] sm:$0xff]   ;;  %v5385_v11 = vld [vmem:[#allocation9 + $0x160] sm:$0xff]  }
 0x264   :  { %5263 = vmatprep.subr.bf16.mxu1 %v5350_v48  ;;  %v5384_v48 = vld [vmem:[#allocation9 + $0x118] sm:$0xff]  }
 0x265   :  { %5242 = vmatpush3.bf16.msra.mxu0 %v5351_v12  ;;  %v5400_v12 = vld [vmem:[#allocation9 + $0x198] sm:$0xff]  }
 0x266   :  { %5243 = vmatprep.subr.bf16.mxu0 %v5353_v15  ;;  %v5386_v15 = vld [vmem:[#allocation9 + $0x120] sm:$0xff]  }
 0x267   :  { %5264 = vmatpush3.bf16.msra.mxu1 %v5352_v14  ;;  %v5401_v14 = vld [vmem:[#allocation9 + $0x1e0] sm:$0xff]  }
 0x268   :  { %5265 = vmatprep.subr.bf16.mxu1 %v5354_v17  ;;  %v5387_v17 = vld [vmem:[#allocation9 + $0x168] sm:$0xff]  }
 0x269   :  { %5244 = vmatpush3.bf16.msra.mxu0 %v5355_v18  ;;  %v5402_v18 = vld [vmem:[#allocation9 + $0x1a0] sm:$0xff]  }
 0x26a   :  { %5245 = vmatprep.subr.bf16.mxu0 %v5357_v38  ;;  %v5389_v38 = vld [vmem:[#allocation9 + $0x170] sm:$0xff]  }
 0x26b   :  { %5266 = vmatpush3.bf16.msra.mxu1 %v5356_v21  ;;  %v5388_v21 = vld [vmem:[#allocation9 + $0x128] sm:$0xff]  }
 0x26c   :  { %5267 = vmatprep.subr.bf16.mxu1 %v5358_v23  ;;  %v5390_v23 = vld [vmem:[#allocation9 + $0x130] sm:$0xff]  }
 0x26d   :  { %5246 = vmatpush3.bf16.msra.mxu0 %v5359_v39  ;;  %v5391_v39 = vld [vmem:[#allocation9 + $0x178] sm:$0xff]  }
 0x26e   :  { %5247 = vmatprep.subr.bf16.mxu0 %v5361_v25  ;;  %v3911_v25 = vsub.s32 4, %v5739_v35 }
 0x26f   :  { %5268 = vmatpush3.bf16.msra.mxu1 %v5360_v24  ;;  %v5392_v24 = vld [vmem:[#allocation9 + $0x138] sm:$0xff]  }
 0x270   :  { %5269 = vmatprep.subr.bf16.mxu1 %v5362_v26  ;;  %v3915_v26 = vsub.s32 5, %v5739_v35 }
 0x271   :  { %5248 = vmatpush3.bf16.msra.mxu0 %v5363_v53 }
 0x272   :  { %5249 = vmatprep.subr.bf16.mxu0 %v5365_v30  ;;  %v3912_v30 = vrot.slane %v5742_v22, %v3911_v25 }
 0x273   :  { %5270 = vmatpush3.bf16.msra.mxu1 %v5364_v28  ;;  %v3570_v41 = vpop.f32.mrb[16].mxu0 }
 0x274   :  { %5271 = vmatprep.subr.bf16.mxu1 %v5366_v32  ;;  %v3572_v44 = vpop.f32.mrb[17].mxu0  ;;  %v5403_v32 = vld [vmem:[#allocation9 + $0x1e8] sm:$0xff]  }
 0x275   :  { %v3611_v43 = vpop.f32.mrb[16].mxu1  ;;  %v3574_v47 = vpop.f32.mrb[18].mxu0  ;;  %5250 = vmatpush3.bf16.msra.mxu0 %v5367_v33 }
 0x276   :  { %v5755_v58 = vadd.f32 %v3611_v43, %v3570_v41  ;;  %v3613_v59 = vpop.f32.mrb[17].mxu1  ;;  %v3575_v51 = vpop.f32.mrb[19].mxu0  ;;  %5251 = vmatprep.subr.bf16.mxu0 %v5369_v37  ;;  %v5405_v47 = vld [vmem:[#allocation9 + $0x1f0] sm:$0xff]  }
 0x277   :  { %v5758_v5 = vadd.f32 %v3613_v59, %v3572_v44  ;;  %v3615_v50 = vpop.f32.mrb[18].mxu1  ;;  %5272 = vmatpush3.bf16.msra.mxu1 %v5368_v36  ;;  %v3916_v36 = vrot.slane %v5742_v22, %v3915_v26 }
 0x278   :  { %v3616_v55 = vpop.f32.mrb[19].mxu1  ;;  %5273 = vmatprep.subr.bf16.mxu1 %v5370_v42 }
 0x279   :  { %5252 = vmatpush3.bf16.msra.mxu0 %v5371_v19 }
 0x27a   :  { %5253 = vmatprep.subr.bf16.mxu0 %v5373_v52  ;;  %v5408_v52 = vld [vmem:[#allocation9 + $0x1b8] sm:$0xff]  }
 0x27b   :  { %5274 = vmatpush3.bf16.msra.mxu1 %v5372_v13 }
 0x27c   :  { %5275 = vmatprep.subr.bf16.mxu1 %v5374_v56 }
 0x27d   :  { %5254 = vmatpush3.bf16.msra.mxu0 %v5375_v57 }
 0x27e   :  { %5283 = vmatprep.subr.bf16.mxu0 %v5377_v46 }
 0x27f   :  { %5276 = vmatpush3.bf16.msra.mxu1 %v5376_v61 }
 0x280   :  { %5305 = vmatprep.subr.bf16.mxu1 %v5393_v63  ;;  %4509 = vmatmul.mubr.bf16.vlgmr.msra.gmra.mrb[32].mxu0 %v3949_v20 }
 0x281   :  { %5284 = vmatpush3.bf16.msra.mxu0 %v5378_v16 }
 0x282   :  { %4549 = vmatmul.mubr.bf16.vlgmr.msra.gmra.mrb[32].mxu1 %v3951_v1  ;;  %5285 = vmatprep.subr.bf16.mxu0 %v5379_v0  ;;  %v3919_v0 = vsub.s32 6, %v5739_v35 }
 0x283   :  { %5306 = vmatpush3.bf16.msra.mxu1 %v5394_v45  ;;  %v3923_v45 = vsub.s32 7, %v5739_v35 }
 0x284   :  { %5307 = vmatprep.subr.bf16.mxu1 %v5395_v2 }
 0x285   :  { %5286 = vmatpush3.bf16.msra.mxu0 %v5380_v3 }
 0x286   :  { %5287 = vmatprep.subr.bf16.mxu0 %v5381_v4  ;;  %v3920_v4 = vrot.slane %v5742_v22, %v3919_v0 }
 0x287   :  { %5308 = vmatpush3.bf16.msra.mxu1 %v5396_v6 }
 0x288   :  { %5309 = vmatprep.subr.bf16.mxu1 %v5397_v7 }
 0x289   :  { %5288 = vmatpush3.bf16.msra.mxu0 %v5382_v29 }
 0x28a   :  { %5289 = vmatprep.subr.bf16.mxu0 %v5383_v10  ;;  %v3924_v10 = vrot.slane %v5742_v22, %v3923_v45 }
 0x28b   :  { %5310 = vmatpush3.bf16.msra.mxu1 %v5398_v54 }
 0x28c   :  { %5311 = vmatprep.subr.bf16.mxu1 %v5399_v49 }
 0x28d   :  { %5290 = vmatpush3.bf16.msra.mxu0 %v5384_v48 }
 0x28e   :  { %5291 = vmatprep.subr.bf16.mxu0 %v5385_v11 }
 0x28f   :  { %5312 = vmatpush3.bf16.msra.mxu1 %v5400_v12 }
 0x290   :  { %5313 = vmatprep.subr.bf16.mxu1 %v5401_v14 }
 0x291   :  { %5292 = vmatpush3.bf16.msra.mxu0 %v5386_v15 }
 0x292   :  { %5293 = vmatprep.subr.bf16.mxu0 %v5387_v17 }
 0x293   :  { %5314 = vmatpush3.bf16.msra.mxu1 %v5402_v18 }
 0x294   :  { %5315 = vmatprep.subr.bf16.mxu1 %v5403_v32 }
 0x295   :  { %5294 = vmatpush3.bf16.msra.mxu0 %v5388_v21 }
 0x296   :  { %5295 = vmatprep.subr.bf16.mxu0 %v5389_v38 }
 0x297   :  { %5316 = vmatpush3.bf16.msra.mxu1 %v5404_v40 }
 0x298   :  { %5317 = vmatprep.subr.bf16.mxu1 %v5405_v47 }
 0x299   :  { %5296 = vmatpush3.bf16.msra.mxu0 %v5390_v23 }
 0x29a   :  { %5297 = vmatprep.subr.bf16.mxu0 %v5391_v39 }
 0x29b   :  { %5318 = vmatpush3.bf16.msra.mxu1 %v5406_v8 }
 0x29d   :  { %5298 = vmatpush3.bf16.msra.mxu0 %v5392_v24  ;;  %v5174_v24 = vld [vmem:[#allocation11] ss:$0 sm:$0xff] }
 0x2b3   :  { %v3652_v53 = vpop.f32.mrb[20].mxu0 }
 0x2b4   :  { %v3653_v27 = vadd.f32 %v3652_v53, %v5755_v58  ;;  %v3654_v31 = vpop.f32.mrb[21].mxu0 }
 0x2b5   :  { %v3693_v28 = vpop.f32.mrb[20].mxu1  ;;  %v3655_v33 = vadd.f32 %v3654_v31, %v5758_v5  ;;  %v3656_v37 = vpop.f32.mrb[22].mxu0  ;;  %v5407_v5 = vld [vmem:[#allocation9 + $0x1f8] sm:$0xff]  }
 0x2b6   :  { %v3695_v34 = vpop.f32.mrb[21].mxu1  ;;  %v3694_v41 = vadd.f32 %v3693_v28, %v3653_v27  ;;  %v3657_v43 = vpop.f32.mrb[23].mxu0  ;;  %5319 = vmatprep.subr.bf16.mxu1 %v5407_v5 }
 0x2b7   :  { %v3697_v42 = vpop.f32.mrb[22].mxu1  ;;  %v3696_v44 = vadd.f32 %v3695_v34, %v3655_v33  ;;  %5320 = vmatpush3.bf16.msra.mxu1 %v5408_v52 }
 0x2b8   :  { %v3698_v59 = vpop.f32.mrb[23].mxu1  ;;  %v3937_v58 = vadd.f32 %v3912_v30, %v3694_v41 }
 0x2b9   :  { %v3938_v19 = vadd.f32 %v3916_v36, %v3696_v44 }
 0x2ba   :  { %v3945_v50 = vmax.f32 %v3937_v58, 0.0 }
 0x2bb   :  { %v3946_v51 = vmax.f32 %v3938_v19, 0.0 }
 0x2bc   :  { %v3953_v9 = vpack.c.bf16 %v3945_v50, %v3945_v50 }
 0x2bd   :  { %v3954_v13 = vpack.c.bf16 %v3946_v51, %v3946_v51 }
 0x2bf   :  { %4588 = vmatprep.mubr.bf16.mxu0 %v3954_v13 }
 0x2c0   :  { %4589 = vmatmul.mubr.bf16.vlgmr.msra.gmra.mrb[36].mxu0 %v3953_v9 }
 0x2f3   :  { %v3734_v55 = vpop.f32.mrb[24].mxu0 }
 0x2f4   :  { %v3736_v57 = vpop.f32.mrb[25].mxu0 }
 0x2f5   :  { %v3775_v56 = vpop.f32.mrb[24].mxu1  ;;  %v3738_v46 = vpop.f32.mrb[26].mxu0 }
 0x2f6   :  { %v3776_v60 = vadd.f32 %v3775_v56, %v3734_v55  ;;  %v3777_v61 = vpop.f32.mrb[25].mxu1  ;;  %v3739_v16 = vpop.f32.mrb[27].mxu0 }
 0x2f7   :  { %v3778_v62 = vadd.f32 %v3777_v61, %v3736_v57  ;;  %v3779_v63 = vpop.f32.mrb[26].mxu1 }
 0x2f8   :  { %v3780_v20 = vpop.f32.mrb[27].mxu1 }
 0x333   :  { %v3816_v1 = vpop.f32.mrb[28].mxu0 }
 0x334   :  { %v3817_v2 = vadd.f32 %v3816_v1, %v3776_v60  ;;  %v3818_v6 = vpop.f32.mrb[29].mxu0 }
 0x335   :  { %v3857_v3 = vpop.f32.mrb[28].mxu1  ;;  %v3819_v7 = vadd.f32 %v3818_v6, %v3778_v62  ;;  %v3820_v54 = vpop.f32.mrb[30].mxu0 }
 0x336   :  { %v3859_v29 = vpop.f32.mrb[29].mxu1  ;;  %v3858_v49 = vadd.f32 %v3857_v3, %v3817_v2  ;;  %v3821_v11 = vpop.f32.mrb[31].mxu0 }
 0x337   :  { %v3861_v48 = vpop.f32.mrb[30].mxu1  ;;  %v3860_v12 = vadd.f32 %v3859_v29, %v3819_v7 }
 0x338   :  { %v3862_v14 = vpop.f32.mrb[31].mxu1  ;;  %v3939_v15 = vadd.f32 %v3920_v4, %v3858_v49 }
 0x339   :  { %v3940_v17 = vadd.f32 %v3924_v10, %v3860_v12 }
 0x33a   :  { %v3947_v18 = vmax.f32 %v3939_v15, 0.0 }
 0x33b   :  { %v3948_v35 = vmax.f32 %v3940_v17, 0.0 }
 0x33c   :  { %v3955_v38 = vpack.c.bf16 %v3947_v18, %v3947_v18 }
 0x33d   :  { %v3956_v21 = vpack.c.bf16 %v3948_v35, %v3948_v35 }
 0x33f   :  { %4628 = vmatprep.mubr.bf16.mxu1 %v3956_v21 }
 0x340   :  { %4629 = vmatmul.mubr.bf16.vlgmr.msra.gmra.mrb[36].mxu1 %v3955_v38 }
 0x353   :  { %v5255_v23 = vpop.f32.mrb[32].mxu0 }
 0x354   :  { %v5256_v25 = vpop.f32.mrb[33].mxu0 }
 0x355   :  { %v5277_v39 = vpop.f32.mrb[32].mxu1  ;;  %v5257_v26 = vadd.f32 %v5256_v25, %v5255_v23  ;;  %v5258_v53 = vpop.f32.mrb[34].mxu0 }
 0x356   :  { %v5278_v22 = vpop.f32.mrb[33].mxu1  ;;  %v5259_v30 = vpop.f32.mrb[35].mxu0 }
 0x357   :  { %v5279_v27 = vadd.f32 %v5278_v22, %v5277_v39  ;;  %v5280_v28 = vpop.f32.mrb[34].mxu1  ;;  %v4511_v31 = vadd.f32 %v5257_v26, %v5174_v24 }
 0x358   :  { %v5281_v32 = vpop.f32.mrb[35].mxu1 }
 0x359   :  { %v4551_v33 = vadd.f32 %v5279_v27, %v4511_v31 }
 0x393   :  { %v5299_v34 = vpop.f32.mrb[36].mxu0 }
 0x394   :  { %v5300_v36 = vpop.f32.mrb[37].mxu0 }
 0x395   :  { %v5301_v37 = vadd.f32 %v5300_v36, %v5299_v34  ;;  %v5302_v40 = vpop.f32.mrb[38].mxu0 }
 0x396   :  { %v5303_v41 = vpop.f32.mrb[39].mxu0 }
 0x397   :  { %v4591_v42 = vadd.f32 %v5301_v37, %v4551_v33 }
 0x413   :  { %v5321_v43 = vpop.f32.mrb[36].mxu1 }
 0x414   :  { %v5322_v44 = vpop.f32.mrb[37].mxu1 }
 0x415   :  { %v5323_v59 = vadd.f32 %v5322_v44, %v5321_v43  ;;  %v5324_v58 = vpop.f32.mrb[38].mxu1 }
 0x416   :  { %v5325_v47 = vpop.f32.mrb[39].mxu1 }
 0x417   :  { %v4631_v19 = vadd.f32 %v5323_v59, %v4591_v42 }
 0x419   :  { %4636 = vst [vmem:[#allocation12] sm:$0xff] %v4631_v19 }
 0x41a   :  { %5530 = shalt.err (!%p5527_p2)
}
 0x41b   :  { %s5531_s6 = scalar_lea.hbm %s5788_s5, 128 }
 0x41c   :  { %p5532_p3 = scmp.ne.s32.totalorder %s5788_s5, %s5531_s6  ;;  %p5535_p4 = scmp.lt.u32.totalorder %s5531_s6, %s5788_s5 }
 0x41e   :  { %p5537_p5 = pnand %p5535_p4, %p5532_p3 }
 0x420   :  { %5540 = shalt.err (!%p5537_p5)
}
 0x421   :  { %4646 = dma.vmem_to_hbm [thread:$0]  %s4644_s28, 128, %s5788_s5, [#allocation5]  }
 0x422   :  { %5547 = dma.done.wait [#allocation5], 128  }
 0x423   :  { %5548 = vsyncadd [#allocation5], 4294967168 }
 0x424   :  { %4650 = vsyncpa [#allocation4], 1 }
 0x425   :  { %4651 = vsyncpa [#allocation7], 1 }
 0x426   :  { %4652 = vsyncpa [#allocation10], 1 }
 0x427   :  { %4653 = vsyncpa [#allocation5], 1 }

</bundles_post_ra>
